<compile_context>
chip_gen: v5e
topology: v5e:2x2
jax: 0.10.0
libtpu: 0.0.40
codegen_flags: <defaults>
</compile_context>

<pallas_src>
import math

import jax
import jax.numpy as jnp
from jax import lax
from jax.experimental import pallas as pl
from jax.experimental.pallas import tpu as pltpu

_NEG_INF = -1e30  # finite "minus infinity": avoids inf/NaN corner cases


# ---------------------------------------------------------------------------
# Kernels 1/3 and 3/3: tiled  out = x @ w + b   (bf16 MXU operands, f32 accum)
# ---------------------------------------------------------------------------
def _matmul_bias_kernel(x_ref, w_ref, b_ref, o_ref, acc_ref):
    k = pl.program_id(2)

    @pl.when(k == 0)
    def _init():
        acc_ref[...] = jnp.zeros_like(acc_ref)

    acc_ref[...] += jnp.dot(x_ref[...], w_ref[...],
                            preferred_element_type=jnp.float32)

    @pl.when(k == pl.num_programs(2) - 1)
    def _finalize():
        o_ref[...] = (acc_ref[...] + b_ref[...]).astype(o_ref.dtype)


def _pick_tile(dim, candidates=(512, 384, 256, 128)):
    for c in candidates:
        if dim % c == 0:
            return c
    raise ValueError(f"dimension {dim} must be a multiple of 128")
    # TODO(synk): pad/mask edge tiles for dims that are not multiples of 128.


def _matmul_bias(x, w, b, *, out_dtype):
    """x: (M,K) bf16, w: (K,N) bf16, b: (N,) f32  ->  (M,N) out_dtype."""
    M, K = x.shape
    Kw, N = w.shape
    assert K == Kw and b.shape == (N,)
    tm, tn, tk = _pick_tile(M), _pick_tile(N), _pick_tile(K)
    b2 = b.reshape(1, N).astype(jnp.float32)

    return pl.pallas_call(
        _matmul_bias_kernel,
        out_shape=jax.ShapeDtypeStruct((M, N), out_dtype),
        grid_spec=pltpu.PrefetchScalarGridSpec(
            num_scalar_prefetch=0,
            grid=(M // tm, N // tn, K // tk),
            in_specs=[
                pl.BlockSpec((tm, tk), lambda i, j, k: (i, k)),   # x tile (bf16)
                pl.BlockSpec((tk, tn), lambda i, j, k: (k, j)),   # w tile (bf16)
                pl.BlockSpec((1, tn), lambda i, j, k: (0, j)),    # bias tile (f32)
            ],
            out_specs=pl.BlockSpec((tm, tn), lambda i, j, k: (i, j)),
            scratch_shapes=[pltpu.VMEM((tm, tn), jnp.float32)],
        ),
        compiler_params=pltpu.CompilerParams(
            dimension_semantics=("parallel", "parallel", "arbitrary")),
    )(x, w, b2)


# ---------------------------------------------------------------------------
# Kernel 2/3: causal flash attention reading heads directly from (B, T, 3C).
# Grid = (B, H, step) where step enumerates only the lower-triangular (qi, ki)
# tiles; qi/ki come from scalar-prefetched SMEM maps.
# ---------------------------------------------------------------------------
def _flash_attn_kernel(qmap_ref, kmap_ref, q_ref, k_ref, v_ref, o_ref,
                       m_sc, l_sc, acc_sc):
    s_idx = pl.program_id(2)
    qi = qmap_ref[s_idx]
    ki = kmap_ref[s_idx]
    is_diag = ki == qi            # diagonal tile == last kv step for this q tile

    @pl.when(ki == 0)
    def _init():
        m_sc[...] = jnp.full(m_sc.shape, _NEG_INF, dtype=m_sc.dtype)
        l_sc[...] = jnp.zeros_like(l_sc)
        acc_sc[...] = jnp.zeros_like(acc_sc)

    q = q_ref[...]                # (blk, hd) bf16, 1/sqrt(hd) already folded in
    k = k_ref[...]                # (blk, hd) bf16
    v = v_ref[...]                # (blk, hd) bf16

    # scores = q @ k^T  (contract over head_dim), f32 accumulation on the MXU.
    s = lax.dot_general(q, k, (((1,), (1,)), ((), ())),
                        preferred_element_type=jnp.float32)   # (blk_q, blk_k)

    def _online_softmax_update(scores):
        m_prev = m_sc[...]
        m_new = jnp.maximum(m_prev, jnp.max(scores, axis=-1, keepdims=True))
        alpha = jnp.exp(m_prev - m_new)
        p = jnp.exp(scores - m_new)
        l_sc[...] = alpha * l_sc[...] + jnp.sum(p, axis=-1, keepdims=True)
        acc_sc[...] = alpha * acc_sc[...] + jnp.dot(
            p.astype(jnp.bfloat16), v, preferred_element_type=jnp.float32)
        m_sc[...] = m_new

    @pl.when(jnp.logical_not(is_diag))
    def _off_diag():              # strictly-lower tile: fully unmasked
        _online_softmax_update(s)

    @pl.when(is_diag)
    def _diag():                  # diagonal tile: causal mask + finalize
        bq, bk = s.shape
        row = lax.broadcasted_iota(jnp.int32, (bq, bk), 0)
        col = lax.broadcasted_iota(jnp.int32, (bq, bk), 1)
        _online_softmax_update(jnp.where(col <= row, s, _NEG_INF))
        inv_l = pl.reciprocal(l_sc[...], approx=True)   # EUP, off the VALU path
        o_ref[...] = (acc_sc[...] * inv_l).astype(o_ref.dtype)


def _flash_attention(qkv, *, n_head, head_dim, blk, out_c):
    """qkv: (B, T_pad, 3C) bf16 -> (B, T_pad, C) bf16 (heads in column blocks)."""
    B, T_pad, _ = qkv.shape
    H, hd = n_head, head_dim
    nq = T_pad // blk

    # Only the causally-live lower-triangular (qi, ki) tiles are visited.
    steps = [(qi, ki) for qi in range(nq) for ki in range(qi + 1)]
    qmap = jnp.asarray([st[0] for st in steps], dtype=jnp.int32)
    kmap = jnp.asarray([st[1] for st in steps], dtype=jnp.int32)
    n_steps = len(steps)

    q_spec = pl.BlockSpec((None, blk, hd),
                          lambda b, h, s, qm, km: (b, qm[s], h))
    k_spec = pl.BlockSpec((None, blk, hd),
                          lambda b, h, s, qm, km: (b, km[s], H + h))
    v_spec = pl.BlockSpec((None, blk, hd),
                          lambda b, h, s, qm, km: (b, km[s], 2 * H + h))
    o_spec = pl.BlockSpec((None, blk, hd),
                          lambda b, h, s, qm, km: (b, qm[s], h))

    return pl.pallas_call(
        _flash_attn_kernel,
        out_shape=jax.ShapeDtypeStruct((B, T_pad, out_c), jnp.bfloat16),
        grid_spec=pltpu.PrefetchScalarGridSpec(
            num_scalar_prefetch=2,
            grid=(B, H, n_steps),
            in_specs=[q_spec, k_spec, v_spec],
            out_specs=o_spec,
            scratch_shapes=[
                pltpu.VMEM((blk, 1), jnp.float32),    # running max  m
                pltpu.VMEM((blk, 1), jnp.float32),    # running sum  l
                pltpu.VMEM((blk, hd), jnp.float32),   # output accumulator
            ],
        ),
        compiler_params=pltpu.CompilerParams(
            dimension_semantics=("parallel", "parallel", "arbitrary")),
    )(qmap, kmap, qkv, qkv, qkv)


# ---------------------------------------------------------------------------
# Full forward: matches CausalAttention.forward
# ---------------------------------------------------------------------------
def causal_attention(x, w_qkv, b_qkv, w_proj, b_proj, *, n_head):
    """x: (B,T,C) f32; w_qkv: (C,3C); b_qkv: (3C,); w_proj: (C,C); b_proj: (C,)."""
    B, T, C = x.shape
    assert C % n_head == 0
    hd = C // n_head
    assert C % 128 == 0, "n_embd must be a multiple of 128 for this kernel"
    # TODO(synk): support head_dim % 128 != 0 (e.g. GPT-2's 64) by grouping two
    # heads per lane-dense block or padding the head dimension.
    assert hd % 128 == 0, "head_dim must be a multiple of 128 for fused head reads"

    # Fold 1/sqrt(hd) into the q columns of the QKV weight/bias (one-time cost,
    # removes the per-step rescale of q inside the attention kernel).
    scale = 1.0 / math.sqrt(hd)
    col_scale = jnp.concatenate([jnp.full((C,), scale, jnp.float32),
                                 jnp.ones((2 * C,), jnp.float32)])
    w_qkv_bf = (w_qkv.astype(jnp.float32) * col_scale[None, :]).astype(jnp.bfloat16)
    b_qkv_f32 = b_qkv.astype(jnp.float32) * col_scale
    w_proj_bf = w_proj.astype(jnp.bfloat16)
    b_proj_f32 = b_proj.astype(jnp.float32)

    # Attention tile size; pad T up to a multiple of it.  Zero-padded key rows
    # are never attended by real query rows (causal mask: col <= row < T), and
    # padded query rows are sliced off at the end.
    blk = 128 if T <= 128 else 256
    T_pad = ((T + blk - 1) // blk) * blk
    x_bf = x.astype(jnp.bfloat16)
    if T_pad != T:
        x_bf = jnp.pad(x_bf, ((0, 0), (0, T_pad - T), (0, 0)))

    # 1) Fused QKV projection over all B*T_pad rows -> (B, T_pad, 3C) bf16.
    qkv = _matmul_bias(x_bf.reshape(B * T_pad, C), w_qkv_bf, b_qkv_f32,
                       out_dtype=jnp.bfloat16)
    qkv = qkv.reshape(B, T_pad, 3 * C)

    # 2) Causal flash attention, heads read straight out of the qkv layout and
    #    output written straight into merged-head (B, T_pad, C) layout.
    y = _flash_attention(qkv, n_head=n_head, head_dim=hd, blk=blk, out_c=C)

    # 3) Output projection (f32 output to match the module's dtype).
    out = _matmul_bias(y.reshape(B * T_pad, C), w_proj_bf, b_proj_f32,
                       out_dtype=jnp.float32)
    out = out.reshape(B, T_pad, C)
    if T_pad != T:
        out = out[:, :T]
    return out


def _reference(x, w_qkv, b_qkv, w_proj, b_proj, n_head):
    """Pure-JAX f32 reference mirroring the PyTorch forward exactly."""
    B, T, C = x.shape
    hd = C // n_head
    qkv = x @ w_qkv + b_qkv
    q, k, v = jnp.split(qkv, 3, axis=2)
    q = q.reshape(B, T, n_head, hd).transpose(0, 2, 1, 3)
    k = k.reshape(B, T, n_head, hd).transpose(0, 2, 1, 3)
    v = v.reshape(B, T, n_head, hd).transpose(0, 2, 1, 3)
    att = jnp.einsum("bhqd,bhkd->bhqk", q, k) * (1.0 / math.sqrt(hd))
    mask = jnp.tril(jnp.ones((T, T), dtype=bool))
    att = jnp.where(mask[None, None], att, -jnp.inf)
    att = jax.nn.softmax(att, axis=-1)
    y = jnp.einsum("bhqk,bhkd->bhqd", att, v)
    y = y.transpose(0, 2, 1, 3).reshape(B, T, C)
    return y @ w_proj + b_proj


if __name__ == "__main__":
    # Small TPU-friendly config: C multiple of 128, head_dim = 128 (lane-dense).
    # T = 384 exercises the pad-to-256 path and multiple q/kv tiles.
    B, T, C, n_head = 2, 384, 256, 2

    key = jax.random.PRNGKey(0)
    kx, k1, k2, k3, k4 = jax.random.split(key, 5)

    x = jax.random.normal(kx, (B, T, C), dtype=jnp.float32)

    bound = 1.0 / math.sqrt(C)   # nn.Linear default init range
    w_qkv = jax.random.uniform(k1, (C, 3 * C), jnp.float32, -bound, bound)
    b_qkv = jax.random.uniform(k2, (3 * C,), jnp.float32, -bound, bound)
    w_proj = jax.random.uniform(k3, (C, C), jnp.float32, -bound, bound)
    b_proj = jax.random.uniform(k4, (C,), jnp.float32, -bound, bound)

    out = causal_attention(x, w_qkv, b_qkv, w_proj, b_proj, n_head=n_head)
    out = jax.block_until_ready(out)

    ref = _reference(x, w_qkv, b_qkv, w_proj, b_proj, n_head)
    assert out.shape == (B, T, C)
    # bf16 activations / MXU operands with f32 accumulation -> loose tolerance.
    err = float(jnp.max(jnp.abs(out - ref)))
    assert jnp.allclose(out, ref, atol=7e-2, rtol=7e-2), err

    print("KERNEL_OK")
</pallas_src>

<mosaic_0001>
module attributes {stable_mosaic.version = 11 : i64} {
  func.func @_matmul_bias_kernel(%arg0: i32, %arg1: i32, %arg2: i32, %arg3: memref<512x256xbf16, #tpu.memory_space<vmem>>, %arg4: memref<256x384xbf16, #tpu.memory_space<vmem>>, %arg5: memref<1x384xf32, #tpu.memory_space<vmem>>, %arg6: memref<512x384xbf16, #tpu.memory_space<vmem>>, %arg7: memref<512x384xf32, #tpu.memory_space<vmem>>) attributes {dimension_semantics = [#tpu.dimension_semantics<parallel>, #tpu.dimension_semantics<parallel>, #tpu.dimension_semantics<arbitrary>], iteration_bounds = array<i64: 2, 2, 1>, scalar_prefetch = 0 : i64, scratch_operands = 1 : i64, tpu.core_type = #tpu.core_type<tc>, window_params = [{transform_indices = @transform_0, window_bounds = array<i64: 512, 256>}, {transform_indices = @transform_1, window_bounds = array<i64: 256, 384>}, {transform_indices = @transform_2, window_bounds = array<i64: 1, 384>}, {transform_indices = @transform_3, window_bounds = array<i64: 512, 384>}]} {
    %c0_i32 = arith.constant 0 : i32
    %0 = arith.cmpi eq, %arg2, %c0_i32 : i32
    %1 = arith.extui %0 : i1 to i32
    %c0_i32_0 = arith.constant 0 : i32
    %2 = arith.cmpi ne, %1, %c0_i32_0 : i32
    scf.if %2 {
      %cst_10 = arith.constant 0.000000e+00 : f32
      %12 = vector.broadcast %cst_10 : f32 to vector<512x384xf32>
      %c0_11 = arith.constant 0 : index
      %c0_12 = arith.constant 0 : index
      %13 = vector.load %arg7[%c0_11, %c0_12] : memref<512x384xf32, #tpu.memory_space<vmem>>, vector<512x384xf32>
      tpu.vector_store %arg7[%c0_11, %c0_12], %12 {strides = array<i32>} : memref<512x384xf32, #tpu.memory_space<vmem>>, vector<512x384xf32>,
    } else {
    }
    %c0 = arith.constant 0 : index
    %c0_1 = arith.constant 0 : index
    %3 = vector.load %arg7[%c0, %c0_1] : memref<512x384xf32, #tpu.memory_space<vmem>>, vector<512x384xf32>
    %c0_2 = arith.constant 0 : index
    %c0_3 = arith.constant 0 : index
    %4 = vector.load %arg3[%c0_2, %c0_3] : memref<512x256xbf16, #tpu.memory_space<vmem>>, vector<512x256xbf16>
    %c0_4 = arith.constant 0 : index
    %c0_5 = arith.constant 0 : index
    %5 = vector.load %arg4[%c0_4, %c0_5] : memref<256x384xbf16, #tpu.memory_space<vmem>>, vector<256x384xbf16>
    %cst = arith.constant dense<0.000000e+00> : vector<512x384xf32>
    %6 = tpu.matmul %4, %5, %cst {dimension_numbers = #tpu.dot_dimension_numbers<[1], [0], [0], [1], [0, 0, 1, 1], [], []>} : vector<512x256xbf16>, vector<256x384xbf16>, vector<512x384xf32> -> vector<512x384xf32>
    %7 = arith.addf %3, %6 : vector<512x384xf32>
    %c0_6 = arith.constant 0 : index
    %c0_7 = arith.constant 0 : index
    %8 = vector.load %arg7[%c0_6, %c0_7] : memref<512x384xf32, #tpu.memory_space<vmem>>, vector<512x384xf32>
    tpu.vector_store %arg7[%c0_6, %c0_7], %7 {strides = array<i32>} : memref<512x384xf32, #tpu.memory_space<vmem>>, vector<512x384xf32>,
    %c0_i32_8 = arith.constant 0 : i32
    %9 = arith.cmpi eq, %arg2, %c0_i32_8 : i32
    %10 = arith.extui %9 : i1 to i32
    %c0_i32_9 = arith.constant 0 : i32
    %11 = arith.cmpi ne, %10, %c0_i32_9 : i32
    scf.if %11 {
      %c0_10 = arith.constant 0 : index
      %c0_11 = arith.constant 0 : index
      %12 = vector.load %arg7[%c0_10, %c0_11] : memref<512x384xf32, #tpu.memory_space<vmem>>, vector<512x384xf32>
      %c0_12 = arith.constant 0 : index
      %c0_13 = arith.constant 0 : index
      %13 = vector.load %arg5[%c0_12, %c0_13] : memref<1x384xf32, #tpu.memory_space<vmem>>, vector<1x384xf32>
      %14 = vector.broadcast %13 : vector<1x384xf32> to vector<512x384xf32>
      %15 = arith.addf %12, %14 : vector<512x384xf32>
      %16 = arith.truncf %15 : vector<512x384xf32> to vector<512x384xbf16>
      %c0_14 = arith.constant 0 : index
      %c0_15 = arith.constant 0 : index
      %17 = vector.load %arg6[%c0_14, %c0_15] : memref<512x384xbf16, #tpu.memory_space<vmem>>, vector<512x384xbf16>
      tpu.vector_store %arg6[%c0_14, %c0_15], %16 {strides = array<i32>} : memref<512x384xbf16, #tpu.memory_space<vmem>>, vector<512x384xbf16>,
    } else {
    }
    return
  }
  func.func @transform_0(%arg0: i32, %arg1: i32, %arg2: i32) -> (i32, i32) {
    %c0_i32 = arith.constant 0 : i32
    return %arg0, %arg2 : i32, i32
  }
  func.func @transform_1(%arg0: i32, %arg1: i32, %arg2: i32) -> (i32, i32) {
    %c0_i32 = arith.constant 0 : i32
    return %arg2, %arg1 : i32, i32
  }
  func.func @transform_2(%arg0: i32, %arg1: i32, %arg2: i32) -> (i32, i32) {
    %c0_i32 = arith.constant 0 : i32
    %c0_i32_0 = arith.constant 0 : i32
    return %c0_i32, %arg1 : i32, i32
  }
  func.func @transform_3(%arg0: i32, %arg1: i32, %arg2: i32) -> (i32, i32) {
    %c0_i32 = arith.constant 0 : i32
    return %arg0, %arg1 : i32, i32
  }
}

</mosaic_0001>

<bundles_post_ra>
// kernel: tpu_custom_call.1
= control target key start
LH: loop header
LB: loop body
LE: loop exit
PB: predicated region body
PF: predicated region fallthrough
CT: control target
= control target key end

     0   :  { %s5968_s0 = inlined_call_operand.hbm [shape: bf16[1024,256], index: 0, kind: input, shape index: {}]   ;;  %s5969_s1 = inlined_call_operand.hbm [shape: bf16[256,768], index: 1, kind: input, shape index: {}]   ;;  %s5970_s2 = inlined_call_operand.hbm [shape: f32[1,768], index: 2, kind: input, shape index: {}]   ;;  %s5971_s3 = inlined_call_operand.hbm [shape: bf16[1024,768], index: 3, kind: output, shape index: {}]  }
   0x1   :  { %6043 = sst [smem:[#allocation89_spill]] %s5968_s0 }
   0x2   :  { %6044 = sst [smem:[#allocation90_spill]] %s5969_s1 }
   0x3   :  { %6045 = sst [smem:[#allocation91_spill]] %s5971_s3 }
   0x4   :  { %8 = vsyncpa [#allocation4], 0 }
   0x5   :  { %10 = vsyncpa [#allocation4 + $0x1], 0 }
   0x6   :  { %11 = vsyncpa [#allocation7], 0 }
   0x7   :  { %13 = vsyncpa [#allocation7 + $0x1], 0 }
   0x8   :  { %14 = vsyncpa [#allocation5], 0 }
   0x9   :  { %16 = vsyncpa [#allocation5 + $0x1], 0  ;;  %s4621_s12 = smov 0   ;;  %s4623_s13 = smov 0  }
   0xa   :  { %s4625_s14 = smov 0   ;;  %s4627_s15 = smov 0  }
   0xb   :  { %s4629_s16 = smov 0   ;;  %s4631_s17 = smov 0  }
   0xc   :  { %s4633_s18 = smov 0   ;;  %s4635_s19 = smov 0  }
   0xd   :  { %s4637_s20 = smov 0   ;;  %s4639_s21 = smov 0  }
   0xe   :  { %s4641_s22 = smov 0   ;;  %s4643_s23 = smov 0  }
   0xf   :  { %s4645_s24 = smov 0   ;;  %s4647_s25 = smov 0  }
  0x10 LB: > { %6046 = sst [smem:[#allocation13_spill]] %s4539_s12  ;;  %s37_s26 = sadd.s32 1, %s4583_s23  ;;  %s4591_s25 = sphi %s4647_s25, %s22_s25   ;;  %s4587_s24 = sphi %s4645_s24, %s6210_s24   ;;  %s4583_s23 = sphi %s4643_s23, %s6219_s23   ;;  %s4579_s22 = sphi %s4641_s22, %s6208_s22   ;;  %s4575_s21 = sphi %s4639_s21, %s6218_s21   ;;  %s4571_s20 = sphi %s4637_s20, %s6207_s20   ;;  %s4567_s19 = sphi %s4635_s19, %s6217_s19   ;;  %s4563_s18 = sphi %s4633_s18, %s6216_s18   ;;  %s4559_s17 = sphi %s4631_s17, %s6215_s17   ;;  %s4555_s16 = sphi %s4629_s16, %s6214_s16   ;;  %s4551_s15 = sphi %s4627_s15, %s6213_s15   ;;  %s4547_s14 = sphi %s4625_s14, %s6204_s14   ;;  %s4543_s13 = sphi %s4623_s13, %s6212_s13   ;;  %s4539_s12 = sphi %s4621_s12, %s6211_s12  }
  0x11   : > { %6047 = sst [smem:[#allocation14_spill]] %s4547_s14  ;;  %p58_p0 = scmp.eq.s32.totalorder %s4591_s25, 0 }
  0x12   : > { %6048 = sst [smem:[#allocation15_spill]] %s4571_s20  ;;  %p85_p1 = scmp.ne.s32.totalorder %s4559_s17, %s4555_s16 }
  0x13   : > { %6049 = sst [smem:[#allocation16_spill]] %s4579_s22  ;;  %p91_p2 = scmp.ne.s32.totalorder %s4555_s16, %s4551_s15 }
  0x14   : > { %6050 = sst [smem:[#allocation17_spill]] %s4587_s24  ;;  %p87_p3 = por %p85_p1, %p58_p0 }
  0x15   : > { %p4229_p4 = scmp.lt.s32.totalorder %s4591_s25, 4  ;;  %s194_s28 = sand.u32 1, %s4591_s25  }
  0x16   : > { %s5972_s29 = sand.u32 1, %s4559_s17   ;;  %s4072_s4 = smul.u32 12, %s4583_s23 }
  0x17   : > { %s4201_s30 = smul.u32 384, %s5972_s29  ;;  %p4708_p5 = pnand %p4229_p4, %p87_p3 }
  0x18   : > { %s6052_s1 = sld [smem:[#allocation90_spill]]  ;;  %s4715_s29 = scalar_lea.sflag [#allocation7], %s194_s28 }
  0x19   : > { %s198_s9 = scalar_lea.vmem [#allocation6], %s4201_s30  ;;  %s4593_s6 = smov 384  }
  0x1a   : > { %s209_s10 = sshll.u32 %s198_s9, 4  ;;  %s4594_s7 = smov 192   ;;  %s210_s10 = int_to_ptr.vmem [resolvable:$true] %s209_s10 }
  0x1b   : > { %p3615_p6 = scmp.ge.s32.totalorder %s4591_s25, 1  ;;  %p236_p7 = scmp.lt.s32.totalorder %s4591_s25, 5 }
  0x1c   : > { %s3607_s28 = sadd.s32 4294967294, %s4591_s25   ;;  %p39_p9 = scmp.ge.s32.totalorder %s37_s26, 2 }
  0x1d   : > { %p4722_p8 = pnand %p3615_p6, %p236_p7  ;;  %s41_s9 = sadd.s32 1, %s4587_s24 }
  0x1e   : > { %s206_s8 = scalar_lea.hbm %s6052_s1, %s4072_s4  ;;  %s4595_s4 = smov 12  }
  0x1f   : > { %s207_s11 = sshll.u32 %s206_s8, 4  ;;  %s4727_s8 = sadd.s32 4294967295, %s4591_s25   ;;  %s208_s11 = int_to_ptr.hbm [resolvable:$true] %s207_s11 }
  0x20   : > { %4221 = dma.hbm_to_vmem [thread:$0]  (!%p4708_p5), %s208_s11, 6144, %s210_s10, %s4715_s29, %s4593_s6, %s4594_s7, %s4595_s4  }
  0x21   : > { %s50_s27 = sadd.s32 1, %s4571_s20  ;;  %s6221_s26 = smov (%p39_p9, %s37_s26), 0 }
  0x22   : > { %6054 = sst [smem:[#allocation18_spill]] %s6221_s26  ;;  %s6223_s9 = smov (!%p39_p9, %s41_s9), %s4587_s24 }
  0x23   : > { %p57_p10 = scmp.ne.s32.totalorder %s4571_s20, %s4567_s19  ;;  %p63_p11 = scmp.ne.s32.totalorder %s4567_s19, %s4563_s18 }
  0x24   : > { %p43_p12 = scmp.ge.s32.totalorder %s6223_s9, 2  ;;  %p64_p13 = scmp.eq.s32.totalorder %s4727_s8, 0 }
  0x25   : > { %p4746_p1 = por %p58_p0, %p57_p10  ;;  %s74_s11 = ssub.s32 %s4583_s23, %s6221_s26 }
  0x26   : > { %s6225_s9 = smov (%p43_p12, %s6223_s9), 0  ;;  %p4754_p3 = por %p64_p13, %p63_p11 }
  0x27   : > { %6056 = sst [smem:[#allocation19_spill]] %s6225_s9  ;;  %p76_p6 = scmp.eq.s32.totalorder %s74_s11, 0 }
  0x28   : > { %s45_s18 = ssub.s32 %s4587_s24, %s6225_s9  ;;  %p4763_p7 = por %p91_p2, %p64_p13 }
  0x29   : > { %p48_p0 = scmp.eq.s32.totalorder %s45_s18, 0  ;;  %s129_s4 = sor.u32 %s74_s11, %s45_s18 }
  0x2a   : > { %s6059_s1 = sadd.s32 1, %s4559_s17  ;;  %p130_p9 = scmp.eq.s32.totalorder %s129_s4, 0 }
  0x2b   : > { %s4770_s26 = scalar_select %p76_p6, %s4559_s17, %s6059_s1  }
  0x2c   : > { %s4773_s3 = scalar_select %p48_p0, %s4571_s20, %s50_s27  }
  0x2d   : > { %6060 = sst [smem:[#allocation20_spill]] %s4770_s26  ;;  %s132_s22 = sadd.s32 1, %s4547_s14 }
  0x2e   : > { %6061 = sst [smem:[#allocation21_spill]] %s4773_s3  ;;  %p142_p10 = scmp.ne.s32.totalorder %s4547_s14, %s4543_s13 }
  0x2f   : > { %p143_p11 = scmp.eq.s32.totalorder %s4727_s8, 3  ;;  %p148_p12 = scmp.ne.s32.totalorder %s4543_s13, %s4539_s12 }
  0x30   : > { %s4780_s9 = scalar_select %p130_p9, %s4547_s14, %s132_s22  }
  0x31   : > { %p4782_p2 = por %p143_p11, %p142_p10  ;;  %p149_p13 = scmp.eq.s32.totalorder %s3607_s28, 3 }
  0x32   : > { %6062 = sst [smem:[#allocation22_spill]] %s4780_s9  ;;  %s169_s11 = sand.u32 1, %s4571_s20  }
  0x33   : > { %s6063_s15 = scalar_select %p4782_p2, 1, 0 }
  0x34   : > { %s3610_s1 = sshll.u32 %s169_s11, 9  ;;  %p4789_p6 = por %p149_p13, %p148_p12 }
  0x35   : > { %6064 = sst [smem:[#allocation23_spill]] %s6063_s15  ;;  %s4071_s18 = sshll.u32 %s4587_s24, 9 }
  0x36   : > { %s6065_s27 = scalar_select %p4789_p6, 1, 0 }
  0x37   : > { %s173_s4 = scalar_lea.vmem [#allocation3], %s3610_s1  ;;  %s6067_s0 = sld [smem:[#allocation89_spill]] }
  0x38   : > { %6066 = sst [smem:[#allocation24_spill]] %s6065_s27  ;;  %s184_s3 = sshll.u32 %s173_s4, 4  ;;  %s185_s3 = int_to_ptr.vmem [resolvable:$true] %s184_s3 }
  0x39   : > { %p4216_p0 = pnand %p4229_p4, %p4746_p1  ;;  %s170_s28 = scalar_lea.sflag [#allocation4], %s169_s11 }
  0x3a   : > { %s4596_s20 = smov 128   ;;  %s4597_s12 = smov 8  }
  0x3b   : > { %s6068_s27 = sand.u32 1, %s4559_s17   ;;  %s224_s1 = smul.u32 3, %s4583_s23 }
  0x3c   : > { %s4202_s24 = smul.u32 3, %s6068_s27 }
  0x3d   : > { %s181_s9 = scalar_lea.hbm %s6067_s0, %s4071_s18  ;;  %s227_s26 = scalar_lea.hbm %s5970_s2, %s224_s1 }
  0x3e   : > { %s182_s14 = sshll.u32 %s181_s9, 4  ;;  %s223_s18 = scalar_lea.vmem [#allocation8], %s4202_s24  ;;  %s183_s14 = int_to_ptr.hbm [resolvable:$true] %s182_s14 }
  0x3f   : > { %4218 = dma.hbm_to_vmem [thread:$0]  (!%p4216_p0), %s183_s14, 8192, %s185_s3, %s170_s28, %s4596_s20, %s4596_s20, %s4597_s12  }
  0x40   : > { %s231_s22 = sshll.u32 %s223_s18, 4  ;;  %s229_s0 = sshll.u32 %s227_s26, 4  ;;  %s232_s22 = int_to_ptr.vmem [resolvable:$true] %s231_s22  ;;  %s230_s0 = int_to_ptr.hbm [resolvable:$true] %s229_s0 }
  0x41   : > { %4224 = dma.hbm_to_vmem [thread:$0]  (!%p4708_p5), %s230_s0, 48, %s232_s22, %s4715_s29  }
  0x42   : > { %240 = sbr.rel (%p4722_p8) target bundleno = 1020 (0x3fc), region = 32 }
  0x47   : > { %s242_s3 = sand.u32 1, %s4567_s19  }
  0x48   : > { %s3616_s12 = sshll.u32 %s242_s3, 9  ;;  %s243_s14 = scalar_lea.sflag [#allocation4], %s242_s3 }
  0x49   : > { %s4813_s20 = scalar_lea.vmem [#allocation3], %s3616_s12 }
  0x4a   : > { %4526 = dma.done.wait (%p4754_p3), %s243_s14, 8192  }
  0x4b   : > { %4528 = vsyncadd (%p4754_p3), %s243_s14, 4294959104  ;;  %s252_s0 = sand.u32 1, %s4727_s8   ;;  %s254_s24 = sand.u32 1, %s4555_s16  }
  0x4c   : > { %s4203_s29 = smul.u32 384, %s254_s24  ;;  %s253_s5 = scalar_lea.sflag [#allocation7], %s252_s0 }
  0x4e   : > { %s4823_s30 = scalar_lea.vmem [#allocation6], %s4203_s29 }
  0x4f   : > { %4530 = dma.done.wait (%p4763_p7), %s253_s5, 6192  }
  0x50   : > { %4532 = vsyncadd (%p4763_p7), %s253_s5, 4294961104  ;;  %v3959_v0 = vld [vmem:[%s4823_s30 + $0xa8] sm:$0xf]  ;;  %v4159_v1 = vld [vmem:[%s4823_s30 + $0xb0] sm:$0xf0]  ;;  %s4204_s8 = smul.u32 3, %s254_s24 }
  0x51   : > { %v4055_v2 = vld [vmem:[%s4823_s30 + $0x168] sm:$0xf]  ;;  %v3960_v3 = vor.u32 %v4159_v1, %v3959_v0  ;;  %v4183_v4 = vld [vmem:[%s4823_s30 + $0x170] sm:$0xf0]  ;;  %v3947_v5 = vld [vmem:[%s4823_s30 + $0x90] sm:$0xf] }
  0x52   : > { %v4156_v6 = vld [vmem:[%s4823_s30 + $0x98] sm:$0xf0]  ;;  %v4056_v7 = vor.u32 %v4183_v4, %v4055_v2  ;;  %v4043_v8 = vld [vmem:[%s4823_s30 + $0x150] sm:$0xf]  ;;  %v3935_v12 = vld [vmem:[%s4823_s30 + $0x78] sm:$0xf] }
  0x53   : > { %v4180_v9 = vld [vmem:[%s4823_s30 + $0x158] sm:$0xf0]  ;;  %1399 = vmatpush.bf16.msra.mxu0 %v3960_v3  ;;  %4185 = vmatpush.bf16.msra.mxu2 %v3960_v3  ;;  %v3948_v10 = vor.u32 %v4156_v6, %v3947_v5  ;;  %v4153_v13 = vld [vmem:[%s4823_s30 + $0x80] sm:$0xf0]  ;;  %v4031_v14 = vld [vmem:[%s4823_s30 + $0x138] sm:$0xf] }
  0x54   : > { %1568 = vmatpush.bf16.msra.mxu1 %v4056_v7  ;;  %4193 = vmatpush.bf16.msra.mxu3 %v4056_v7  ;;  %v4044_v11 = vor.u32 %v4180_v9, %v4043_v8  ;;  %v4177_v15 = vld [vmem:[%s4823_s30 + $0x140] sm:$0xf0]  ;;  %v3936_v16 = vor.u32 %v4153_v13, %v3935_v12  ;;  %v3923_v18 = vld [vmem:[%s4823_s30 + $0x60] sm:$0xf]  ;;  %v4150_v19 = vld [vmem:[%s4823_s30 + $0x68] sm:$0xf0] }
  0x55   : > { %v4032_v17 = vor.u32 %v4177_v15, %v4031_v14  ;;  %v4019_v20 = vld [vmem:[%s4823_s30 + $0x120] sm:$0xf]  ;;  %v4174_v21 = vld [vmem:[%s4823_s30 + $0x128] sm:$0xf0]  ;;  %v3924_v22 = vor.u32 %v4150_v19, %v3923_v18  ;;  %v3911_v24 = vld [vmem:[%s4823_s30 + $0x48] sm:$0xf] }
  0x56   : > { %v4020_v23 = vor.u32 %v4174_v21, %v4019_v20  ;;  %v4147_v25 = vld [vmem:[%s4823_s30 + $0x50] sm:$0xf0]  ;;  %v4007_v26 = vld [vmem:[%s4823_s30 + $0x108] sm:$0xf]  ;;  %v3899_v30 = vld [vmem:[%s4823_s30 + $0x30] sm:$0xf] }
  0x57   : > { %1400 = vmatpush.bf16.msra.mxu0 %v3948_v10  ;;  %4186 = vmatpush.bf16.msra.mxu2 %v3948_v10  ;;  %v4171_v27 = vld [vmem:[%s4823_s30 + $0x110] sm:$0xf0]  ;;  %v3912_v28 = vor.u32 %v4147_v25, %v3911_v24  ;;  %v4144_v31 = vld [vmem:[%s4823_s30 + $0x38] sm:$0xf0]  ;;  %v3995_v32 = vld [vmem:[%s4823_s30 + $0xf0] sm:$0xf] }
  0x58   : > { %1569 = vmatpush.bf16.msra.mxu1 %v4044_v11  ;;  %4194 = vmatpush.bf16.msra.mxu3 %v4044_v11  ;;  %v4008_v29 = vor.u32 %v4171_v27, %v4007_v26  ;;  %v4168_v33 = vld [vmem:[%s4823_s30 + $0xf8] sm:$0xf0]  ;;  %v3900_v34 = vor.u32 %v4144_v31, %v3899_v30  ;;  %v3887_v36 = vld [vmem:[%s4823_s30 + $0x18] sm:$0xf]  ;;  %v4141_v37 = vld [vmem:[%s4823_s30 + $0x20] sm:$0xf0] }
  0x59   : > { %v3996_v35 = vor.u32 %v4168_v33, %v3995_v32  ;;  %v3983_v38 = vld [vmem:[%s4823_s30 + $0xd8] sm:$0xf]  ;;  %v4165_v39 = vld [vmem:[%s4823_s30 + $0xe0] sm:$0xf0]  ;;  %v3888_v40 = vor.u32 %v4141_v37, %v3887_v36  ;;  %v3875_v41 = vld [vmem:[%s4823_s30] sm:$0xf] }
  0x5a   : > { %v3984_v42 = vor.u32 %v4165_v39, %v3983_v38  ;;  %v4138_v43 = vld [vmem:[%s4823_s30 + $0x8] sm:$0xf0]  ;;  %v3971_v44 = vld [vmem:[%s4823_s30 + $0xc0] sm:$0xf]  ;;  %v4074_v47 = vld [vmem:[%s4813_s20 + $0x4] sm:$0xf0] }
  0x5b   : > { %1401 = vmatpush.bf16.msra.mxu0 %v3936_v16  ;;  %4187 = vmatpush.bf16.msra.mxu2 %v3936_v16  ;;  %v4162_v45 = vld [vmem:[%s4823_s30 + $0xc8] sm:$0xf0]  ;;  %v3619_v46 = vld [vmem:[%s4813_s20] sm:$0xf]  ;;  %v3961_v50 = vld [vmem:[%s4823_s30 + $0xb4] sm:$0xf0]  ;;  %v3876_v53 = vor.u32 %v4138_v43, %v3875_v41 }
  0x5c   : > { %1570 = vmatpush.bf16.msra.mxu1 %v4032_v17  ;;  %4195 = vmatpush.bf16.msra.mxu3 %v4032_v17  ;;  %v3747_v48 = vld [vmem:[%s4813_s20 + $0x100] sm:$0xf]  ;;  %v4158_v49 = vld [vmem:[%s4823_s30 + $0xac] sm:$0xf]  ;;  %v4057_v52 = vld [vmem:[%s4823_s30 + $0x174] sm:$0xf0]  ;;  %v3972_v57 = vor.u32 %v4162_v45, %v3971_v44  ;;  %v4877_v2 = vor.u32 %v4074_v47, %v3619_v46 }
  0x5d   : > { %v4182_v51 = vld [vmem:[%s4823_s30 + $0x16c] sm:$0xf]  ;;  %v4106_v54 = vld [vmem:[%s4813_s20 + $0x104] sm:$0xf0]  ;;  %v4073_v55 = vld [vmem:[%s4813_s20 + $0x4] sm:$0xf]  ;;  %v3964_v61 = vor.u32 %v4158_v49, %v3961_v50 }
  0x5e   : > { %v3621_v56 = vld [vmem:[%s4813_s20 + $0x8] sm:$0xf0]  ;;  %v4105_v58 = vld [vmem:[%s4813_s20 + $0x104] sm:$0xf]  ;;  %v3967_v60 = vld [vmem:[%s4823_s30 + $0xb0] sm:$0xf]  ;;  %v4060_v62 = vor.u32 %v4182_v51, %v4057_v52  ;;  %v4879_v3 = vor.u32 %v4106_v54, %v3747_v48 }
  0x5f   : > { %1402 = vmatpush.bf16.msra.mxu0 %v3924_v22  ;;  %4188 = vmatpush.bf16.msra.mxu2 %v3924_v22  ;;  %v3749_v59 = vld [vmem:[%s4813_s20 + $0x108] sm:$0xf0]  ;;  %v4160_v63 = vld [vmem:[%s4823_s30 + $0xb8] sm:$0xf0]  ;;  %v4063_v0 = vld [vmem:[%s4823_s30 + $0x170] sm:$0xf]  ;;  %v4881_v4 = vor.u32 %v4073_v55, %v3621_v56 }
  0x60   : > { %1571 = vmatpush.bf16.msra.mxu1 %v4020_v23  ;;  %4196 = vmatpush.bf16.msra.mxu3 %v4020_v23  ;;  %v4184_v1 = vld [vmem:[%s4823_s30 + $0x178] sm:$0xf0]  ;;  %v4883_v5 = vor.u32 %v4105_v58, %v3749_v59  ;;  %v3968_v6 = vor.u32 %v4160_v63, %v3967_v60  ;;  %v4155_v8 = vld [vmem:[%s4823_s30 + $0x94] sm:$0xf]  ;;  %v3949_v9 = vld [vmem:[%s4823_s30 + $0x9c] sm:$0xf0] }
  0x61   : > { %v4064_v7 = vor.u32 %v4184_v1, %v4063_v0  ;;  %v4179_v10 = vld [vmem:[%s4823_s30 + $0x154] sm:$0xf]  ;;  %v3952_v11 = vor.u32 %v4155_v8, %v3949_v9  ;;  %v4045_v12 = vld [vmem:[%s4823_s30 + $0x15c] sm:$0xf0]  ;;  %v3955_v13 = vld [vmem:[%s4823_s30 + $0x98] sm:$0xf] }
  0x62   : > { %v4157_v14 = vld [vmem:[%s4823_s30 + $0xa0] sm:$0xf0]  ;;  %v4048_v15 = vor.u32 %v4179_v10, %v4045_v12  ;;  %v4051_v17 = vld [vmem:[%s4823_s30 + $0x158] sm:$0xf]  ;;  %v3627_v20 = vld [vmem:[%s4813_s20 + $0x10] sm:$0xf] }
  0x63   : > { %1403 = vmatpush.bf16.msra.mxu0 %v3912_v28  ;;  %4189 = vmatpush.bf16.msra.mxu2 %v3912_v28  ;;  %v3956_v16 = vor.u32 %v4157_v14, %v3955_v13  ;;  %v4181_v18 = vld [vmem:[%s4823_s30 + $0x160] sm:$0xf0]  ;;  %v4076_v21 = vld [vmem:[%s4813_s20 + $0x14] sm:$0xf0]  ;;  %v3755_v22 = vld [vmem:[%s4813_s20 + $0x110] sm:$0xf] }
  0x64   : > { %1572 = vmatpush.bf16.msra.mxu1 %v4008_v29  ;;  %4197 = vmatpush.bf16.msra.mxu3 %v4008_v29  ;;  %v4052_v19 = vor.u32 %v4181_v18, %v4051_v17  ;;  %v4108_v23 = vld [vmem:[%s4813_s20 + $0x114] sm:$0xf0]  ;;  %v4075_v24 = vld [vmem:[%s4813_s20 + $0x14] sm:$0xf]  ;;  %v3629_v25 = vld [vmem:[%s4813_s20 + $0x18] sm:$0xf0]  ;;  %v4905_v28 = vor.u32 %v4076_v21, %v3627_v20 }
  0x65   : > { %v4107_v26 = vld [vmem:[%s4813_s20 + $0x114] sm:$0xf]  ;;  %v3757_v27 = vld [vmem:[%s4813_s20 + $0x118] sm:$0xf0]  ;;  %v4907_v29 = vor.u32 %v4108_v23, %v3755_v22  ;;  %v4909_v30 = vor.u32 %v4075_v24, %v3629_v25  ;;  %v3635_v32 = vld [vmem:[%s4813_s20 + $0x20] sm:$0xf] }
  0x66   : > { %v4911_v31 = vor.u32 %v4107_v26, %v3757_v27  ;;  %v4078_v33 = vld [vmem:[%s4813_s20 + $0x24] sm:$0xf0]  ;;  %v4077_v36 = vld [vmem:[%s4813_s20 + $0x24] sm:$0xf]  ;;  %v3637_v37 = vld [vmem:[%s4813_s20 + $0x28] sm:$0xf0] }
  0x67   : > { %1404 = vmatpush.bf16.msra.mxu0 %v3900_v34  ;;  %4190 = vmatpush.bf16.msra.mxu2 %v3900_v34  ;;  %6069 = vst [vmem:[#allocation25_spill] sm:$0xff] %v4907_v29  ;;  %v3763_v34 = vld [vmem:[%s4813_s20 + $0x120] sm:$0xf]  ;;  %v4109_v38 = vld [vmem:[%s4813_s20 + $0x124] sm:$0xf]  ;;  %s297_s9 = sand.u32 1, %s4543_s13  }
  0x68   : > { %1573 = vmatpush.bf16.msra.mxu1 %v3996_v35  ;;  %4198 = vmatpush.bf16.msra.mxu3 %v3996_v35  ;;  %6070 = vst [vmem:[#allocation26_spill] sm:$0xff] %v4911_v31  ;;  %v4110_v35 = vld [vmem:[%s4813_s20 + $0x124] sm:$0xf0]  ;;  %v3765_v39 = vld [vmem:[%s4813_s20 + $0x128] sm:$0xf0]  ;;  %s266_s10 = scalar_lea.vmem [#allocation8], %s4204_s8 }
  0x69   : > { %v4927_v41 = vor.u32 %v4110_v35, %v3763_v34  ;;  %v4931_v43 = vor.u32 %v4109_v38, %v3765_v39  ;;  %v4152_v44 = vld [vmem:[%s4823_s30 + $0x7c] sm:$0xf]  ;;  %v3937_v45 = vld [vmem:[%s4823_s30 + $0x84] sm:$0xf0]  ;;  %v3943_v49 = vld [vmem:[%s4823_s30 + $0x80] sm:$0xf] }
  0x6a   : > { %v4176_v46 = vld [vmem:[%s4823_s30 + $0x13c] sm:$0xf]  ;;  %v3940_v47 = vor.u32 %v4152_v44, %v3937_v45  ;;  %v4033_v48 = vld [vmem:[%s4823_s30 + $0x144] sm:$0xf0]  ;;  %v4154_v50 = vld [vmem:[%s4823_s30 + $0x88] sm:$0xf0] }
  0x6b   : > { %1405 = vmatpush.bf16.msra.mxu0 %v3888_v40  ;;  %4191 = vmatpush.bf16.msra.mxu2 %v3888_v40  ;;  %v4925_v40 = vor.u32 %v4078_v33, %v3635_v32  ;;  %6071 = vst [vmem:[#allocation27_spill] sm:$0xff] %v4927_v41  ;;  %v4036_v51 = vor.u32 %v4176_v46, %v4033_v48  ;;  %v4178_v54 = vld [vmem:[%s4823_s30 + $0x148] sm:$0xf0]  ;;  %v3643_v56 = vld [vmem:[%s4813_s20 + $0x30] sm:$0xf]  ;;  %s4205_s6 = smul.u32 768, %s297_s9 }
  0x6c   : > { %1574 = vmatpush.bf16.msra.mxu1 %v3984_v42  ;;  %4199 = vmatpush.bf16.msra.mxu3 %v3984_v42  ;;  %v4929_v42 = vor.u32 %v4077_v36, %v3637_v37  ;;  %6072 = vst [vmem:[#allocation28_spill] sm:$0xff] %v4931_v43  ;;  %v3944_v52 = vor.u32 %v4154_v50, %v3943_v49  ;;  %v3771_v58 = vld [vmem:[%s4813_s20 + $0x130] sm:$0xf]  ;;  %v4112_v59 = vld [vmem:[%s4813_s20 + $0x134] sm:$0xf0]  ;;  %s6194_s15 = sld [smem:[#allocation16_spill]] }
  0x6d   : > { %v4079_v60 = vld [vmem:[%s4813_s20 + $0x34] sm:$0xf]  ;;  %v3773_v63 = vld [vmem:[%s4813_s20 + $0x138] sm:$0xf0]  ;;  %v4955_v1 = vor.u32 %v4112_v59, %v3771_v58  ;;  %v3651_v8 = vld [vmem:[%s4813_s20 + $0x40] sm:$0xf] }
  0x6e   : > { %v4082_v9 = vld [vmem:[%s4813_s20 + $0x44] sm:$0xf0]  ;;  %v3779_v10 = vld [vmem:[%s4813_s20 + $0x140] sm:$0xf]  ;;  %v4081_v12 = vld [vmem:[%s4813_s20 + $0x44] sm:$0xf] }
  0x6f   : > { %1406 = vmatpush.bf16.msra.mxu0 %v3876_v53  ;;  %4192 = vmatpush.bf16.msra.mxu2 %v3876_v53  ;;  %v4039_v53 = vld [vmem:[%s4823_s30 + $0x140] sm:$0xf]  ;;  %6073 = vst [vmem:[#allocation29_spill] sm:$0xff] %v4955_v1  ;;  %v3653_v13 = vld [vmem:[%s4813_s20 + $0x48] sm:$0xf0]  ;;  %s5421_s7 = scalar_lea.vmem [#allocation9], %s4205_s6 }
  0x70   : > { %1575 = vmatpush.bf16.msra.mxu1 %v3972_v57  ;;  %4200 = vmatpush.bf16.msra.mxu3 %v3972_v57  ;;  %v4040_v55 = vor.u32 %v4178_v54, %v4039_v53  ;;  %v4080_v57 = vld [vmem:[%s4813_s20 + $0x34] sm:$0xf0]  ;;  %v4113_v14 = vld [vmem:[%s4813_s20 + $0x144] sm:$0xf]  ;;  %v4977_v18 = vor.u32 %v4081_v12, %v3653_v13  ;;  %v3925_v21 = vld [vmem:[%s4823_s30 + $0x6c] sm:$0xf0] }
  0x71   : > { %v4953_v0 = vor.u32 %v4080_v57, %v3643_v56  ;;  %v4149_v20 = vld [vmem:[%s4823_s30 + $0x64] sm:$0xf]  ;;  %v4021_v24 = vld [vmem:[%s4823_s30 + $0x12c] sm:$0xf0]  ;;  %v3931_v25 = vld [vmem:[%s4823_s30 + $0x68] sm:$0xf] }
  0x72   : > { %1407 = vmatmul.bf16.vlgmr.msra.gmra.mxu0 %v4877_v2  ;;  %1487 = vmatmul.bf16.vlgmr.msra.gmra.mxu2 %v4879_v3  ;;  %v4173_v22 = vld [vmem:[%s4823_s30 + $0x124] sm:$0xf]  ;;  %v3928_v23 = vor.u32 %v4149_v20, %v3925_v21  ;;  %v4151_v26 = vld [vmem:[%s4823_s30 + $0x70] sm:$0xf0]  ;;  %v4027_v33 = vld [vmem:[%s4823_s30 + $0x128] sm:$0xf] }
  0x73   : > { %1737 = vmatpush.bf16.msrb.mxu2 %v3964_v61  ;;  %1576 = vmatmul.bf16.vlgmr.msra.gmra.mxu1 %v4881_v4  ;;  %v3645_v61 = vld [vmem:[%s4813_s20 + $0x38] sm:$0xf0]  ;;  %v4024_v27 = vor.u32 %v4173_v22, %v4021_v24  ;;  %v3932_v32 = vor.u32 %v4151_v26, %v3931_v25  ;;  %v4175_v34 = vld [vmem:[%s4823_s30 + $0x130] sm:$0xf0]  ;;  %v3659_v36 = vld [vmem:[%s4813_s20 + $0x50] sm:$0xf] }
  0x74   : > { %1906 = vmatpush.bf16.msrb.mxu3 %v4060_v62  ;;  %2075 = vmatpush.bf16.msrb.mxu0 %v3968_v6  ;;  %v4111_v62 = vld [vmem:[%s4813_s20 + $0x134] sm:$0xf]  ;;  %v4957_v6 = vor.u32 %v4079_v60, %v3645_v61  ;;  %v4028_v35 = vor.u32 %v4175_v34, %v4027_v33  ;;  %v4084_v37 = vld [vmem:[%s4813_s20 + $0x54] sm:$0xf0]  ;;  %v3787_v38 = vld [vmem:[%s4813_s20 + $0x150] sm:$0xf] }
  0x75   : > { %1656 = vmatmul.bf16.vlgmr.msra.gmra.mxu3 %v4883_v5  ;;  %2244 = vmatpush.bf16.msrb.mxu1 %v4064_v7  ;;  %v4959_v7 = vor.u32 %v4111_v62, %v3773_v63  ;;  %v4116_v39 = vld [vmem:[%s4813_s20 + $0x154] sm:$0xf0]  ;;  %v4083_v44 = vld [vmem:[%s4813_s20 + $0x54] sm:$0xf]  ;;  %v3661_v45 = vld [vmem:[%s4813_s20 + $0x58] sm:$0xf0]  ;;  %v5001_v48 = vor.u32 %v4084_v37, %v3659_v36 }
  0x76   : > { %v4115_v46 = vld [vmem:[%s4813_s20 + $0x154] sm:$0xf]  ;;  %v5003_v49 = vor.u32 %v4116_v39, %v3787_v38  ;;  %v5005_v50 = vor.u32 %v4083_v44, %v3661_v45  ;;  %v4086_v53 = vld [vmem:[%s4813_s20 + $0x64] sm:$0xf0]  ;;  %v3795_v54 = vld [vmem:[%s4813_s20 + $0x160] sm:$0xf] }
  0x77   : > { %1738 = vmatpush.bf16.msrb.mxu2 %v3952_v11  ;;  %6074 = vst [vmem:[#allocation30_spill] sm:$0xff] %v4959_v7  ;;  %v4114_v11 = vld [vmem:[%s4813_s20 + $0x144] sm:$0xf0]  ;;  %v4085_v56 = vld [vmem:[%s4813_s20 + $0x64] sm:$0xf]  ;;  %s3457_s11 = smul.u32 3, %s4575_s21 }
  0x78   : > { %1907 = vmatpush.bf16.msrb.mxu3 %v4048_v15  ;;  %2076 = vmatpush.bf16.msrb.mxu0 %v3956_v16  ;;  %v3781_v15 = vld [vmem:[%s4813_s20 + $0x148] sm:$0xf0]  ;;  %v4973_v16 = vor.u32 %v4082_v9, %v3651_v8  ;;  %v4975_v17 = vor.u32 %v4114_v11, %v3779_v10  ;;  %6077 = vst [vmem:[#allocation33_spill] sm:$0xff] %v5003_v49  ;;  %v4117_v58 = vld [vmem:[%s4813_s20 + $0x164] sm:$0xf]  ;;  %s4206_s27 = smul.u32 384, %s6194_s15 }
  0x79   : > { %2245 = vmatpush.bf16.msrb.mxu1 %v4052_v19  ;;  %v4979_v19 = vor.u32 %v4113_v14, %v3781_v15  ;;  %v3669_v57 = vld [vmem:[%s4813_s20 + $0x68] sm:$0xf0]  ;;  %v3913_v9 = vld [vmem:[%s4823_s30 + $0x54] sm:$0xf0]  ;;  %v3675_v14 = vld [vmem:[%s4813_s20 + $0x70] sm:$0xf] }
  0x7a   : > { %6075 = vst [vmem:[#allocation31_spill] sm:$0xff] %v4975_v17  ;;  %v3797_v59 = vld [vmem:[%s4813_s20 + $0x168] sm:$0xf0]  ;;  %v5025_v62 = vor.u32 %v4085_v56, %v3669_v57  ;;  %v4009_v12 = vld [vmem:[%s4823_s30 + $0x114] sm:$0xf0]  ;;  %s3461_s28 = sadd.s32 %s4206_s27, %s3457_s11  ;;  %s6197_s26 = sld [smem:[#allocation91_spill]] }
  0x7b   : > { %1739 = vmatpush.bf16.msrb.mxu2 %v3940_v47  ;;  %6076 = vst [vmem:[#allocation32_spill] sm:$0xff] %v4979_v19  ;;  %v3789_v47 = vld [vmem:[%s4813_s20 + $0x158] sm:$0xf0]  ;;  %v5027_v63 = vor.u32 %v4117_v58, %v3797_v59  ;;  %v4146_v8 = vld [vmem:[%s4823_s30 + $0x4c] sm:$0xf]  ;;  %s4067_s21 = sshll.u32 %s3461_s28, 2 }
  0x7c   : > { %1908 = vmatpush.bf16.msrb.mxu3 %v4036_v51  ;;  %2077 = vmatpush.bf16.msrb.mxu0 %v3944_v52  ;;  %v5007_v51 = vor.u32 %v4115_v46, %v3789_v47  ;;  %v3667_v52 = vld [vmem:[%s4813_s20 + $0x60] sm:$0xf]  ;;  %v3916_v10 = vor.u32 %v4146_v8, %v3913_v9  ;;  %v4170_v11 = vld [vmem:[%s4823_s30 + $0x10c] sm:$0xf]  ;;  %v4088_v15 = vld [vmem:[%s4813_s20 + $0x74] sm:$0xf0] }
  0x7d   : > { %2246 = vmatpush.bf16.msrb.mxu1 %v4040_v55  ;;  %v4118_v55 = vld [vmem:[%s4813_s20 + $0x164] sm:$0xf0]  ;;  %v5021_v60 = vor.u32 %v4086_v53, %v3667_v52  ;;  %6080 = vst [vmem:[#allocation36_spill] sm:$0xff] %v5027_v63  ;;  %v4012_v13 = vor.u32 %v4170_v11, %v4009_v12  ;;  %v3803_v20 = vld [vmem:[%s4813_s20 + $0x170] sm:$0xf]  ;;  %v5049_v36 = vor.u32 %v4088_v15, %v3675_v14  ;;  %s3464_s3 = sshll.u32 %s5421_s7, 4  ;;  %s3465_s3 = int_to_ptr.vmem [resolvable:$true] %s3464_s3 }
  0x7e   : > { %6078 = vst [vmem:[#allocation34_spill] sm:$0xff] %v5007_v51  ;;  %v5023_v61 = vor.u32 %v4118_v55, %v3795_v54  ;;  %v4120_v21 = vld [vmem:[%s4813_s20 + $0x174] sm:$0xf0]  ;;  %v4087_v22 = vld [vmem:[%s4813_s20 + $0x74] sm:$0xf]  ;;  %s3449_s14 = scalar_lea.sflag [#allocation5], %s297_s9 }
  0x7f   : > { %1740 = vmatpush.bf16.msrb.mxu2 %v3928_v23  ;;  %v3677_v23 = vld [vmem:[%s4813_s20 + $0x78] sm:$0xf0]  ;;  %v3919_v24 = vld [vmem:[%s4823_s30 + $0x50] sm:$0xf]  ;;  %v5051_v37 = vor.u32 %v4120_v21, %v3803_v20  ;;  %v3683_v44 = vld [vmem:[%s4813_s20 + $0x80] sm:$0xf] }
  0x80   : > { %1909 = vmatpush.bf16.msrb.mxu3 %v4024_v27  ;;  %2078 = vmatpush.bf16.msrb.mxu0 %v3932_v32  ;;  %6079 = vst [vmem:[#allocation35_spill] sm:$0xff] %v5023_v61  ;;  %v4148_v25 = vld [vmem:[%s4823_s30 + $0x58] sm:$0xf0]  ;;  %v4015_v26 = vld [vmem:[%s4823_s30 + $0x110] sm:$0xf]  ;;  %v5053_v38 = vor.u32 %v4087_v22, %v3677_v23  ;;  %s3463_s18 = scalar_lea.hbm %s6197_s26, %s4067_s21  ;;  %s4461_s5 = scalar_lea.hbm %s6197_s26, 3072 }
  0x81   : > { %2247 = vmatpush.bf16.msrb.mxu1 %v4028_v35  ;;  %v4119_v27 = vld [vmem:[%s4813_s20 + $0x174] sm:$0xf]  ;;  %v3805_v32 = vld [vmem:[%s4813_s20 + $0x178] sm:$0xf0]  ;;  %v3920_v33 = vor.u32 %v4148_v25, %v3919_v24  ;;  %6081 = vst [vmem:[#allocation37_spill] sm:$0xff] %v5051_v37  ;;  %s3466_s12 = sshll.u32 %s3463_s18, 4  ;;  %s3467_s12 = int_to_ptr.hbm [resolvable:$true] %s3466_s12 }
  0x82   : > { %1412 = vmatmul.bf16.gmra.mxu0 %v4905_v28  ;;  %1492 = vmatmul.bf16.gmra.mxu2 %v4907_v29  ;;  %v4172_v34 = vld [vmem:[%s4823_s30 + $0x118] sm:$0xf0]  ;;  %v5055_v39 = vor.u32 %v4119_v27, %v3805_v32  ;;  %v4090_v45 = vld [vmem:[%s4813_s20 + $0x84] sm:$0xf0]  ;;  %v3811_v46 = vld [vmem:[%s4813_s20 + $0x180] sm:$0xf] }
  0x83   : > { %1581 = vmatmul.bf16.gmra.mxu1 %v4909_v30  ;;  %1741 = vmatpush.bf16.msrb.mxu2 %v3916_v10  ;;  %v4016_v35 = vor.u32 %v4172_v34, %v4015_v26  ;;  %v4122_v47 = vld [vmem:[%s4813_s20 + $0x184] sm:$0xf0]  ;;  %v4089_v52 = vld [vmem:[%s4813_s20 + $0x84] sm:$0xf]  ;;  %v3685_v53 = vld [vmem:[%s4813_s20 + $0x88] sm:$0xf0]  ;;  %v5069_v56 = vor.u32 %v4090_v45, %v3683_v44 }
  0x84   : > { %1910 = vmatpush.bf16.msrb.mxu3 %v4012_v13  ;;  %2079 = vmatpush.bf16.msrb.mxu0 %v3920_v33  ;;  %6082 = vst [vmem:[#allocation38_spill] sm:$0xff] %v5055_v39  ;;  %v4121_v54 = vld [vmem:[%s4813_s20 + $0x184] sm:$0xf]  ;;  %v3813_v55 = vld [vmem:[%s4813_s20 + $0x188] sm:$0xf0]  ;;  %v5071_v57 = vor.u32 %v4122_v47, %v3811_v46  ;;  %v5073_v59 = vor.u32 %v4089_v52, %v3685_v53 }
  0x85   : > { %1661 = vmatmul.bf16.gmra.mxu3 %v4911_v31  ;;  %2248 = vmatpush.bf16.msrb.mxu1 %v4016_v35  ;;  %v5075_v8 = vor.u32 %v4121_v54, %v3813_v55  ;;  %v4143_v11 = vld [vmem:[%s4823_s30 + $0x34] sm:$0xf]  ;;  %v3901_v12 = vld [vmem:[%s4823_s30 + $0x3c] sm:$0xf0]  ;;  %v3691_v27 = vld [vmem:[%s4813_s20 + $0x90] sm:$0xf] }
  0x86   : > { %6083 = vst [vmem:[#allocation39_spill] sm:$0xff] %v5071_v57  ;;  %v4167_v13 = vld [vmem:[%s4823_s30 + $0xf4] sm:$0xf]  ;;  %v3904_v14 = vor.u32 %v4143_v11, %v3901_v12  ;;  %v3997_v15 = vld [vmem:[%s4823_s30 + $0xfc] sm:$0xf0] }
  0x87   : > { %6084 = vst [vmem:[#allocation40_spill] sm:$0xff] %v5075_v8  ;;  %v4000_v21 = vor.u32 %v4167_v13, %v3997_v15  ;;  %v4092_v32 = vld [vmem:[%s4813_s20 + $0x94] sm:$0xf0]  ;;  %v3819_v33 = vld [vmem:[%s4813_s20 + $0x190] sm:$0xf] }
  0x88   : > { %1742 = vmatpush.bf16.msrb.mxu2 %v3904_v14  ;;  %v4124_v34 = vld [vmem:[%s4813_s20 + $0x194] sm:$0xf0]  ;;  %v4091_v35 = vld [vmem:[%s4813_s20 + $0x94] sm:$0xf]  ;;  %v3693_v44 = vld [vmem:[%s4813_s20 + $0x98] sm:$0xf0]  ;;  %v5103_v12 = vor.u32 %v4092_v32, %v3691_v27 }
  0x89   : > { %1911 = vmatpush.bf16.msrb.mxu3 %v4000_v21  ;;  %v3907_v45 = vld [vmem:[%s4823_s30 + $0x38] sm:$0xf]  ;;  %v4145_v46 = vld [vmem:[%s4823_s30 + $0x40] sm:$0xf0]  ;;  %v4123_v52 = vld [vmem:[%s4813_s20 + $0x194] sm:$0xf]  ;;  %v5105_v13 = vor.u32 %v4124_v34, %v3819_v33 }
  0x8a   : > { %v4003_v47 = vld [vmem:[%s4823_s30 + $0xf8] sm:$0xf]  ;;  %v3821_v53 = vld [vmem:[%s4813_s20 + $0x198] sm:$0xf0]  ;;  %v3908_v54 = vor.u32 %v4145_v46, %v3907_v45  ;;  %v4169_v55 = vld [vmem:[%s4823_s30 + $0x100] sm:$0xf0] }
  0x8b   : > { %6086 = vst [vmem:[#allocation42_spill] sm:$0xff] %v5105_v13  ;;  %v5111_v21 = vor.u32 %v4123_v52, %v3821_v53  ;;  %v4094_v45 = vld [vmem:[%s4813_s20 + $0xa4] sm:$0xf0]  ;;  %v3827_v46 = vld [vmem:[%s4813_s20 + $0x1a0] sm:$0xf] }
  0x8c   : > { %2080 = vmatpush.bf16.msrb.mxu0 %v3908_v54  ;;  %v4093_v52 = vld [vmem:[%s4813_s20 + $0xa4] sm:$0xf]  ;;  %v3701_v53 = vld [vmem:[%s4813_s20 + $0xa8] sm:$0xf0] }
  0x8d   : > { %6088 = vst [vmem:[#allocation44_spill] sm:$0xff] %v5111_v21  ;;  %v4125_v54 = vld [vmem:[%s4813_s20 + $0x1a4] sm:$0xf] }
  0x92   : > { %1417 = vmatmul.bf16.gmra.mxu0 %v4925_v40  ;;  %1497 = vmatmul.bf16.gmra.mxu2 %v4927_v41 }
  0x93   : > { %1586 = vmatmul.bf16.gmra.mxu1 %v4929_v42 }
  0x95   : > { %1666 = vmatmul.bf16.gmra.mxu3 %v4931_v43 }
  0xa2   : > { %1422 = vmatmul.bf16.gmra.mxu0 %v4953_v0  ;;  %1502 = vmatmul.bf16.gmra.mxu2 %v4955_v1 }
  0xa3   : > { %1591 = vmatmul.bf16.gmra.mxu1 %v4957_v6 }
  0xa5   : > { %1671 = vmatmul.bf16.gmra.mxu3 %v4959_v7 }
  0xb2   : > { %1427 = vmatmul.bf16.gmra.mxu0 %v4973_v16  ;;  %1507 = vmatmul.bf16.gmra.mxu2 %v4975_v17 }
  0xb3   : > { %1596 = vmatmul.bf16.gmra.mxu1 %v4977_v18 }
  0xb5   : > { %1676 = vmatmul.bf16.gmra.mxu3 %v4979_v19 }
  0xc2   : > { %1432 = vmatmul.bf16.gmra.mxu0 %v5001_v48  ;;  %1512 = vmatmul.bf16.gmra.mxu2 %v5003_v49 }
  0xc3   : > { %1601 = vmatmul.bf16.gmra.mxu1 %v5005_v50 }
  0xc5   : > { %1681 = vmatmul.bf16.gmra.mxu3 %v5007_v51  ;;  %v4131_v51 = vld [vmem:[%s4813_s20 + $0x1d4] sm:$0xf] }
  0xd2   : > { %1437 = vmatmul.bf16.gmra.mxu0 %v5021_v60  ;;  %1517 = vmatmul.bf16.gmra.mxu2 %v5023_v61  ;;  %v3979_v61 = vld [vmem:[%s4823_s30 + $0xc8] sm:$0xf] }
  0xd3   : > { %1606 = vmatmul.bf16.gmra.mxu1 %v5025_v62 }
  0xd5   : > { %1686 = vmatmul.bf16.gmra.mxu3 %v5027_v63  ;;  %v3725_v63 = vld [vmem:[%s4813_s20 + $0xd8] sm:$0xf0] }
  0xe2   : > { %1442 = vmatmul.bf16.gmra.mxu0 %v5049_v36  ;;  %1522 = vmatmul.bf16.gmra.mxu2 %v5051_v37 }
  0xe3   : > { %1611 = vmatmul.bf16.gmra.mxu1 %v5053_v38 }
  0xe5   : > { %1691 = vmatmul.bf16.gmra.mxu3 %v5055_v39 }
  0xef   : > { %v1408_v58 = vpop.f32.mrf.mxu0 }
  0xf0   : > { %v1577_v9 = vpop.f32.mrf.mxu1 }
  0xf1   : > { %v5077_v10 = vadd.f32 %v1577_v9, %v1408_v58  ;;  %v4004_v9 = vor.u32 %v4169_v55, %v4003_v47  ;;  %v4126_v47 = vld [vmem:[%s4813_s20 + $0x1a4] sm:$0xf0]  ;;  %v3829_v55 = vld [vmem:[%s4813_s20 + $0x1a8] sm:$0xf0] }
  0xf2   : > { %1447 = vmatmul.bf16.gmra.mxu0 %v5069_v56  ;;  %1527 = vmatmul.bf16.gmra.mxu2 %v5071_v57 }
  0xf3   : > { %1616 = vmatmul.bf16.gmra.mxu1 %v5073_v59 }
  0xf4   : > { %2249 = vmatpush.bf16.msrb.mxu1 %v4004_v9 }
  0xf5   : > { %1696 = vmatmul.bf16.gmra.mxu3 %v5075_v8  ;;  %v1488_v20 = vpop.f32.mrf.mxu2 }
  0xf7   : > { %v1410_v24 = vpop.f32.mrf.mxu0 }
  0xf8   : > { %v1657_v22 = vpop.f32.mrf.mxu3  ;;  %v1579_v25 = vpop.f32.mrf.mxu1 }
  0xf9   : > { %v5087_v23 = vadd.f32 %v1657_v22, %v1488_v20  ;;  %v5089_v26 = vadd.f32 %v1579_v25, %v1410_v24  ;;  %v5109_v20 = vor.u32 %v4091_v35, %v3693_v44  ;;  %v3699_v44 = vld [vmem:[%s4813_s20 + $0xa0] sm:$0xf] }
  0xfb   : > { %6085 = vst [vmem:[#allocation41_spill] sm:$0xff] %v5087_v23 }
  0xfd   : > { %v1490_v58 = vpop.f32.mrf.mxu2 }
  0xff   : > { %v1413_v15 = vpop.f32.mrf.mxu0 }
 0x100   : > { %v1659_v11 = vpop.f32.mrf.mxu3  ;;  %v1582_v22 = vpop.f32.mrf.mxu1 }
 0x101   : > { %v5107_v14 = vadd.f32 %v1659_v11, %v1490_v58  ;;  %v5113_v24 = vadd.f32 %v1582_v22, %v1413_v15  ;;  %v5131_v11 = vor.u32 %v4094_v45, %v3699_v44  ;;  %v5133_v15 = vor.u32 %v4126_v47, %v3827_v46  ;;  %v4140_v44 = vld [vmem:[%s4823_s30 + $0x1c] sm:$0xf]  ;;  %v3889_v45 = vld [vmem:[%s4823_s30 + $0x24] sm:$0xf0] }
 0x102   : > { %1452 = vmatmul.bf16.gmra.mxu0 %v5103_v12  ;;  %1532 = vmatmul.bf16.gmra.mxu2 %v5105_v13  ;;  %v4164_v46 = vld [vmem:[%s4823_s30 + $0xdc] sm:$0xf]  ;;  %v3892_v47 = vor.u32 %v4140_v44, %v3889_v45  ;;  %v3707_v44 = vld [vmem:[%s4813_s20 + $0xb0] sm:$0xf]  ;;  %v4096_v45 = vld [vmem:[%s4813_s20 + $0xb4] sm:$0xf0] }
 0x103   : > { %6087 = vst [vmem:[#allocation43_spill] sm:$0xff] %v5107_v14  ;;  %1621 = vmatmul.bf16.gmra.mxu1 %v5109_v20  ;;  %v3991_v13 = vld [vmem:[%s4823_s30 + $0xe0] sm:$0xf]  ;;  %v4127_v14 = vld [vmem:[%s4813_s20 + $0x1b4] sm:$0xf] }
 0x104   : > { %6090 = vst [vmem:[#allocation46_spill] sm:$0xff] %v5133_v15  ;;  %1743 = vmatpush.bf16.msrb.mxu2 %v3892_v47  ;;  %v3837_v47 = vld [vmem:[%s4813_s20 + $0x1b8] sm:$0xf0] }
 0x105   : > { %1701 = vmatmul.bf16.gmra.mxu3 %v5111_v21  ;;  %v1493_v25 = vpop.f32.mrf.mxu2  ;;  %v3709_v21 = vld [vmem:[%s4813_s20 + $0xb8] sm:$0xf0]  ;;  %v5175_v37 = vor.u32 %v4127_v14, %v3837_v47  ;;  %v4129_v47 = vld [vmem:[%s4813_s20 + $0x1c4] sm:$0xf] }
 0x107   : > { %v1415_v33 = vpop.f32.mrf.mxu0  ;;  %6096 = vst [vmem:[#allocation52_spill] sm:$0xff] %v5175_v37 }
 0x108   : > { %v1662_v27 = vpop.f32.mrf.mxu3  ;;  %v1584_v34 = vpop.f32.mrf.mxu1 }
 0x109   : > { %v5119_v32 = vadd.f32 %v1662_v27, %v1493_v25  ;;  %v5121_v35 = vadd.f32 %v1584_v34, %v1415_v33  ;;  %v5137_v27 = vor.u32 %v4093_v52, %v3701_v53  ;;  %v5139_v33 = vor.u32 %v4125_v54, %v3829_v55  ;;  %v3985_v52 = vld [vmem:[%s4823_s30 + $0xe4] sm:$0xf0] }
 0x10a   : > { %v3988_v54 = vor.u32 %v4164_v46, %v3985_v52  ;;  %v3895_v46 = vld [vmem:[%s4823_s30 + $0x20] sm:$0xf]  ;;  %v4142_v52 = vld [vmem:[%s4823_s30 + $0x28] sm:$0xf0] }
 0x10b   : > { %6089 = vst [vmem:[#allocation45_spill] sm:$0xff] %v5119_v32  ;;  %v3896_v23 = vor.u32 %v4142_v52, %v3895_v46  ;;  %v3717_v52 = vld [vmem:[%s4813_s20 + $0xc8] sm:$0xf0] }
 0x10c   : > { %6092 = vst [vmem:[#allocation48_spill] sm:$0xff] %v5139_v33  ;;  %1912 = vmatpush.bf16.msrb.mxu3 %v3988_v54  ;;  %v5167_v54 = vor.u32 %v4096_v45, %v3707_v44  ;;  %v4130_v44 = vld [vmem:[%s4813_s20 + $0x1c4] sm:$0xf0]  ;;  %v4097_v45 = vld [vmem:[%s4813_s20 + $0xc4] sm:$0xf] }
 0x10d   : > { %v1495_v58 = vpop.f32.mrf.mxu2  ;;  %2081 = vmatpush.bf16.msrb.mxu0 %v3896_v23 }
 0x10f   : > { %v1418_v25 = vpop.f32.mrf.mxu0 }
 0x110   : > { %v1664_v9 = vpop.f32.mrf.mxu3  ;;  %v1587_v34 = vpop.f32.mrf.mxu1 }
 0x111   : > { %v5135_v22 = vadd.f32 %v1664_v9, %v1495_v58  ;;  %v5141_v32 = vadd.f32 %v1587_v34, %v1418_v25 }
 0x112   : > { %1457 = vmatmul.bf16.gmra.mxu0 %v5131_v11  ;;  %1537 = vmatmul.bf16.gmra.mxu2 %v5133_v15  ;;  %v4128_v15 = vld [vmem:[%s4813_s20 + $0x1b4] sm:$0xf0] }
 0x113   : > { %6091 = vst [vmem:[#allocation47_spill] sm:$0xff] %v5135_v22  ;;  %1626 = vmatmul.bf16.gmra.mxu1 %v5137_v27  ;;  %v4095_v22 = vld [vmem:[%s4813_s20 + $0xb4] sm:$0xf] }
 0x114   : > { %v5173_v39 = vor.u32 %v4095_v22, %v3709_v21 }
 0x115   : > { %1706 = vmatmul.bf16.gmra.mxu3 %v5139_v33  ;;  %v1498_v53 = vpop.f32.mrf.mxu2  ;;  %v3835_v33 = vld [vmem:[%s4813_s20 + $0x1b0] sm:$0xf] }
 0x117   : > { %v1420_v9 = vpop.f32.mrf.mxu0 }
 0x118   : > { %v1667_v55 = vpop.f32.mrf.mxu3  ;;  %v1589_v25 = vpop.f32.mrf.mxu1 }
 0x119   : > { %v5151_v58 = vadd.f32 %v1667_v55, %v1498_v53  ;;  %v5153_v34 = vadd.f32 %v1589_v25, %v1420_v9  ;;  %v4166_v53 = vld [vmem:[%s4823_s30 + $0xe8] sm:$0xf0]  ;;  %v5169_v9 = vor.u32 %v4128_v15, %v3835_v33  ;;  %v4098_v33 = vld [vmem:[%s4813_s20 + $0xc4] sm:$0xf0] }
 0x11b   : > { %6093 = vst [vmem:[#allocation49_spill] sm:$0xff] %v5151_v58  ;;  %v3992_v58 = vor.u32 %v4166_v53, %v3991_v13  ;;  %v3845_v53 = vld [vmem:[%s4813_s20 + $0x1c8] sm:$0xf0] }
 0x11c   : > { %6094 = vst [vmem:[#allocation50_spill] sm:$0xff] %v5169_v9 }
 0x11d   : > { %v1500_v55 = vpop.f32.mrf.mxu2  ;;  %2250 = vmatpush.bf16.msrb.mxu1 %v3992_v58  ;;  %v3843_v58 = vld [vmem:[%s4813_s20 + $0x1c0] sm:$0xf] }
 0x11f   : > { %v1423_v57 = vpop.f32.mrf.mxu0 }
 0x120   : > { %v1669_v8 = vpop.f32.mrf.mxu3  ;;  %v1592_v46 = vpop.f32.mrf.mxu1 }
 0x121   : > { %v5171_v25 = vadd.f32 %v1669_v8, %v1500_v55  ;;  %v5177_v13 = vadd.f32 %v1592_v46, %v1423_v57  ;;  %v3715_v57 = vld [vmem:[%s4813_s20 + $0xc0] sm:$0xf] }
 0x122   : > { %1462 = vmatmul.bf16.gmra.mxu0 %v5167_v54  ;;  %1542 = vmatmul.bf16.gmra.mxu2 %v5169_v9 }
 0x123   : > { %6095 = vst [vmem:[#allocation51_spill] sm:$0xff] %v5171_v25  ;;  %1631 = vmatmul.bf16.gmra.mxu1 %v5173_v39 }
 0x125   : > { %1711 = vmatmul.bf16.gmra.mxu3 %v5175_v37  ;;  %v1503_v8 = vpop.f32.mrf.mxu2  ;;  %v5195_v37 = vor.u32 %v4098_v33, %v3715_v57  ;;  %v4137_v57 = vld [vmem:[%s4823_s30 + $0x4] sm:$0xf]  ;;  %v3877_v33 = vld [vmem:[%s4823_s30 + $0xc] sm:$0xf0] }
 0x127   : > { %v1425_v21 = vpop.f32.mrf.mxu0 }
 0x128   : > { %v1672_v23 = vpop.f32.mrf.mxu3  ;;  %v1594_v15 = vpop.f32.mrf.mxu1 }
 0x129   : > { %v5183_v14 = vadd.f32 %v1672_v23, %v1503_v8  ;;  %v5185_v22 = vadd.f32 %v1594_v15, %v1425_v21  ;;  %v5197_v8 = vor.u32 %v4130_v44, %v3843_v58  ;;  %v5201_v15 = vor.u32 %v4097_v45, %v3717_v52  ;;  %v4161_v58 = vld [vmem:[%s4823_s30 + $0xc4] sm:$0xf] }
 0x12a   : > { %v3880_v44 = vor.u32 %v4137_v57, %v3877_v33  ;;  %v3723_v57 = vld [vmem:[%s4813_s20 + $0xd0] sm:$0xf]  ;;  %v4100_v33 = vld [vmem:[%s4813_s20 + $0xd4] sm:$0xf0] }
 0x12b   : > { %6097 = vst [vmem:[#allocation53_spill] sm:$0xff] %v5183_v14  ;;  %v5203_v14 = vor.u32 %v4129_v47, %v3845_v53 }
 0x12c   : > { %6098 = vst [vmem:[#allocation54_spill] sm:$0xff] %v5197_v8  ;;  %1744 = vmatpush.bf16.msrb.mxu2 %v3880_v44  ;;  %v3853_v44 = vld [vmem:[%s4813_s20 + $0x1d8] sm:$0xf0] }
 0x12d   : > { %v1505_v55 = vpop.f32.mrf.mxu2  ;;  %6100 = vst [vmem:[#allocation56_spill] sm:$0xff] %v5203_v14  ;;  %v5239_v1 = vor.u32 %v4131_v51, %v3853_v44  ;;  %v4133_v44 = vld [vmem:[%s4813_s20 + $0x1e4] sm:$0xf] }
 0x12f   : > { %v1428_v21 = vpop.f32.mrf.mxu0  ;;  %6104 = vst [vmem:[#allocation60_spill] sm:$0xff] %v5239_v1 }
 0x130   : > { %v1674_v46 = vpop.f32.mrf.mxu3  ;;  %v1597_v9 = vpop.f32.mrf.mxu1 }
 0x131   : > { %v5199_v23 = vadd.f32 %v1674_v46, %v1505_v55  ;;  %v5205_v25 = vadd.f32 %v1597_v9, %v1428_v21  ;;  %v3973_v9 = vld [vmem:[%s4823_s30 + $0xcc] sm:$0xf0] }
 0x132   : > { %1467 = vmatmul.bf16.gmra.mxu0 %v5195_v37  ;;  %1547 = vmatmul.bf16.gmra.mxu2 %v5197_v8  ;;  %v3976_v52 = vor.u32 %v4161_v58, %v3973_v9  ;;  %v4132_v8 = vld [vmem:[%s4813_s20 + $0x1d4] sm:$0xf0]  ;;  %v3883_v58 = vld [vmem:[%s4823_s30 + $0x8] sm:$0xf]  ;;  %v4139_v9 = vld [vmem:[%s4823_s30 + $0x10] sm:$0xf0] }
 0x133   : > { %6099 = vst [vmem:[#allocation55_spill] sm:$0xff] %v5199_v23  ;;  %1636 = vmatmul.bf16.gmra.mxu1 %v5201_v15  ;;  %v4099_v23 = vld [vmem:[%s4813_s20 + $0xd4] sm:$0xf]  ;;  %v3884_v49 = vor.u32 %v4139_v9, %v3883_v58  ;;  %v3733_v9 = vld [vmem:[%s4813_s20 + $0xe8] sm:$0xf0] }
 0x134   : > { %1913 = vmatpush.bf16.msrb.mxu3 %v3976_v52  ;;  %v5231_v52 = vor.u32 %v4100_v33, %v3723_v57  ;;  %v5237_v7 = vor.u32 %v4099_v23, %v3725_v63  ;;  %v4102_v23 = vld [vmem:[%s4813_s20 + $0xe4] sm:$0xf0]  ;;  %v4101_v33 = vld [vmem:[%s4813_s20 + $0xe4] sm:$0xf] }
 0x135   : > { %1716 = vmatmul.bf16.gmra.mxu3 %v5203_v14  ;;  %v1508_v45 = vpop.f32.mrf.mxu2  ;;  %v3851_v14 = vld [vmem:[%s4813_s20 + $0x1d0] sm:$0xf]  ;;  %2082 = vmatpush.bf16.msrb.mxu0 %v3884_v49  ;;  %v4134_v57 = vld [vmem:[%s4813_s20 + $0x1e4] sm:$0xf0] }
 0x137   : > { %v1430_v55 = vpop.f32.mrf.mxu0 }
 0x138   : > { %v1677_v47 = vpop.f32.mrf.mxu3  ;;  %v1599_v46 = vpop.f32.mrf.mxu1 }
 0x139   : > { %v5215_v53 = vadd.f32 %v1677_v47, %v1508_v45  ;;  %v5217_v21 = vadd.f32 %v1599_v46, %v1430_v55  ;;  %v4163_v45 = vld [vmem:[%s4823_s30 + $0xd0] sm:$0xf0]  ;;  %v5233_v55 = vor.u32 %v4132_v8, %v3851_v14 }
 0x13b   : > { %6101 = vst [vmem:[#allocation57_spill] sm:$0xff] %v5215_v53  ;;  %v3980_v53 = vor.u32 %v4163_v45, %v3979_v61  ;;  %v3861_v45 = vld [vmem:[%s4813_s20 + $0x1e8] sm:$0xf0] }
 0x13c   : > { %6102 = vst [vmem:[#allocation58_spill] sm:$0xff] %v5233_v55 }
 0x13d   : > { %v1510_v47 = vpop.f32.mrf.mxu2  ;;  %2251 = vmatpush.bf16.msrb.mxu1 %v3980_v53  ;;  %v3859_v53 = vld [vmem:[%s4813_s20 + $0x1e0] sm:$0xf] }
 0x13f   : > { %v1433_v17 = vpop.f32.mrf.mxu0 }
 0x140   : > { %v1679_v19 = vpop.f32.mrf.mxu3  ;;  %v1602_v58 = vpop.f32.mrf.mxu1 }
 0x141   : > { %v5235_v46 = vadd.f32 %v1679_v19, %v1510_v47  ;;  %v5241_v61 = vadd.f32 %v1602_v58, %v1433_v17  ;;  %v3731_v17 = vld [vmem:[%s4813_s20 + $0xe0] sm:$0xf] }
 0x142   : > { %1472 = vmatmul.bf16.gmra.mxu0 %v5231_v52  ;;  %1552 = vmatmul.bf16.gmra.mxu2 %v5233_v55  ;;  %v5259_v55 = vor.u32 %v4102_v23, %v3731_v17 }
 0x143   : > { %6103 = vst [vmem:[#allocation59_spill] sm:$0xff] %v5235_v46  ;;  %1641 = vmatmul.bf16.gmra.mxu1 %v5237_v7 }
 0x145   : > { %1721 = vmatmul.bf16.gmra.mxu3 %v5239_v1  ;;  %v1513_v19 = vpop.f32.mrf.mxu2  ;;  %v5261_v1 = vor.u32 %v4134_v57, %v3859_v53 }
 0x147   : > { %v1435_v63 = vpop.f32.mrf.mxu0  ;;  %6106 = vst [vmem:[#allocation62_spill] sm:$0xff] %v5261_v1 }
 0x148   : > { %v1682_v49 = vpop.f32.mrf.mxu3  ;;  %v1604_v14 = vpop.f32.mrf.mxu1 }
 0x149   : > { %v5247_v51 = vadd.f32 %v1682_v49, %v1513_v19  ;;  %v5249_v8 = vadd.f32 %v1604_v14, %v1435_v63  ;;  %v5265_v63 = vor.u32 %v4101_v33, %v3733_v9  ;;  %v5267_v14 = vor.u32 %v4133_v44, %v3861_v45  ;;  %v4104_v44 = vld [vmem:[%s4813_s20 + $0xf4] sm:$0xf0]  ;;  %v3867_v45 = vld [vmem:[%s4813_s20 + $0x1f0] sm:$0xf] }
 0x14b   : > { %6105 = vst [vmem:[#allocation61_spill] sm:$0xff] %v5247_v51 }
 0x14c   : > { %6108 = vst [vmem:[#allocation64_spill] sm:$0xff] %v5267_v14 }
 0x14d   : > { %v1515_v47 = vpop.f32.mrf.mxu2 }
 0x14f   : > { %v1438_v49 = vpop.f32.mrf.mxu0 }
 0x150   : > { %v1684_v58 = vpop.f32.mrf.mxu3  ;;  %v1607_v51 = vpop.f32.mrf.mxu1 }
 0x151   : > { %v5263_v19 = vadd.f32 %v1684_v58, %v1515_v47  ;;  %v5269_v46 = vadd.f32 %v1607_v51, %v1438_v49  ;;  %v3739_v51 = vld [vmem:[%s4813_s20 + $0xf0] sm:$0xf]  ;;  %v4136_v47 = vld [vmem:[%s4813_s20 + $0x1f4] sm:$0xf0]  ;;  %v4103_v58 = vld [vmem:[%s4813_s20 + $0xf4] sm:$0xf] }
 0x152   : > { %1477 = vmatmul.bf16.gmra.mxu0 %v5259_v55  ;;  %1557 = vmatmul.bf16.gmra.mxu2 %v5261_v1  ;;  %v3741_v49 = vld [vmem:[%s4813_s20 + $0xf8] sm:$0xf0]  ;;  %v4135_v1 = vld [vmem:[%s4813_s20 + $0x1f4] sm:$0xf]  ;;  %v5287_v31 = vor.u32 %v4104_v44, %v3739_v51 }
 0x153   : > { %6107 = vst [vmem:[#allocation63_spill] sm:$0xff] %v5263_v19  ;;  %1646 = vmatmul.bf16.gmra.mxu1 %v5265_v63  ;;  %v3869_v19 = vld [vmem:[%s4813_s20 + $0x1f8] sm:$0xf0]  ;;  %s4455_s20 = sshra.s32 %s3467_s12, 4  ;;  %s4456_s20 = int_to_ptr.hbm [resolvable:$true] %s4455_s20 }
 0x154   : > { %s4457_s0 = scalar_lea.hbm %s4456_s20, 768  ;;  %p4462_p1 = scmp.lt.s32.totalorder %s4456_s20, %s6197_s26 }
 0x155   : > { %1726 = vmatmul.bf16.gmra.mxu3 %v5267_v14  ;;  %v1518_v17 = vpop.f32.mrf.mxu2  ;;  %v5289_v14 = vor.u32 %v4136_v47, %v3867_v45  ;;  %p4458_p4 = scmp.ne.s32.totalorder %s4456_s20, %s4457_s0  ;;  %p4463_p3 = scmp.lt.s32.totalorder %s4461_s5, %s4457_s0 }
 0x157   : > { %v1440_v57 = vpop.f32.mrf.mxu0  ;;  %6110 = vst [vmem:[#allocation66_spill] sm:$0xff] %v5289_v14  ;;  %p4459_p5 = pnand %p4458_p4, %p4782_p2  ;;  %p4464_p7 = por %p4463_p3, %p4462_p1 }
 0x158   : > { %v1687_v23 = vpop.f32.mrf.mxu3  ;;  %v1609_v33 = vpop.f32.mrf.mxu1 }
 0x159   : > { %v5275_v53 = vadd.f32 %v1687_v23, %v1518_v17  ;;  %v5277_v9 = vadd.f32 %v1609_v33, %v1440_v57  ;;  %v5295_v57 = vor.u32 %v4135_v1, %v3869_v19  ;;  %p4460_p8 = pneg %p4459_p5 }
 0x15b   : > { %6109 = vst [vmem:[#allocation65_spill] sm:$0xff] %v5275_v53  ;;  %v5293_v53 = vor.u32 %v4103_v58, %v3741_v49  ;;  %p4465_p9 = pnand %p4464_p7, %p4460_p8 }
 0x15c   : > { %6112 = vst [vmem:[#allocation68_spill] sm:$0xff] %v5295_v57 }
 0x15d   : > { %v1520_v43 = vpop.f32.mrf.mxu2 }
 0x15f   : > { %v1443_v23 = vpop.f32.mrf.mxu0 }
 0x160   : > { %v1689_v41 = vpop.f32.mrf.mxu3  ;;  %v1612_v33 = vpop.f32.mrf.mxu1 }
 0x161   : > { %v5291_v17 = vadd.f32 %v1689_v41, %v1520_v43  ;;  %v5297_v29 = vadd.f32 %v1612_v33, %v1443_v23 }
 0x162   : > { %1482 = vmatmul.bf16.gmra.mxu0 %v5287_v31  ;;  %1562 = vmatmul.bf16.gmra.mxu2 %v5289_v14 }
 0x163   : > { %6111 = vst [vmem:[#allocation67_spill] sm:$0xff] %v5291_v17  ;;  %1651 = vmatmul.bf16.gmra.mxu1 %v5293_v53 }
 0x165   : > { %1731 = vmatmul.bf16.gmra.mxu3 %v5295_v57  ;;  %v1523_v51 = vpop.f32.mrf.mxu2 }
 0x167   : > { %v1445_v43 = vpop.f32.mrf.mxu0 }
 0x168   : > { %v1692_v44 = vpop.f32.mrf.mxu3  ;;  %v1614_v45 = vpop.f32.mrf.mxu1 }
 0x169   : > { %v5303_v41 = vadd.f32 %v1692_v44, %v1523_v51  ;;  %v5305_v47 = vadd.f32 %v1614_v45, %v1445_v43 }
 0x16b   : > { %6113 = vst [vmem:[#allocation69_spill] sm:$0xff] %v5303_v41 }
 0x16d   : > { %v1525_v1 = vpop.f32.mrf.mxu2 }
 0x16f   : > { %v1448_v49 = vpop.f32.mrf.mxu0 }
 0x170   : > { %v1694_v19 = vpop.f32.mrf.mxu3  ;;  %v1617_v23 = vpop.f32.mrf.mxu1 }
 0x171   : > { %v5307_v58 = vadd.f32 %v1694_v19, %v1525_v1  ;;  %v5309_v33 = vadd.f32 %v1617_v23, %v1448_v49 }
 0x172   : > { %1745 = vmatmul.bf16.vlgmr.msrb.gmra.mxu2 %v4877_v2  ;;  %2083 = vmatmul.bf16.vlgmr.msrb.gmra.mxu0 %v4877_v2 }
 0x173   : > { %6114 = vst [vmem:[#allocation70_spill] sm:$0xff] %v5307_v58  ;;  %2252 = vmatmul.bf16.vlgmr.msrb.gmra.mxu1 %v4881_v4 }
 0x175   : > { %1914 = vmatmul.bf16.vlgmr.msrb.gmra.mxu3 %v4881_v4  ;;  %v1528_v51 = vpop.f32.mrf.mxu2 }
 0x177   : > { %v1450_v45 = vpop.f32.mrf.mxu0 }
 0x178   : > { %v1697_v44 = vpop.f32.mrf.mxu3  ;;  %v1619_v41 = vpop.f32.mrf.mxu1 }
 0x179   : > { %v5315_v43 = vadd.f32 %v1697_v44, %v1528_v51  ;;  %v5317_v1 = vadd.f32 %v1619_v41, %v1450_v45 }
 0x17b   : > { %6115 = vst [vmem:[#allocation71_spill] sm:$0xff] %v5315_v43 }
 0x17d   : > { %v1530_v19 = vpop.f32.mrf.mxu2 }
 0x17f   : > { %v1453_v23 = vpop.f32.mrf.mxu0 }
 0x180   : > { %v1699_v58 = vpop.f32.mrf.mxu3  ;;  %v1622_v57 = vpop.f32.mrf.mxu1 }
 0x181   : > { %v5319_v49 = vadd.f32 %v1699_v58, %v1530_v19  ;;  %v5321_v14 = vadd.f32 %v1622_v57, %v1453_v23 }
 0x182   : > { %1750 = vmatmul.bf16.gmra.mxu2 %v4905_v28  ;;  %2088 = vmatmul.bf16.gmra.mxu0 %v4905_v28 }
 0x183   : > { %6116 = vst [vmem:[#allocation72_spill] sm:$0xff] %v5319_v49  ;;  %2257 = vmatmul.bf16.gmra.mxu1 %v4909_v30 }
 0x185   : > { %1919 = vmatmul.bf16.gmra.mxu3 %v4909_v30  ;;  %v1533_v2 = vpop.f32.mrf.mxu2 }
 0x187   : > { %v1455_v51 = vpop.f32.mrf.mxu0 }
 0x188   : > { %v1702_v4 = vpop.f32.mrf.mxu3  ;;  %v1624_v44 = vpop.f32.mrf.mxu1 }
 0x189   : > { %v5327_v41 = vadd.f32 %v1702_v4, %v1533_v2  ;;  %v5329_v58 = vadd.f32 %v1624_v44, %v1455_v51 }
 0x18b   : > { %6117 = vst [vmem:[#allocation73_spill] sm:$0xff] %v5327_v41 }
 0x18d   : > { %v1535_v45 = vpop.f32.mrf.mxu2 }
 0x18f   : > { %v1458_v23 = vpop.f32.mrf.mxu0 }
 0x190   : > { %v1704_v19 = vpop.f32.mrf.mxu3  ;;  %v1627_v49 = vpop.f32.mrf.mxu1 }
 0x191   : > { %v5331_v57 = vadd.f32 %v1704_v19, %v1535_v45  ;;  %v5333_v43 = vadd.f32 %v1627_v49, %v1458_v23 }
 0x192   : > { %1755 = vmatmul.bf16.gmra.mxu2 %v4925_v40  ;;  %2093 = vmatmul.bf16.gmra.mxu0 %v4925_v40 }
 0x193   : > { %6118 = vst [vmem:[#allocation74_spill] sm:$0xff] %v5331_v57  ;;  %2262 = vmatmul.bf16.gmra.mxu1 %v4929_v42 }
 0x195   : > { %1924 = vmatmul.bf16.gmra.mxu3 %v4929_v42  ;;  %v1538_v28 = vpop.f32.mrf.mxu2 }
 0x197   : > { %v1460_v4 = vpop.f32.mrf.mxu0 }
 0x198   : > { %v1707_v30 = vpop.f32.mrf.mxu3  ;;  %v1629_v51 = vpop.f32.mrf.mxu1 }
 0x199   : > { %v5339_v2 = vadd.f32 %v1707_v30, %v1538_v28  ;;  %v5341_v44 = vadd.f32 %v1629_v51, %v1460_v4 }
 0x19b   : > { %6119 = vst [vmem:[#allocation75_spill] sm:$0xff] %v5339_v2 }
 0x19d   : > { %v1540_v45 = vpop.f32.mrf.mxu2 }
 0x19f   : > { %v1463_v23 = vpop.f32.mrf.mxu0 }
 0x1a0   : > { %v1709_v19 = vpop.f32.mrf.mxu3  ;;  %v1632_v57 = vpop.f32.mrf.mxu1 }
 0x1a1   : > { %v5343_v49 = vadd.f32 %v1709_v19, %v1540_v45  ;;  %v5345_v41 = vadd.f32 %v1632_v57, %v1463_v23 }
 0x1a2   : > { %1760 = vmatmul.bf16.gmra.mxu2 %v4953_v0  ;;  %2098 = vmatmul.bf16.gmra.mxu0 %v4953_v0 }
 0x1a3   : > { %6120 = vst [vmem:[#allocation76_spill] sm:$0xff] %v5343_v49  ;;  %2267 = vmatmul.bf16.gmra.mxu1 %v4957_v6 }
 0x1a5   : > { %1929 = vmatmul.bf16.gmra.mxu3 %v4957_v6  ;;  %v1543_v40 = vpop.f32.mrf.mxu2 }
 0x1a7   : > { %v1465_v30 = vpop.f32.mrf.mxu0 }
 0x1a8   : > { %v1712_v42 = vpop.f32.mrf.mxu3  ;;  %v1634_v4 = vpop.f32.mrf.mxu1 }
 0x1a9   : > { %v5351_v28 = vadd.f32 %v1712_v42, %v1543_v40  ;;  %v5353_v51 = vadd.f32 %v1634_v4, %v1465_v30 }
 0x1ab   : > { %6121 = vst [vmem:[#allocation77_spill] sm:$0xff] %v5351_v28 }
 0x1ad   : > { %v1545_v45 = vpop.f32.mrf.mxu2 }
 0x1af   : > { %v1468_v23 = vpop.f32.mrf.mxu0 }
 0x1b0   : > { %v1714_v19 = vpop.f32.mrf.mxu3  ;;  %v1637_v49 = vpop.f32.mrf.mxu1 }
 0x1b1   : > { %v5355_v57 = vadd.f32 %v1714_v19, %v1545_v45  ;;  %v5357_v2 = vadd.f32 %v1637_v49, %v1468_v23 }
 0x1b2   : > { %1765 = vmatmul.bf16.gmra.mxu2 %v4973_v16  ;;  %2103 = vmatmul.bf16.gmra.mxu0 %v4973_v16 }
 0x1b3   : > { %6122 = vst [vmem:[#allocation78_spill] sm:$0xff] %v5355_v57  ;;  %2272 = vmatmul.bf16.gmra.mxu1 %v4977_v18 }
 0x1b5   : > { %1934 = vmatmul.bf16.gmra.mxu3 %v4977_v18  ;;  %v1548_v0 = vpop.f32.mrf.mxu2 }
 0x1b7   : > { %v1470_v42 = vpop.f32.mrf.mxu0 }
 0x1b8   : > { %v1717_v6 = vpop.f32.mrf.mxu3  ;;  %v1639_v30 = vpop.f32.mrf.mxu1 }
 0x1b9   : > { %v5363_v40 = vadd.f32 %v1717_v6, %v1548_v0  ;;  %v5365_v4 = vadd.f32 %v1639_v30, %v1470_v42 }
 0x1bb   : > { %6123 = vst [vmem:[#allocation79_spill] sm:$0xff] %v5363_v40 }
 0x1bd   : > { %v1550_v45 = vpop.f32.mrf.mxu2 }
 0x1bf   : > { %v1473_v23 = vpop.f32.mrf.mxu0 }
 0x1c0   : > { %v1719_v19 = vpop.f32.mrf.mxu3  ;;  %v1642_v57 = vpop.f32.mrf.mxu1 }
 0x1c1   : > { %v5367_v49 = vadd.f32 %v1719_v19, %v1550_v45  ;;  %v5369_v28 = vadd.f32 %v1642_v57, %v1473_v23 }
 0x1c2   : > { %1770 = vmatmul.bf16.gmra.mxu2 %v5001_v48  ;;  %2108 = vmatmul.bf16.gmra.mxu0 %v5001_v48 }
 0x1c3   : > { %6124 = vst [vmem:[#allocation80_spill] sm:$0xff] %v5367_v49  ;;  %2277 = vmatmul.bf16.gmra.mxu1 %v5005_v50 }
 0x1c5   : > { %1939 = vmatmul.bf16.gmra.mxu3 %v5005_v50  ;;  %v1553_v16 = vpop.f32.mrf.mxu2 }
 0x1c7   : > { %v1475_v6 = vpop.f32.mrf.mxu0 }
 0x1c8   : > { %v1722_v18 = vpop.f32.mrf.mxu3  ;;  %v1644_v42 = vpop.f32.mrf.mxu1 }
 0x1c9   : > { %v5375_v0 = vadd.f32 %v1722_v18, %v1553_v16  ;;  %v5377_v30 = vadd.f32 %v1644_v42, %v1475_v6 }
 0x1cb   : > { %6125 = vst [vmem:[#allocation81_spill] sm:$0xff] %v5375_v0 }
 0x1cd   : > { %v1555_v45 = vpop.f32.mrf.mxu2 }
 0x1cf   : > { %v1478_v23 = vpop.f32.mrf.mxu0 }
 0x1d0   : > { %v1724_v19 = vpop.f32.mrf.mxu3  ;;  %v1647_v49 = vpop.f32.mrf.mxu1 }
 0x1d1   : > { %v5379_v57 = vadd.f32 %v1724_v19, %v1555_v45  ;;  %v5381_v40 = vadd.f32 %v1647_v49, %v1478_v23 }
 0x1d2   : > { %1775 = vmatmul.bf16.gmra.mxu2 %v5021_v60  ;;  %2113 = vmatmul.bf16.gmra.mxu0 %v5021_v60 }
 0x1d3   : > { %6126 = vst [vmem:[#allocation82_spill] sm:$0xff] %v5379_v57  ;;  %2282 = vmatmul.bf16.gmra.mxu1 %v5025_v62 }
 0x1d5   : > { %1944 = vmatmul.bf16.gmra.mxu3 %v5025_v62  ;;  %v1558_v48 = vpop.f32.mrf.mxu2 }
 0x1d7   : > { %v1480_v18 = vpop.f32.mrf.mxu0 }
 0x1d8   : > { %v1727_v50 = vpop.f32.mrf.mxu3  ;;  %v1649_v6 = vpop.f32.mrf.mxu1 }
 0x1d9   : > { %v5387_v16 = vadd.f32 %v1727_v50, %v1558_v48  ;;  %v5389_v42 = vadd.f32 %v1649_v6, %v1480_v18 }
 0x1db   : > { %6127 = vst [vmem:[#allocation83_spill] sm:$0xff] %v5387_v16 }
 0x1dd   : > { %v1560_v45 = vpop.f32.mrf.mxu2 }
 0x1df   : > { %v1483_v23 = vpop.f32.mrf.mxu0 }
 0x1e0   : > { %v1729_v49 = vpop.f32.mrf.mxu3  ;;  %v1652_v60 = vpop.f32.mrf.mxu1 }
 0x1e1   : > { %v5391_v19 = vadd.f32 %v1729_v49, %v1560_v45  ;;  %v5393_v57 = vadd.f32 %v1652_v60, %v1483_v23  ;;  %v2992_v23 = vld [vmem:[%s266_s10] sm:$0x7] }
 0x1e2   : > { %1780 = vmatmul.bf16.gmra.mxu2 %v5049_v36  ;;  %2118 = vmatmul.bf16.gmra.mxu0 %v5049_v36 }
 0x1e3   : > { %6128 = vst [vmem:[#allocation84_spill] sm:$0xff] %v5391_v19  ;;  %2287 = vmatmul.bf16.gmra.mxu1 %v5053_v38 }
 0x1e4   : > { %6129 = vst [vmem:[#allocation85_spill] sm:$0xff] %v5393_v57 }
 0x1e5   : > { %1949 = vmatmul.bf16.gmra.mxu3 %v5053_v38  ;;  %v1563_v62 = vpop.f32.mrf.mxu2  ;;  %v5408_v38 = vperm.slane %v2992_v23, 2 }
 0x1e7   : > { %v1485_v18 = vpop.f32.mrf.mxu0 }
 0x1e8   : > { %v1732_v48 = vpop.f32.mrf.mxu3  ;;  %v1654_v6 = vpop.f32.mrf.mxu1 }
 0x1e9   : > { %v5401_v50 = vadd.f32 %v1732_v48, %v1563_v62  ;;  %v5403_v45 = vadd.f32 %v1654_v6, %v1485_v18  ;;  %v5417_v48 = vperm.slane %v2992_v23, 0 }
 0x1eb   : > { %6130 = vst [vmem:[#allocation86_spill] sm:$0xff] %v5401_v50 }
 0x1ec   : > { %6131 = vst [vmem:[#allocation87_spill] sm:$0xff] %v5403_v45 }
 0x1ed   : > { %v1565_v49 = vpop.f32.mrf.mxu2 }
 0x1ef   : > { %v2084_v19 = vpop.f32.mrf.mxu0 }
 0x1f0   : > { %v1734_v36 = vpop.f32.mrf.mxu3  ;;  %v2253_v16 = vpop.f32.mrf.mxu1 }
 0x1f1   : > { %v5406_v60 = vadd.f32 %v1734_v36, %v1565_v49  ;;  %v2254_v0 = vadd.f32 %v2253_v16, %v2084_v19  ;;  %v5419_v49 = vperm.slane %v2992_v23, 1  ;;  %v3000_v19 = vadd.f32 %v5417_v48, %v5077_v10 }
 0x1f2   : > { %1785 = vmatmul.bf16.gmra.mxu2 %v5069_v56  ;;  %2123 = vmatmul.bf16.gmra.mxu0 %v5069_v56 }
 0x1f3   : > { %6132 = vst [vmem:[#allocation88_spill] sm:$0xff] %v5406_v60  ;;  %v3002_v62 = vadd.f32 %v5408_v38, %v2254_v0  ;;  %2292 = vmatmul.bf16.gmra.mxu1 %v5073_v59 }
 0x1f5   : > { %1954 = vmatmul.bf16.gmra.mxu3 %v5073_v59  ;;  %v3193_v18 = vpack.c.bf16 %v3002_v62, %v3002_v62  ;;  %v1746_v6 = vpop.f32.mrf.mxu2 }
 0x1f7   : > { %3321 = vst [vmem:[%s5421_s7 + $0x8] sm:$0xf] %v3193_v18  ;;  %v2086_v16 = vpop.f32.mrf.mxu0 }
 0x1f8   : > { %v1915_v36 = vpop.f32.mrf.mxu3  ;;  %v2255_v0 = vpop.f32.mrf.mxu1 }
 0x1f9   : > { %v1916_v56 = vadd.f32 %v1915_v36, %v1746_v6  ;;  %v2256_v60 = vadd.f32 %v2255_v0, %v2086_v16  ;;  %v3003_v36 = vadd.f32 %v5417_v48, %v5089_v26 }
 0x1fb   : > { %v3001_v59 = vadd.f32 %v5419_v49, %v1916_v56  ;;  %v3005_v23 = vadd.f32 %v5408_v38, %v2256_v60 }
 0x1fd   : > { %v3192_v62 = vpack.c.bf16 %v3001_v59, %v3000_v19  ;;  %v3195_v50 = vpack.c.bf16 %v3005_v23, %v3005_v23  ;;  %v1748_v17 = vpop.f32.mrf.mxu2 }
 0x1ff   : > { %3320 = vst [vmem:[%s5421_s7] sm:$0xff] %v3192_v62  ;;  %v2089_v18 = vpop.f32.mrf.mxu0 }
 0x200   : > { %v1917_v45 = vpop.f32.mrf.mxu3  ;;  %3323 = vst [vmem:[%s5421_s7 + $0x14] sm:$0xf] %v3195_v50  ;;  %v2258_v6 = vpop.f32.mrf.mxu1 }
 0x201   : > { %v1918_v57 = vadd.f32 %v1917_v45, %v1748_v17  ;;  %v2259_v56 = vadd.f32 %v2258_v6, %v2089_v18 }
 0x202   : > { %1790 = vmatmul.bf16.gmra.mxu2 %v5103_v12  ;;  %2128 = vmatmul.bf16.gmra.mxu0 %v5103_v12  ;;  %v3006_v12 = vadd.f32 %v5417_v48, %v5113_v24 }
 0x203   : > { %v3004_v10 = vadd.f32 %v5419_v49, %v1918_v57  ;;  %v3008_v16 = vadd.f32 %v5408_v38, %v2259_v56  ;;  %2297 = vmatmul.bf16.gmra.mxu1 %v5109_v20 }
 0x205   : > { %v3194_v60 = vpack.c.bf16 %v3004_v10, %v3003_v36  ;;  %1959 = vmatmul.bf16.gmra.mxu3 %v5109_v20  ;;  %v3197_v17 = vpack.c.bf16 %v3008_v16, %v3008_v16  ;;  %v1751_v50 = vpop.f32.mrf.mxu2 }
 0x207   : > { %3322 = vst [vmem:[%s5421_s7 + $0xc] sm:$0xff] %v3194_v60  ;;  %v2091_v45 = vpop.f32.mrf.mxu0  ;;  %v3009_v60 = vadd.f32 %v5417_v48, %v5121_v35 }
 0x208   : > { %v1920_v26 = vpop.f32.mrf.mxu3  ;;  %3325 = vst [vmem:[%s5421_s7 + $0x20] sm:$0xf] %v3197_v17  ;;  %v2260_v0 = vpop.f32.mrf.mxu1 }
 0x209   : > { %v1921_v57 = vadd.f32 %v1920_v26, %v1751_v50  ;;  %v2261_v59 = vadd.f32 %v2260_v0, %v2091_v45 }
 0x20b   : > { %v3007_v19 = vadd.f32 %v5419_v49, %v1921_v57  ;;  %v3011_v23 = vadd.f32 %v5408_v38, %v2261_v59 }
 0x20d   : > { %v3196_v62 = vpack.c.bf16 %v3007_v19, %v3006_v12  ;;  %v3199_v20 = vpack.c.bf16 %v3011_v23, %v3011_v23  ;;  %v1753_v18 = vpop.f32.mrf.mxu2 }
 0x20f   : > { %3324 = vst [vmem:[%s5421_s7 + $0x18] sm:$0xff] %v3196_v62  ;;  %v2094_v10 = vpop.f32.mrf.mxu0 }
 0x210   : > { %v1922_v6 = vpop.f32.mrf.mxu3  ;;  %3327 = vst [vmem:[%s5421_s7 + $0x2c] sm:$0xf] %v3199_v20  ;;  %v2263_v56 = vpop.f32.mrf.mxu1 }
 0x211   : > { %v1923_v36 = vadd.f32 %v1922_v6, %v1753_v18  ;;  %v2264_v16 = vadd.f32 %v2263_v56, %v2094_v10  ;;  %v3015_v56 = vadd.f32 %v5417_v48, %v5153_v34 }
 0x212   : > { %1795 = vmatmul.bf16.gmra.mxu2 %v5131_v11  ;;  %2133 = vmatmul.bf16.gmra.mxu0 %v5131_v11  ;;  %v3012_v11 = vadd.f32 %v5417_v48, %v5141_v32 }
 0x213   : > { %v3010_v24 = vadd.f32 %v5419_v49, %v1923_v36  ;;  %v3014_v50 = vadd.f32 %v5408_v38, %v2264_v16  ;;  %2302 = vmatmul.bf16.gmra.mxu1 %v5137_v27 }
 0x215   : > { %v3198_v17 = vpack.c.bf16 %v3010_v24, %v3009_v60  ;;  %1964 = vmatmul.bf16.gmra.mxu3 %v5137_v27  ;;  %v3201_v26 = vpack.c.bf16 %v3014_v50, %v3014_v50  ;;  %v1756_v57 = vpop.f32.mrf.mxu2 }
 0x217   : > { %3326 = vst [vmem:[%s5421_s7 + $0x24] sm:$0xff] %v3198_v17  ;;  %v2096_v0 = vpop.f32.mrf.mxu0 }
 0x218   : > { %v1925_v35 = vpop.f32.mrf.mxu3  ;;  %3329 = vst [vmem:[%s5421_s7 + $0x38] sm:$0xf] %v3201_v26  ;;  %v2265_v12 = vpop.f32.mrf.mxu1 }
 0x219   : > { %v1926_v45 = vadd.f32 %v1925_v35, %v1756_v57  ;;  %v2266_v59 = vadd.f32 %v2265_v12, %v2096_v0 }
 0x21b   : > { %v3013_v19 = vadd.f32 %v5419_v49, %v1926_v45  ;;  %v3017_v23 = vadd.f32 %v5408_v38, %v2266_v59 }
 0x21d   : > { %v3200_v62 = vpack.c.bf16 %v3013_v19, %v3012_v11  ;;  %v3203_v27 = vpack.c.bf16 %v3017_v23, %v3017_v23  ;;  %v1758_v20 = vpop.f32.mrf.mxu2 }
 0x21f   : > { %3328 = vst [vmem:[%s5421_s7 + $0x30] sm:$0xff] %v3200_v62  ;;  %v2099_v36 = vpop.f32.mrf.mxu0 }
 0x220   : > { %v1927_v18 = vpop.f32.mrf.mxu3  ;;  %3331 = vst [vmem:[%s5421_s7 + $0x44] sm:$0xf] %v3203_v27  ;;  %v2268_v10 = vpop.f32.mrf.mxu1 }
 0x221   : > { %v1928_v6 = vadd.f32 %v1927_v18, %v1758_v20  ;;  %v2269_v60 = vadd.f32 %v2268_v10, %v2099_v36  ;;  %v3021_v20 = vadd.f32 %v5417_v48, %v5185_v22 }
 0x222   : > { %1800 = vmatmul.bf16.gmra.mxu2 %v5167_v54  ;;  %2138 = vmatmul.bf16.gmra.mxu0 %v5167_v54  ;;  %v3018_v54 = vadd.f32 %v5417_v48, %v5177_v13 }
 0x223   : > { %v3016_v32 = vadd.f32 %v5419_v49, %v1928_v6  ;;  %v3020_v16 = vadd.f32 %v5408_v38, %v2269_v60  ;;  %2307 = vmatmul.bf16.gmra.mxu1 %v5173_v39 }
 0x225   : > { %v3202_v24 = vpack.c.bf16 %v3016_v32, %v3015_v56  ;;  %1969 = vmatmul.bf16.gmra.mxu3 %v5173_v39  ;;  %v3205_v17 = vpack.c.bf16 %v3020_v16, %v3020_v16  ;;  %v1761_v50 = vpop.f32.mrf.mxu2 }
 0x227   : > { %3330 = vst [vmem:[%s5421_s7 + $0x3c] sm:$0xff] %v3202_v24  ;;  %v2101_v57 = vpop.f32.mrf.mxu0 }
 0x228   : > { %v1930_v34 = vpop.f32.mrf.mxu3  ;;  %3333 = vst [vmem:[%s5421_s7 + $0x50] sm:$0xf] %v3205_v17  ;;  %v2270_v35 = vpop.f32.mrf.mxu1 }
 0x229   : > { %v1931_v26 = vadd.f32 %v1930_v34, %v1761_v50  ;;  %v2271_v0 = vadd.f32 %v2270_v35, %v2101_v57 }
 0x22b   : > { %v3019_v45 = vadd.f32 %v5419_v49, %v1931_v26  ;;  %v3023_v11 = vadd.f32 %v5408_v38, %v2271_v0  ;;  %v3027_v0 = vadd.f32 %v5417_v48, %v5217_v21 }
 0x22d   : > { %v3204_v12 = vpack.c.bf16 %v3019_v45, %v3018_v54  ;;  %v3207_v39 = vpack.c.bf16 %v3023_v11, %v3023_v11  ;;  %v1763_v19 = vpop.f32.mrf.mxu2 }
 0x22f   : > { %3332 = vst [vmem:[%s5421_s7 + $0x48] sm:$0xff] %v3204_v12  ;;  %v2104_v23 = vpop.f32.mrf.mxu0 }
 0x230   : > { %v1932_v59 = vpop.f32.mrf.mxu3  ;;  %3335 = vst [vmem:[%s5421_s7 + $0x5c] sm:$0xf] %v3207_v39  ;;  %v2273_v27 = vpop.f32.mrf.mxu1 }
 0x231   : > { %v1933_v62 = vadd.f32 %v1932_v59, %v1763_v19  ;;  %v2274_v18 = vadd.f32 %v2273_v27, %v2104_v23 }
 0x232   : > { %1805 = vmatmul.bf16.gmra.mxu2 %v5195_v37  ;;  %2143 = vmatmul.bf16.gmra.mxu0 %v5195_v37  ;;  %v3024_v37 = vadd.f32 %v5417_v48, %v5205_v25 }
 0x233   : > { %v3022_v13 = vadd.f32 %v5419_v49, %v1933_v62  ;;  %v3026_v36 = vadd.f32 %v5408_v38, %v2274_v18  ;;  %2312 = vmatmul.bf16.gmra.mxu1 %v5201_v15 }
 0x235   : > { %v3206_v6 = vpack.c.bf16 %v3022_v13, %v3021_v20  ;;  %1974 = vmatmul.bf16.gmra.mxu3 %v5201_v15  ;;  %v3209_v10 = vpack.c.bf16 %v3026_v36, %v3026_v36  ;;  %v1766_v56 = vpop.f32.mrf.mxu2 }
 0x237   : > { %3334 = vst [vmem:[%s5421_s7 + $0x54] sm:$0xff] %v3206_v6  ;;  %v2106_v60 = vpop.f32.mrf.mxu0 }
 0x238   : > { %v1935_v22 = vpop.f32.mrf.mxu3  ;;  %3337 = vst [vmem:[%s5421_s7 + $0x68] sm:$0xf] %v3209_v10  ;;  %v2275_v24 = vpop.f32.mrf.mxu1 }
 0x239   : > { %v1936_v32 = vadd.f32 %v1935_v22, %v1766_v56  ;;  %v2276_v17 = vadd.f32 %v2275_v24, %v2106_v60  ;;  %v3033_v60 = vadd.f32 %v5417_v48, %v5249_v8 }
 0x23b   : > { %v3025_v16 = vadd.f32 %v5419_v49, %v1936_v32  ;;  %v3029_v34 = vadd.f32 %v5408_v38, %v2276_v17 }
 0x23d   : > { %v3208_v50 = vpack.c.bf16 %v3025_v16, %v3024_v37  ;;  %v3211_v15 = vpack.c.bf16 %v3029_v34, %v3029_v34  ;;  %v1768_v26 = vpop.f32.mrf.mxu2 }
 0x23f   : > { %3336 = vst [vmem:[%s5421_s7 + $0x60] sm:$0xff] %v3208_v50  ;;  %v2109_v54 = vpop.f32.mrf.mxu0 }
 0x240   : > { %v1937_v57 = vpop.f32.mrf.mxu3  ;;  %3339 = vst [vmem:[%s5421_s7 + $0x74] sm:$0xf] %v3211_v15  ;;  %v2278_v45 = vpop.f32.mrf.mxu1 }
 0x241   : > { %v1938_v35 = vadd.f32 %v1937_v57, %v1768_v26  ;;  %v2279_v12 = vadd.f32 %v2278_v45, %v2109_v54 }
 0x242   : > { %1810 = vmatmul.bf16.gmra.mxu2 %v5231_v52  ;;  %2148 = vmatmul.bf16.gmra.mxu0 %v5231_v52  ;;  %v3030_v52 = vadd.f32 %v5417_v48, %v5241_v61 }
 0x243   : > { %v3028_v25 = vadd.f32 %v5419_v49, %v1938_v35  ;;  %v3032_v39 = vadd.f32 %v5408_v38, %v2279_v12  ;;  %2317 = vmatmul.bf16.gmra.mxu1 %v5237_v7 }
 0x245   : > { %v3210_v11 = vpack.c.bf16 %v3028_v25, %v3027_v0  ;;  %1979 = vmatmul.bf16.gmra.mxu3 %v5237_v7  ;;  %v3213_v19 = vpack.c.bf16 %v3032_v39, %v3032_v39  ;;  %v1771_v59 = vpop.f32.mrf.mxu2 }
 0x247   : > { %3338 = vst [vmem:[%s5421_s7 + $0x6c] sm:$0xff] %v3210_v11  ;;  %v2111_v23 = vpop.f32.mrf.mxu0 }
 0x248   : > { %v1940_v21 = vpop.f32.mrf.mxu3  ;;  %3341 = vst [vmem:[%s5421_s7 + $0x80] sm:$0xf] %v3213_v19  ;;  %v2280_v27 = vpop.f32.mrf.mxu1  ;;  %v3039_v19 = vadd.f32 %v5417_v48, %v5277_v9 }
 0x249   : > { %v1941_v62 = vadd.f32 %v1940_v21, %v1771_v59  ;;  %v2281_v13 = vadd.f32 %v2280_v27, %v2111_v23 }
 0x24b   : > { %v3031_v20 = vadd.f32 %v5419_v49, %v1941_v62  ;;  %v3035_v6 = vadd.f32 %v5408_v38, %v2281_v13 }
 0x24d   : > { %v3212_v18 = vpack.c.bf16 %v3031_v20, %v3030_v52  ;;  %v3215_v7 = vpack.c.bf16 %v3035_v6, %v3035_v6  ;;  %v1773_v36 = vpop.f32.mrf.mxu2 }
 0x24f   : > { %3340 = vst [vmem:[%s5421_s7 + $0x78] sm:$0xff] %v3212_v18  ;;  %v2114_v22 = vpop.f32.mrf.mxu0 }
 0x250   : > { %v1942_v10 = vpop.f32.mrf.mxu3  ;;  %3343 = vst [vmem:[%s5421_s7 + $0x8c] sm:$0xf] %v3215_v7  ;;  %v2283_v32 = vpop.f32.mrf.mxu1 }
 0x251   : > { %v1943_v56 = vadd.f32 %v1942_v10, %v1773_v36  ;;  %v2284_v24 = vadd.f32 %v2283_v32, %v2114_v22 }
 0x252   : > { %1815 = vmatmul.bf16.gmra.mxu2 %v5259_v55  ;;  %2153 = vmatmul.bf16.gmra.mxu0 %v5259_v55  ;;  %v3036_v55 = vadd.f32 %v5417_v48, %v5269_v46 }
 0x253   : > { %v3034_v61 = vadd.f32 %v5419_v49, %v1943_v56  ;;  %v3038_v16 = vadd.f32 %v5408_v38, %v2284_v24  ;;  %2322 = vmatmul.bf16.gmra.mxu1 %v5265_v63 }
 0x255   : > { %v3214_v37 = vpack.c.bf16 %v3034_v61, %v3033_v60  ;;  %1984 = vmatmul.bf16.gmra.mxu3 %v5265_v63  ;;  %v3217_v17 = vpack.c.bf16 %v3038_v16, %v3038_v16  ;;  %v1776_v50 = vpop.f32.mrf.mxu2  ;;  %v3045_v61 = vadd.f32 %v5417_v48, %v5305_v47 }
 0x257   : > { %3342 = vst [vmem:[%s5421_s7 + $0x84] sm:$0xff] %v3214_v37  ;;  %v2116_v15 = vpop.f32.mrf.mxu0 }
 0x258   : > { %v1945_v8 = vpop.f32.mrf.mxu3  ;;  %3345 = vst [vmem:[%s5421_s7 + $0x98] sm:$0xf] %v3217_v17  ;;  %v2285_v26 = vpop.f32.mrf.mxu1 }
 0x259   : > { %v1946_v34 = vadd.f32 %v1945_v8, %v1776_v50  ;;  %v2286_v35 = vadd.f32 %v2285_v26, %v2116_v15 }
 0x25b   : > { %v3037_v57 = vadd.f32 %v5419_v49, %v1946_v34  ;;  %v3041_v45 = vadd.f32 %v5408_v38, %v2286_v35 }
 0x25d   : > { %v3216_v54 = vpack.c.bf16 %v3037_v57, %v3036_v55  ;;  %v3219_v63 = vpack.c.bf16 %v3041_v45, %v3041_v45  ;;  %v1778_v0 = vpop.f32.mrf.mxu2 }
 0x25f   : > { %3344 = vst [vmem:[%s5421_s7 + $0x90] sm:$0xff] %v3216_v54  ;;  %v2119_v11 = vpop.f32.mrf.mxu0 }
 0x260   : > { %v1947_v25 = vpop.f32.mrf.mxu3  ;;  %3347 = vst [vmem:[%s5421_s7 + $0xa4] sm:$0xf] %v3219_v63  ;;  %v2288_v39 = vpop.f32.mrf.mxu1 }
 0x261   : > { %v1948_v12 = vadd.f32 %v1947_v25, %v1778_v0  ;;  %v2289_v59 = vadd.f32 %v2288_v39, %v2119_v11  ;;  %v6133_v39 = vld [vmem:[#allocation25_spill] sm:$0xff] }
 0x262   : > { %1820 = vmatmul.bf16.gmra.mxu2 %v5287_v31  ;;  %2158 = vmatmul.bf16.gmra.mxu0 %v5287_v31  ;;  %v3042_v31 = vadd.f32 %v5417_v48, %v5297_v29 }
 0x263   : > { %v3040_v46 = vadd.f32 %v5419_v49, %v1948_v12  ;;  %v3044_v62 = vadd.f32 %v5408_v38, %v2289_v59  ;;  %2327 = vmatmul.bf16.gmra.mxu1 %v5293_v53  ;;  %v3051_v12 = vadd.f32 %v5417_v48, %v5317_v1  ;;  %v6134_v59 = vld [vmem:[#allocation26_spill] sm:$0xff] }
 0x265   : > { %v3218_v21 = vpack.c.bf16 %v3040_v46, %v3039_v19  ;;  %1989 = vmatmul.bf16.gmra.mxu3 %v5293_v53  ;;  %v3221_v23 = vpack.c.bf16 %v3044_v62, %v3044_v62  ;;  %v1781_v27 = vpop.f32.mrf.mxu2 }
 0x267   : > { %3346 = vst [vmem:[%s5421_s7 + $0x9c] sm:$0xff] %v3218_v21  ;;  %v2121_v20 = vpop.f32.mrf.mxu0 }
 0x268   : > { %v1950_v9 = vpop.f32.mrf.mxu3  ;;  %3349 = vst [vmem:[%s5421_s7 + $0xb0] sm:$0xf] %v3221_v23  ;;  %v2290_v13 = vpop.f32.mrf.mxu1 }
 0x269   : > { %v1951_v52 = vadd.f32 %v1950_v9, %v1781_v27  ;;  %v2291_v6 = vadd.f32 %v2290_v13, %v2121_v20 }
 0x26b   : > { %v3043_v18 = vadd.f32 %v5419_v49, %v1951_v52  ;;  %v3047_v36 = vadd.f32 %v5408_v38, %v2291_v6  ;;  %v3054_v52 = vadd.f32 %v5417_v48, %v5321_v14 }
 0x26d   : > { %v3220_v7 = vpack.c.bf16 %v3043_v18, %v3042_v31  ;;  %v3223_v53 = vpack.c.bf16 %v3047_v36, %v3047_v36  ;;  %v1783_v10 = vpop.f32.mrf.mxu2 }
 0x26f   : > { %3348 = vst [vmem:[%s5421_s7 + $0xa8] sm:$0xff] %v3220_v7  ;;  %v2124_v32 = vpop.f32.mrf.mxu0 }
 0x270   : > { %v1952_v56 = vpop.f32.mrf.mxu3  ;;  %3351 = vst [vmem:[%s5421_s7 + $0xbc] sm:$0xf] %v3223_v53  ;;  %v2293_v60 = vpop.f32.mrf.mxu1 }
 0x271   : > { %v1953_v22 = vadd.f32 %v1952_v56, %v1783_v10  ;;  %v2294_v24 = vadd.f32 %v2293_v60, %v2124_v32  ;;  %v6135_v60 = vld [vmem:[#allocation27_spill] sm:$0xff] }
 0x272   : > { %1825 = vmatmul.bf16.gmra.mxu2 %v4879_v3  ;;  %2163 = vmatmul.bf16.gmra.mxu0 %v4879_v3  ;;  %v3048_v3 = vadd.f32 %v5417_v48, %v5309_v33 }
 0x273   : > { %v3046_v29 = vadd.f32 %v5419_v49, %v1953_v22  ;;  %v3050_v16 = vadd.f32 %v5408_v38, %v2294_v24  ;;  %2332 = vmatmul.bf16.gmra.mxu1 %v4883_v5  ;;  %v3057_v22 = vadd.f32 %v5417_v48, %v5329_v58  ;;  %v6136_v24 = vld [vmem:[#allocation28_spill] sm:$0xff] }
 0x275   : > { %v3222_v37 = vpack.c.bf16 %v3046_v29, %v3045_v61  ;;  %1994 = vmatmul.bf16.gmra.mxu3 %v4883_v5  ;;  %v3225_v17 = vpack.c.bf16 %v3050_v16, %v3050_v16  ;;  %v1786_v50 = vpop.f32.mrf.mxu2 }
 0x277   : > { %3350 = vst [vmem:[%s5421_s7 + $0xb4] sm:$0xff] %v3222_v37  ;;  %v2126_v34 = vpop.f32.mrf.mxu0 }
 0x278   : > { %v1955_v47 = vpop.f32.mrf.mxu3  ;;  %3353 = vst [vmem:[%s5421_s7 + $0xc8] sm:$0xf] %v3225_v17  ;;  %v2295_v15 = vpop.f32.mrf.mxu1 }
 0x279   : > { %v1956_v8 = vadd.f32 %v1955_v47, %v1786_v50  ;;  %v2296_v55 = vadd.f32 %v2295_v15, %v2126_v34 }
 0x27b   : > { %v3049_v26 = vadd.f32 %v5419_v49, %v1956_v8  ;;  %v3053_v35 = vadd.f32 %v5408_v38, %v2296_v55  ;;  %v3060_v8 = vadd.f32 %v5417_v48, %v5333_v43 }
 0x27d   : > { %v3224_v57 = vpack.c.bf16 %v3049_v26, %v3048_v3  ;;  %v3227_v5 = vpack.c.bf16 %v3053_v35, %v3053_v35  ;;  %v1788_v54 = vpop.f32.mrf.mxu2 }
 0x27f   : > { %3352 = vst [vmem:[%s5421_s7 + $0xc0] sm:$0xff] %v3224_v57  ;;  %v2129_v0 = vpop.f32.mrf.mxu0 }
 0x280   : > { %v1957_v45 = vpop.f32.mrf.mxu3  ;;  %3355 = vst [vmem:[%s5421_s7 + $0xd4] sm:$0xf] %v3227_v5  ;;  %v2298_v25 = vpop.f32.mrf.mxu1 }
 0x281   : > { %v1958_v63 = vadd.f32 %v1957_v45, %v1788_v54  ;;  %v2299_v11 = vadd.f32 %v2298_v25, %v2129_v0  ;;  %v6137_v25 = vld [vmem:[#allocation29_spill] sm:$0xff] }
 0x282   : > { %1830 = vmatmul.bf16.gmra.mxu2 %v6133_v39  ;;  %2168 = vmatmul.bf16.gmra.mxu0 %v6133_v39 }
 0x283   : > { %v3052_v33 = vadd.f32 %v5419_v49, %v1958_v63  ;;  %v3056_v46 = vadd.f32 %v5408_v38, %v2299_v11  ;;  %2337 = vmatmul.bf16.gmra.mxu1 %v6134_v59  ;;  %v3063_v63 = vadd.f32 %v5417_v48, %v5341_v44  ;;  %v6138_v11 = vld [vmem:[#allocation30_spill] sm:$0xff] }
 0x285   : > { %v3226_v19 = vpack.c.bf16 %v3052_v33, %v3051_v12  ;;  %1999 = vmatmul.bf16.gmra.mxu3 %v6134_v59  ;;  %v3229_v21 = vpack.c.bf16 %v3056_v46, %v3056_v46  ;;  %v1791_v62 = vpop.f32.mrf.mxu2 }
 0x287   : > { %3354 = vst [vmem:[%s5421_s7 + $0xcc] sm:$0xff] %v3226_v19  ;;  %v2131_v27 = vpop.f32.mrf.mxu0 }
 0x288   : > { %v1960_v1 = vpop.f32.mrf.mxu3  ;;  %3357 = vst [vmem:[%s5421_s7 + $0xe0] sm:$0xf] %v3229_v21  ;;  %v2300_v9 = vpop.f32.mrf.mxu1 }
 0x289   : > { %v1961_v23 = vadd.f32 %v1960_v1, %v1791_v62  ;;  %v2301_v13 = vadd.f32 %v2300_v9, %v2131_v27  ;;  %v3066_v62 = vadd.f32 %v5417_v48, %v5345_v41 }
 0x28b   : > { %v3055_v20 = vadd.f32 %v5419_v49, %v1961_v23  ;;  %v3059_v18 = vadd.f32 %v5408_v38, %v2301_v13 }
 0x28d   : > { %v3228_v31 = vpack.c.bf16 %v3055_v20, %v3054_v52  ;;  %v3231_v6 = vpack.c.bf16 %v3059_v18, %v3059_v18  ;;  %v1793_v7 = vpop.f32.mrf.mxu2 }
 0x28f   : > { %3356 = vst [vmem:[%s5421_s7 + $0xd8] sm:$0xff] %v3228_v31  ;;  %v2134_v10 = vpop.f32.mrf.mxu0 }
 0x290   : > { %v1962_v36 = vpop.f32.mrf.mxu3  ;;  %3359 = vst [vmem:[%s5421_s7 + $0xec] sm:$0xf] %v3231_v6  ;;  %v2303_v56 = vpop.f32.mrf.mxu1 }
 0x291   : > { %v1963_v53 = vadd.f32 %v1962_v36, %v1793_v7  ;;  %v2304_v32 = vadd.f32 %v2303_v56, %v2134_v10  ;;  %v3069_v7 = vadd.f32 %v5417_v48, %v5353_v51 }
 0x292   : > { %1835 = vmatmul.bf16.gmra.mxu2 %v6135_v60  ;;  %2173 = vmatmul.bf16.gmra.mxu0 %v6135_v60 }
 0x293   : > { %v3058_v14 = vadd.f32 %v5419_v49, %v1963_v53  ;;  %v3062_v29 = vadd.f32 %v5408_v38, %v2304_v32  ;;  %2342 = vmatmul.bf16.gmra.mxu1 %v6136_v24  ;;  %v6139_v53 = vld [vmem:[#allocation31_spill] sm:$0xff] }
 0x295   : > { %v3230_v61 = vpack.c.bf16 %v3058_v14, %v3057_v22  ;;  %2004 = vmatmul.bf16.gmra.mxu3 %v6136_v24  ;;  %v3233_v37 = vpack.c.bf16 %v3062_v29, %v3062_v29  ;;  %v1796_v16 = vpop.f32.mrf.mxu2  ;;  %v6140_v22 = vld [vmem:[#allocation32_spill] sm:$0xff]  ;;  %v3072_v24 = vadd.f32 %v5417_v48, %v5357_v2 }
 0x297   : > { %3358 = vst [vmem:[%s5421_s7 + $0xe4] sm:$0xff] %v3230_v61  ;;  %v2136_v50 = vpop.f32.mrf.mxu0 }
 0x298   : > { %v1965_v58 = vpop.f32.mrf.mxu3  ;;  %3361 = vst [vmem:[%s5421_s7 + $0xf8] sm:$0xf] %v3233_v37  ;;  %v2305_v47 = vpop.f32.mrf.mxu1 }
 0x299   : > { %v1966_v17 = vadd.f32 %v1965_v58, %v1796_v16  ;;  %v2306_v15 = vadd.f32 %v2305_v47, %v2136_v50 }
 0x29b   : > { %v3061_v34 = vadd.f32 %v5419_v49, %v1966_v17  ;;  %v3065_v26 = vadd.f32 %v5408_v38, %v2306_v15 }
 0x29d   : > { %v3232_v3 = vpack.c.bf16 %v3061_v34, %v3060_v8  ;;  %v3235_v55 = vpack.c.bf16 %v3065_v26, %v3065_v26  ;;  %v1798_v57 = vpop.f32.mrf.mxu2  ;;  %v3075_v26 = vadd.f32 %v5417_v48, %v5365_v4 }
 0x29f   : > { %3360 = vst [vmem:[%s5421_s7 + $0xf0] sm:$0xff] %v3232_v3  ;;  %v2139_v54 = vpop.f32.mrf.mxu0 }
 0x2a0   : > { %v1967_v35 = vpop.f32.mrf.mxu3  ;;  %3363 = vst [vmem:[%s5421_s7 + $0x104] sm:$0xf] %v3235_v55  ;;  %v2308_v45 = vpop.f32.mrf.mxu1 }
 0x2a1   : > { %v1968_v5 = vadd.f32 %v1967_v35, %v1798_v57  ;;  %v2309_v0 = vadd.f32 %v2308_v45, %v2139_v54  ;;  %v6141_v57 = vld [vmem:[#allocation33_spill] sm:$0xff]  ;;  %v6142_v54 = vld [vmem:[#allocation34_spill] sm:$0xff] }
 0x2a2   : > { %1840 = vmatmul.bf16.gmra.mxu2 %v6137_v25  ;;  %2178 = vmatmul.bf16.gmra.mxu0 %v6137_v25 }
 0x2a3   : > { %v3064_v43 = vadd.f32 %v5419_v49, %v1968_v5  ;;  %v3068_v33 = vadd.f32 %v5408_v38, %v2309_v0  ;;  %2347 = vmatmul.bf16.gmra.mxu1 %v6138_v11 }
 0x2a5   : > { %v3234_v12 = vpack.c.bf16 %v3064_v43, %v3063_v63  ;;  %2009 = vmatmul.bf16.gmra.mxu3 %v6138_v11  ;;  %v3237_v39 = vpack.c.bf16 %v3068_v33, %v3068_v33  ;;  %v1801_v19 = vpop.f32.mrf.mxu2 }
 0x2a7   : > { %3362 = vst [vmem:[%s5421_s7 + $0xfc] sm:$0xff] %v3234_v12  ;;  %v2141_v59 = vpop.f32.mrf.mxu0  ;;  %v3078_v12 = vadd.f32 %v5417_v48, %v5369_v28 }
 0x2a8   : > { %v1970_v44 = vpop.f32.mrf.mxu3  ;;  %3365 = vst [vmem:[%s5421_s7 + $0x110] sm:$0xf] %v3237_v39  ;;  %v2310_v21 = vpop.f32.mrf.mxu1 }
 0x2a9   : > { %v1971_v46 = vadd.f32 %v1970_v44, %v1801_v19  ;;  %v2311_v23 = vadd.f32 %v2310_v21, %v2141_v59 }
 0x2ab   : > { %v3067_v1 = vadd.f32 %v5419_v49, %v1971_v46  ;;  %v3071_v9 = vadd.f32 %v5408_v38, %v2311_v23  ;;  %v3081_v23 = vadd.f32 %v5417_v48, %v5377_v30 }
 0x2ad   : > { %v3236_v27 = vpack.c.bf16 %v3067_v1, %v3066_v62  ;;  %v3239_v52 = vpack.c.bf16 %v3071_v9, %v3071_v9  ;;  %v1803_v20 = vpop.f32.mrf.mxu2  ;;  %v6143_v9 = vld [vmem:[#allocation35_spill] sm:$0xff] }
 0x2af   : > { %3364 = vst [vmem:[%s5421_s7 + $0x108] sm:$0xff] %v3236_v27  ;;  %v2144_v18 = vpop.f32.mrf.mxu0 }
 0x2b0   : > { %v1972_v13 = vpop.f32.mrf.mxu3  ;;  %3367 = vst [vmem:[%s5421_s7 + $0x11c] sm:$0xf] %v3239_v52  ;;  %v2313_v6 = vpop.f32.mrf.mxu1 }
 0x2b1   : > { %v1973_v31 = vadd.f32 %v1972_v13, %v1803_v20  ;;  %v2314_v36 = vadd.f32 %v2313_v6, %v2144_v18  ;;  %v6144_v13 = vld [vmem:[#allocation36_spill] sm:$0xff] }
 0x2b2   : > { %1845 = vmatmul.bf16.gmra.mxu2 %v6139_v53  ;;  %2183 = vmatmul.bf16.gmra.mxu0 %v6139_v53 }
 0x2b3   : > { %v3070_v41 = vadd.f32 %v5419_v49, %v1973_v31  ;;  %v3074_v56 = vadd.f32 %v5408_v38, %v2314_v36  ;;  %2352 = vmatmul.bf16.gmra.mxu1 %v6140_v22  ;;  %v3084_v36 = vadd.f32 %v5417_v48, %v5381_v40 }
 0x2b5   : > { %v3238_v10 = vpack.c.bf16 %v3070_v41, %v3069_v7  ;;  %2014 = vmatmul.bf16.gmra.mxu3 %v6140_v22  ;;  %v3241_v14 = vpack.c.bf16 %v3074_v56, %v3074_v56  ;;  %v1806_v32 = vpop.f32.mrf.mxu2 }
 0x2b7   : > { %3366 = vst [vmem:[%s5421_s7 + $0x114] sm:$0xff] %v3238_v10  ;;  %v2146_v61 = vpop.f32.mrf.mxu0 }
 0x2b8   : > { %v1975_v51 = vpop.f32.mrf.mxu3  ;;  %3369 = vst [vmem:[%s5421_s7 + $0x128] sm:$0xf] %v3241_v14  ;;  %v2315_v29 = vpop.f32.mrf.mxu1 }
 0x2b9   : > { %v1976_v60 = vadd.f32 %v1975_v51, %v1806_v32  ;;  %v2316_v16 = vadd.f32 %v2315_v29, %v2146_v61 }
 0x2bb   : > { %v3073_v37 = vadd.f32 %v5419_v49, %v1976_v60  ;;  %v3077_v17 = vadd.f32 %v5408_v38, %v2316_v16  ;;  %v6145_v16 = vld [vmem:[#allocation37_spill] sm:$0xff] }
 0x2bd   : > { %v3240_v58 = vpack.c.bf16 %v3073_v37, %v3072_v24  ;;  %v3243_v50 = vpack.c.bf16 %v3077_v17, %v3077_v17  ;;  %v1808_v47 = vpop.f32.mrf.mxu2  ;;  %v3087_v24 = vadd.f32 %v5417_v48, %v5389_v42 }
 0x2bf   : > { %3368 = vst [vmem:[%s5421_s7 + $0x120] sm:$0xff] %v3240_v58  ;;  %v2149_v15 = vpop.f32.mrf.mxu0 }
 0x2c0   : > { %v1977_v8 = vpop.f32.mrf.mxu3  ;;  %3371 = vst [vmem:[%s5421_s7 + $0x134] sm:$0xf] %v3243_v50  ;;  %v2318_v3 = vpop.f32.mrf.mxu1  ;;  %v6146_v50 = vld [vmem:[#allocation38_spill] sm:$0xff] }
 0x2c1   : > { %v1978_v34 = vadd.f32 %v1977_v8, %v1808_v47  ;;  %v2319_v55 = vadd.f32 %v2318_v3, %v2149_v15 }
 0x2c2   : > { %1850 = vmatmul.bf16.gmra.mxu2 %v6141_v57  ;;  %2188 = vmatmul.bf16.gmra.mxu0 %v6141_v57 }
 0x2c3   : > { %v3076_v2 = vadd.f32 %v5419_v49, %v1978_v34  ;;  %v3080_v5 = vadd.f32 %v5408_v38, %v2319_v55  ;;  %2357 = vmatmul.bf16.gmra.mxu1 %v6142_v54 }
 0x2c5   : > { %v3242_v35 = vpack.c.bf16 %v3076_v2, %v3075_v26  ;;  %2019 = vmatmul.bf16.gmra.mxu3 %v6142_v54  ;;  %v3245_v45 = vpack.c.bf16 %v3080_v5, %v3080_v5  ;;  %v1811_v63 = vpop.f32.mrf.mxu2  ;;  %v6147_v26 = vld [vmem:[#allocation85_spill] sm:$0xff] }
 0x2c6   : > { %v3090_v2 = vadd.f32 %v5417_v48, %v6147_v26 }
 0x2c7   : > { %3370 = vst [vmem:[%s5421_s7 + $0x12c] sm:$0xff] %v3242_v35  ;;  %v2151_v0 = vpop.f32.mrf.mxu0 }
 0x2c8   : > { %v1980_v4 = vpop.f32.mrf.mxu3  ;;  %3373 = vst [vmem:[%s5421_s7 + $0x140] sm:$0xf] %v3245_v45  ;;  %v2320_v25 = vpop.f32.mrf.mxu1 }
 0x2c9   : > { %v1981_v43 = vadd.f32 %v1980_v4, %v1811_v63  ;;  %v2321_v11 = vadd.f32 %v2320_v25, %v2151_v0  ;;  %v6148_v25 = vld [vmem:[#allocation87_spill] sm:$0xff] }
 0x2cb   : > { %v3079_v33 = vadd.f32 %v5419_v49, %v1981_v43  ;;  %v3083_v19 = vadd.f32 %v5408_v38, %v2321_v11 }
 0x2cd   : > { %v3244_v39 = vpack.c.bf16 %v3079_v33, %v3078_v12  ;;  %v3247_v44 = vpack.c.bf16 %v3083_v19, %v3083_v19  ;;  %v1813_v46 = vpop.f32.mrf.mxu2  ;;  %v3093_v12 = vadd.f32 %v5417_v48, %v6148_v25 }
 0x2cf   : > { %3372 = vst [vmem:[%s5421_s7 + $0x138] sm:$0xff] %v3244_v39  ;;  %v2154_v62 = vpop.f32.mrf.mxu0  ;;  %v6149_v39 = vld [vmem:[#allocation39_spill] sm:$0xff] }
 0x2d0   : > { %v1982_v59 = vpop.f32.mrf.mxu3  ;;  %3375 = vst [vmem:[%s5421_s7 + $0x14c] sm:$0xf] %v3247_v44  ;;  %v2323_v1 = vpop.f32.mrf.mxu1 }
 0x2d1   : > { %v1983_v21 = vadd.f32 %v1982_v59, %v1813_v46  ;;  %v2324_v27 = vadd.f32 %v2323_v1, %v2154_v62  ;;  %v6150_v46 = vld [vmem:[#allocation40_spill] sm:$0xff] }
 0x2d2   : > { %1855 = vmatmul.bf16.gmra.mxu2 %v6143_v9  ;;  %2193 = vmatmul.bf16.gmra.mxu0 %v6143_v9 }
 0x2d3   : > { %v3082_v28 = vadd.f32 %v5419_v49, %v1983_v21  ;;  %v3086_v20 = vadd.f32 %v5408_v38, %v2324_v27  ;;  %2362 = vmatmul.bf16.gmra.mxu1 %v6144_v13  ;;  %v6151_v27 = vld [vmem:[#allocation41_spill] sm:$0xff] }
 0x2d4   : > { %v3096_v9 = vadd.f32 %v5417_v48, %v6151_v27 }
 0x2d5   : > { %v3246_v52 = vpack.c.bf16 %v3082_v28, %v3081_v23  ;;  %2024 = vmatmul.bf16.gmra.mxu3 %v6144_v13  ;;  %v3249_v31 = vpack.c.bf16 %v3086_v20, %v3086_v20  ;;  %v1816_v18 = vpop.f32.mrf.mxu2 }
 0x2d7   : > { %3374 = vst [vmem:[%s5421_s7 + $0x144] sm:$0xff] %v3246_v52  ;;  %v2156_v7 = vpop.f32.mrf.mxu0 }
 0x2d8   : > { %v1985_v30 = vpop.f32.mrf.mxu3  ;;  %3377 = vst [vmem:[%s5421_s7 + $0x158] sm:$0xf] %v3249_v31  ;;  %v2325_v41 = vpop.f32.mrf.mxu1 }
 0x2d9   : > { %v1986_v6 = vadd.f32 %v1985_v30, %v1816_v18  ;;  %v2326_v10 = vadd.f32 %v2325_v41, %v2156_v7 }
 0x2db   : > { %v3085_v53 = vadd.f32 %v5419_v49, %v1986_v6  ;;  %v3089_v22 = vadd.f32 %v5408_v38, %v2326_v10 }
 0x2dd   : > { %v3248_v56 = vpack.c.bf16 %v3085_v53, %v3084_v36  ;;  %v3251_v14 = vpack.c.bf16 %v3089_v22, %v3089_v22  ;;  %v1818_v32 = vpop.f32.mrf.mxu2  ;;  %v6152_v53 = vld [vmem:[#allocation43_spill] sm:$0xff] }
 0x2de   : > { %v3099_v10 = vadd.f32 %v5417_v48, %v6152_v53 }
 0x2df   : > { %3376 = vst [vmem:[%s5421_s7 + $0x150] sm:$0xff] %v3248_v56  ;;  %v2159_v61 = vpop.f32.mrf.mxu0 }
 0x2e0   : > { %v1987_v51 = vpop.f32.mrf.mxu3  ;;  %3379 = vst [vmem:[%s5421_s7 + $0x164] sm:$0xf] %v3251_v14  ;;  %v2328_v29 = vpop.f32.mrf.mxu1  ;;  %v6153_v14 = vld [vmem:[#allocation42_spill] sm:$0xff] }
 0x2e1   : > { %v1988_v60 = vadd.f32 %v1987_v51, %v1818_v32  ;;  %v2329_v37 = vadd.f32 %v2328_v29, %v2159_v61 }
 0x2e2   : > { %1860 = vmatmul.bf16.gmra.mxu2 %v6145_v16  ;;  %2198 = vmatmul.bf16.gmra.mxu0 %v6145_v16 }
 0x2e3   : > { %v3088_v40 = vadd.f32 %v5419_v49, %v1988_v60  ;;  %v3092_v17 = vadd.f32 %v5408_v38, %v2329_v37  ;;  %2367 = vmatmul.bf16.gmra.mxu1 %v6146_v50  ;;  %v6154_v60 = vld [vmem:[#allocation44_spill] sm:$0xff] }
 0x2e5   : > { %v3250_v58 = vpack.c.bf16 %v3088_v40, %v3087_v24  ;;  %2029 = vmatmul.bf16.gmra.mxu3 %v6146_v50  ;;  %v3253_v47 = vpack.c.bf16 %v3092_v17, %v3092_v17  ;;  %v1821_v8 = vpop.f32.mrf.mxu2 }
 0x2e7   : > { %3378 = vst [vmem:[%s5421_s7 + $0x15c] sm:$0xff] %v3250_v58  ;;  %v2161_v15 = vpop.f32.mrf.mxu0  ;;  %v6155_v58 = vld [vmem:[#allocation45_spill] sm:$0xff] }
 0x2e8   : > { %v1990_v42 = vpop.f32.mrf.mxu3  ;;  %3381 = vst [vmem:[%s5421_s7 + $0x170] sm:$0xf] %v3253_v47  ;;  %v2330_v3 = vpop.f32.mrf.mxu1  ;;  %v3102_v17 = vadd.f32 %v5417_v48, %v6155_v58 }
 0x2e9   : > { %v1991_v34 = vadd.f32 %v1990_v42, %v1821_v8  ;;  %v2331_v57 = vadd.f32 %v2330_v3, %v2161_v15 }
 0x2eb   : > { %v3091_v55 = vadd.f32 %v5419_v49, %v1991_v34  ;;  %v3095_v5 = vadd.f32 %v5408_v38, %v2331_v57  ;;  %v6156_v57 = vld [vmem:[#allocation47_spill] sm:$0xff] }
 0x2ed   : > { %v3252_v35 = vpack.c.bf16 %v3091_v55, %v3090_v2  ;;  %v3255_v54 = vpack.c.bf16 %v3095_v5, %v3095_v5  ;;  %v1823_v45 = vpop.f32.mrf.mxu2 }
 0x2ef   : > { %3380 = vst [vmem:[%s5421_s7 + $0x168] sm:$0xff] %v3252_v35  ;;  %v2164_v43 = vpop.f32.mrf.mxu0  ;;  %v3105_v35 = vadd.f32 %v5417_v48, %v6156_v57 }
 0x2f0   : > { %v1992_v63 = vpop.f32.mrf.mxu3  ;;  %3383 = vst [vmem:[%s5421_s7 + $0x17c] sm:$0xf] %v3255_v54  ;;  %v2333_v0 = vpop.f32.mrf.mxu1 }
 0x2f1   : > { %v1993_v4 = vadd.f32 %v1992_v63, %v1823_v45  ;;  %v2334_v11 = vadd.f32 %v2333_v0, %v2164_v43  ;;  %v6157_v45 = vld [vmem:[#allocation46_spill] sm:$0xff]  ;;  %v6158_v43 = vld [vmem:[#allocation48_spill] sm:$0xff] }
 0x2f2   : > { %1865 = vmatmul.bf16.gmra.mxu2 %v6149_v39  ;;  %2203 = vmatmul.bf16.gmra.mxu0 %v6149_v39 }
 0x2f3   : > { %v3094_v33 = vadd.f32 %v5419_v49, %v1993_v4  ;;  %v3098_v44 = vadd.f32 %v5408_v38, %v2334_v11  ;;  %2372 = vmatmul.bf16.gmra.mxu1 %v6150_v46 }
 0x2f5   : > { %v3254_v19 = vpack.c.bf16 %v3094_v33, %v3093_v12  ;;  %2034 = vmatmul.bf16.gmra.mxu3 %v6150_v46  ;;  %v3257_v59 = vpack.c.bf16 %v3098_v44, %v3098_v44  ;;  %v1826_v21 = vpop.f32.mrf.mxu2 }
 0x2f7   : > { %3382 = vst [vmem:[%s5421_s7 + $0x174] sm:$0xff] %v3254_v19  ;;  %v2166_v23 = vpop.f32.mrf.mxu0  ;;  %v6159_v19 = vld [vmem:[#allocation49_spill] sm:$0xff] }
 0x2f8   : > { %v1995_v62 = vpop.f32.mrf.mxu3  ;;  %3385 = vst [vmem:[%s5421_s7 + $0x188] sm:$0xf] %v3257_v59  ;;  %v2335_v28 = vpop.f32.mrf.mxu1  ;;  %v3108_v44 = vadd.f32 %v5417_v48, %v6159_v19 }
 0x2f9   : > { %v1996_v1 = vadd.f32 %v1995_v62, %v1826_v21  ;;  %v2336_v20 = vadd.f32 %v2335_v28, %v2166_v23 }
 0x2fb   : > { %v3097_v52 = vadd.f32 %v5419_v49, %v1996_v1  ;;  %v3101_v31 = vadd.f32 %v5408_v38, %v2336_v20  ;;  %v6160_v20 = vld [vmem:[#allocation51_spill] sm:$0xff] }
 0x2fd   : > { %v3256_v13 = vpack.c.bf16 %v3097_v52, %v3096_v9  ;;  %v3259_v18 = vpack.c.bf16 %v3101_v31, %v3101_v31  ;;  %v1828_v30 = vpop.f32.mrf.mxu2 }
 0x2ff   : > { %3384 = vst [vmem:[%s5421_s7 + $0x180] sm:$0xff] %v3256_v13  ;;  %v2169_v41 = vpop.f32.mrf.mxu0  ;;  %v3111_v13 = vadd.f32 %v5417_v48, %v6160_v20 }
 0x300   : > { %v1997_v6 = vpop.f32.mrf.mxu3  ;;  %3387 = vst [vmem:[%s5421_s7 + $0x194] sm:$0xf] %v3259_v18  ;;  %v2338_v36 = vpop.f32.mrf.mxu1 }
 0x301   : > { %v1998_v7 = vadd.f32 %v1997_v6, %v1828_v30  ;;  %v2339_v22 = vadd.f32 %v2338_v36, %v2169_v41  ;;  %v6161_v30 = vld [vmem:[#allocation50_spill] sm:$0xff]  ;;  %v6162_v41 = vld [vmem:[#allocation52_spill] sm:$0xff] }
 0x302   : > { %1870 = vmatmul.bf16.gmra.mxu2 %v6153_v14  ;;  %2208 = vmatmul.bf16.gmra.mxu0 %v6153_v14 }
 0x303   : > { %v3100_v56 = vadd.f32 %v5419_v49, %v1998_v7  ;;  %v3104_v51 = vadd.f32 %v5408_v38, %v2339_v22  ;;  %2377 = vmatmul.bf16.gmra.mxu1 %v6154_v60 }
 0x305   : > { %v3258_v32 = vpack.c.bf16 %v3100_v56, %v3099_v10  ;;  %2039 = vmatmul.bf16.gmra.mxu3 %v6154_v60  ;;  %v3261_v61 = vpack.c.bf16 %v3104_v51, %v3104_v51  ;;  %v1831_v29 = vpop.f32.mrf.mxu2 }
 0x307   : > { %3386 = vst [vmem:[%s5421_s7 + $0x18c] sm:$0xff] %v3258_v32  ;;  %v2171_v37 = vpop.f32.mrf.mxu0  ;;  %v6163_v32 = vld [vmem:[#allocation53_spill] sm:$0xff] }
 0x308   : > { %v2000_v24 = vpop.f32.mrf.mxu3  ;;  %3389 = vst [vmem:[%s5421_s7 + $0x1a0] sm:$0xf] %v3261_v61  ;;  %v2340_v16 = vpop.f32.mrf.mxu1  ;;  %v3114_v51 = vadd.f32 %v5417_v48, %v6163_v32 }
 0x309   : > { %v2001_v40 = vadd.f32 %v2000_v24, %v1831_v29  ;;  %v2341_v47 = vadd.f32 %v2340_v16, %v2171_v37 }
 0x30b   : > { %v3103_v50 = vadd.f32 %v5419_v49, %v2001_v40  ;;  %v3107_v42 = vadd.f32 %v5408_v38, %v2341_v47  ;;  %v6164_v47 = vld [vmem:[#allocation55_spill] sm:$0xff] }
 0x30d   : > { %v3260_v8 = vpack.c.bf16 %v3103_v50, %v3102_v17  ;;  %v3263_v34 = vpack.c.bf16 %v3107_v42, %v3107_v42  ;;  %v1833_v15 = vpop.f32.mrf.mxu2 }
 0x30f   : > { %3388 = vst [vmem:[%s5421_s7 + $0x198] sm:$0xff] %v3260_v8  ;;  %v2174_v2 = vpop.f32.mrf.mxu0  ;;  %v3117_v8 = vadd.f32 %v5417_v48, %v6164_v47 }
 0x310   : > { %v2002_v3 = vpop.f32.mrf.mxu3  ;;  %3391 = vst [vmem:[%s5421_s7 + $0x1ac] sm:$0xf] %v3263_v34  ;;  %v2343_v55 = vpop.f32.mrf.mxu1 }
 0x311   : > { %v2003_v26 = vadd.f32 %v2002_v3, %v1833_v15  ;;  %v2344_v54 = vadd.f32 %v2343_v55, %v2174_v2  ;;  %v6165_v15 = vld [vmem:[#allocation54_spill] sm:$0xff]  ;;  %v6166_v2 = vld [vmem:[#allocation56_spill] sm:$0xff] }
 0x312   : > { %1875 = vmatmul.bf16.gmra.mxu2 %v6157_v45  ;;  %2213 = vmatmul.bf16.gmra.mxu0 %v6157_v45 }
 0x313   : > { %v3106_v5 = vadd.f32 %v5419_v49, %v2003_v26  ;;  %v3110_v4 = vadd.f32 %v5408_v38, %v2344_v54  ;;  %2382 = vmatmul.bf16.gmra.mxu1 %v6158_v43 }
 0x315   : > { %v3262_v63 = vpack.c.bf16 %v3106_v5, %v3105_v35  ;;  %2044 = vmatmul.bf16.gmra.mxu3 %v6158_v43  ;;  %v3265_v0 = vpack.c.bf16 %v3110_v4, %v3110_v4  ;;  %v1836_v25 = vpop.f32.mrf.mxu2 }
 0x317   : > { %3390 = vst [vmem:[%s5421_s7 + $0x1a4] sm:$0xff] %v3262_v63  ;;  %v2176_v11 = vpop.f32.mrf.mxu0  ;;  %v6167_v63 = vld [vmem:[#allocation57_spill] sm:$0xff] }
 0x318   : > { %v2005_v12 = vpop.f32.mrf.mxu3  ;;  %3393 = vst [vmem:[%s5421_s7 + $0x1b8] sm:$0xf] %v3265_v0  ;;  %v2345_v39 = vpop.f32.mrf.mxu1  ;;  %v3120_v4 = vadd.f32 %v5417_v48, %v6167_v63 }
 0x319   : > { %v2006_v33 = vadd.f32 %v2005_v12, %v1836_v25  ;;  %v2346_v59 = vadd.f32 %v2345_v39, %v2176_v11 }
 0x31b   : > { %v3109_v46 = vadd.f32 %v5419_v49, %v2006_v33  ;;  %v3113_v62 = vadd.f32 %v5408_v38, %v2346_v59  ;;  %v6168_v59 = vld [vmem:[#allocation59_spill] sm:$0xff] }
 0x31d   : > { %v3264_v21 = vpack.c.bf16 %v3109_v46, %v3108_v44  ;;  %v3267_v1 = vpack.c.bf16 %v3113_v62, %v3113_v62  ;;  %v1838_v23 = vpop.f32.mrf.mxu2 }
 0x31f   : > { %3392 = vst [vmem:[%s5421_s7 + $0x1b0] sm:$0xff] %v3264_v21  ;;  %v2179_v9 = vpop.f32.mrf.mxu0  ;;  %v3123_v21 = vadd.f32 %v5417_v48, %v6168_v59 }
 0x320   : > { %v2007_v28 = vpop.f32.mrf.mxu3  ;;  %3395 = vst [vmem:[%s5421_s7 + $0x1c4] sm:$0xf] %v3267_v1  ;;  %v2348_v52 = vpop.f32.mrf.mxu1 }
 0x321   : > { %v2008_v27 = vadd.f32 %v2007_v28, %v1838_v23  ;;  %v2349_v18 = vadd.f32 %v2348_v52, %v2179_v9  ;;  %v6169_v23 = vld [vmem:[#allocation58_spill] sm:$0xff]  ;;  %v6170_v9 = vld [vmem:[#allocation60_spill] sm:$0xff] }
 0x322   : > { %1880 = vmatmul.bf16.gmra.mxu2 %v6161_v30  ;;  %2218 = vmatmul.bf16.gmra.mxu0 %v6161_v30 }
 0x323   : > { %v3112_v31 = vadd.f32 %v5419_v49, %v2008_v27  ;;  %v3116_v7 = vadd.f32 %v5408_v38, %v2349_v18  ;;  %2387 = vmatmul.bf16.gmra.mxu1 %v6162_v41 }
 0x325   : > { %v3266_v6 = vpack.c.bf16 %v3112_v31, %v3111_v13  ;;  %2049 = vmatmul.bf16.gmra.mxu3 %v6162_v41  ;;  %v3269_v36 = vpack.c.bf16 %v3116_v7, %v3116_v7  ;;  %v1841_v53 = vpop.f32.mrf.mxu2 }
 0x327   : > { %3394 = vst [vmem:[%s5421_s7 + $0x1bc] sm:$0xff] %v3266_v6  ;;  %v2181_v22 = vpop.f32.mrf.mxu0  ;;  %v6171_v6 = vld [vmem:[#allocation61_spill] sm:$0xff] }
 0x328   : > { %v2010_v10 = vpop.f32.mrf.mxu3  ;;  %3397 = vst [vmem:[%s5421_s7 + $0x1d0] sm:$0xf] %v3269_v36  ;;  %v2350_v14 = vpop.f32.mrf.mxu1  ;;  %v3126_v7 = vadd.f32 %v5417_v48, %v6171_v6 }
 0x329   : > { %v2011_v56 = vadd.f32 %v2010_v10, %v1841_v53  ;;  %v2351_v61 = vadd.f32 %v2350_v14, %v2181_v22 }
 0x32b   : > { %v3115_v60 = vadd.f32 %v5419_v49, %v2011_v56  ;;  %v3119_v24 = vadd.f32 %v5408_v38, %v2351_v61  ;;  %v6172_v61 = vld [vmem:[#allocation63_spill] sm:$0xff] }
 0x32d   : > { %v3268_v29 = vpack.c.bf16 %v3115_v60, %v3114_v51  ;;  %v3271_v40 = vpack.c.bf16 %v3119_v24, %v3119_v24  ;;  %v1843_v37 = vpop.f32.mrf.mxu2 }
 0x32f   : > { %3396 = vst [vmem:[%s5421_s7 + $0x1c8] sm:$0xff] %v3268_v29  ;;  %v2184_v17 = vpop.f32.mrf.mxu0  ;;  %v3129_v29 = vadd.f32 %v5417_v48, %v6172_v61 }
 0x330   : > { %v2012_v16 = vpop.f32.mrf.mxu3  ;;  %3399 = vst [vmem:[%s5421_s7 + $0x1dc] sm:$0xf] %v3271_v40  ;;  %v2353_v50 = vpop.f32.mrf.mxu1 }
 0x331   : > { %v2013_v58 = vadd.f32 %v2012_v16, %v1843_v37  ;;  %v2354_v34 = vadd.f32 %v2353_v50, %v2184_v17  ;;  %v6173_v37 = vld [vmem:[#allocation62_spill] sm:$0xff]  ;;  %v6174_v17 = vld [vmem:[#allocation64_spill] sm:$0xff] }
 0x332   : > { %1885 = vmatmul.bf16.gmra.mxu2 %v6165_v15  ;;  %2223 = vmatmul.bf16.gmra.mxu0 %v6165_v15 }
 0x333   : > { %v3118_v42 = vadd.f32 %v5419_v49, %v2013_v58  ;;  %v3122_v26 = vadd.f32 %v5408_v38, %v2354_v34  ;;  %2392 = vmatmul.bf16.gmra.mxu1 %v6166_v2 }
 0x335   : > { %v3270_v3 = vpack.c.bf16 %v3118_v42, %v3117_v8  ;;  %2054 = vmatmul.bf16.gmra.mxu3 %v6166_v2  ;;  %v3273_v55 = vpack.c.bf16 %v3122_v26, %v3122_v26  ;;  %v1846_v57 = vpop.f32.mrf.mxu2 }
 0x337   : > { %3398 = vst [vmem:[%s5421_s7 + $0x1d4] sm:$0xff] %v3270_v3  ;;  %v2186_v54 = vpop.f32.mrf.mxu0  ;;  %v6175_v3 = vld [vmem:[#allocation65_spill] sm:$0xff] }
 0x338   : > { %v2015_v35 = vpop.f32.mrf.mxu3  ;;  %3401 = vst [vmem:[%s5421_s7 + $0x1e8] sm:$0xf] %v3273_v55  ;;  %v2355_v45 = vpop.f32.mrf.mxu1  ;;  %v3132_v26 = vadd.f32 %v5417_v48, %v6175_v3 }
 0x339   : > { %v2016_v5 = vadd.f32 %v2015_v35, %v1846_v57  ;;  %v2356_v0 = vadd.f32 %v2355_v45, %v2186_v54 }
 0x33b   : > { %v3121_v43 = vadd.f32 %v5419_v49, %v2016_v5  ;;  %v3125_v12 = vadd.f32 %v5408_v38, %v2356_v0  ;;  %v6176_v0 = vld [vmem:[#allocation67_spill] sm:$0xff] }
 0x33d   : > { %v3272_v25 = vpack.c.bf16 %v3121_v43, %v3120_v4  ;;  %v3275_v33 = vpack.c.bf16 %v3125_v12, %v3125_v12  ;;  %v1848_v11 = vpop.f32.mrf.mxu2 }
 0x33f   : > { %3400 = vst [vmem:[%s5421_s7 + $0x1e0] sm:$0xff] %v3272_v25  ;;  %v2189_v44 = vpop.f32.mrf.mxu0  ;;  %v3135_v25 = vadd.f32 %v5417_v48, %v6176_v0 }
 0x340   : > { %v2017_v39 = vpop.f32.mrf.mxu3  ;;  %3403 = vst [vmem:[%s5421_s7 + $0x1f4] sm:$0xf] %v3275_v33  ;;  %v2358_v46 = vpop.f32.mrf.mxu1 }
 0x341   : > { %v2018_v19 = vadd.f32 %v2017_v39, %v1848_v11  ;;  %v2359_v1 = vadd.f32 %v2358_v46, %v2189_v44  ;;  %v6177_v11 = vld [vmem:[#allocation66_spill] sm:$0xff]  ;;  %v6178_v44 = vld [vmem:[#allocation68_spill] sm:$0xff] }
 0x342   : > { %1890 = vmatmul.bf16.gmra.mxu2 %v6169_v23  ;;  %2228 = vmatmul.bf16.gmra.mxu0 %v6169_v23 }
 0x343   : > { %v3124_v62 = vadd.f32 %v5419_v49, %v2018_v19  ;;  %v3128_v27 = vadd.f32 %v5408_v38, %v2359_v1  ;;  %2397 = vmatmul.bf16.gmra.mxu1 %v6170_v9 }
 0x345   : > { %v3274_v28 = vpack.c.bf16 %v3124_v62, %v3123_v21  ;;  %2059 = vmatmul.bf16.gmra.mxu3 %v6170_v9  ;;  %v3277_v52 = vpack.c.bf16 %v3128_v27, %v3128_v27  ;;  %v1851_v20 = vpop.f32.mrf.mxu2 }
 0x347   : > { %3402 = vst [vmem:[%s5421_s7 + $0x1ec] sm:$0xff] %v3274_v28  ;;  %v2191_v18 = vpop.f32.mrf.mxu0  ;;  %v6179_v28 = vld [vmem:[#allocation69_spill] sm:$0xff] }
 0x348   : > { %v2020_v13 = vpop.f32.mrf.mxu3  ;;  %3405 = vst [vmem:[%s5421_s7 + $0x200] sm:$0xf] %v3277_v52  ;;  %v2360_v30 = vpop.f32.mrf.mxu1  ;;  %v3138_v27 = vadd.f32 %v5417_v48, %v6179_v28 }
 0x349   : > { %v2021_v31 = vadd.f32 %v2020_v13, %v1851_v20  ;;  %v2361_v36 = vadd.f32 %v2360_v30, %v2191_v18 }
 0x34b   : > { %v3127_v41 = vadd.f32 %v5419_v49, %v2021_v31  ;;  %v3131_v10 = vadd.f32 %v5408_v38, %v2361_v36  ;;  %v6180_v36 = vld [vmem:[#allocation70_spill] sm:$0xff] }
 0x34d   : > { %v3276_v53 = vpack.c.bf16 %v3127_v41, %v3126_v7  ;;  %v3279_v56 = vpack.c.bf16 %v3131_v10, %v3131_v10  ;;  %v1853_v22 = vpop.f32.mrf.mxu2 }
 0x34f   : > { %3404 = vst [vmem:[%s5421_s7 + $0x1f8] sm:$0xff] %v3276_v53  ;;  %v2194_v51 = vpop.f32.mrf.mxu0  ;;  %v3141_v53 = vadd.f32 %v5417_v48, %v6180_v36 }
 0x350   : > { %v2022_v14 = vpop.f32.mrf.mxu3  ;;  %3407 = vst [vmem:[%s5421_s7 + $0x20c] sm:$0xf] %v3279_v56  ;;  %v2363_v60 = vpop.f32.mrf.mxu1 }
 0x351   : > { %v2023_v32 = vadd.f32 %v2022_v14, %v1853_v22  ;;  %v2364_v40 = vadd.f32 %v2363_v60, %v2194_v51 }
 0x352   : > { %1895 = vmatmul.bf16.gmra.mxu2 %v6173_v37  ;;  %2233 = vmatmul.bf16.gmra.mxu0 %v6173_v37 }
 0x353   : > { %v3130_v24 = vadd.f32 %v5419_v49, %v2023_v32  ;;  %v3134_v58 = vadd.f32 %v5408_v38, %v2364_v40  ;;  %2402 = vmatmul.bf16.gmra.mxu1 %v6174_v17  ;;  %v6181_v40 = vld [vmem:[#allocation71_spill] sm:$0xff] }
 0x354   : > { %v3144_v37 = vadd.f32 %v5417_v48, %v6181_v40 }
 0x355   : > { %v3278_v16 = vpack.c.bf16 %v3130_v24, %v3129_v29  ;;  %2064 = vmatmul.bf16.gmra.mxu3 %v6174_v17  ;;  %v3281_v50 = vpack.c.bf16 %v3134_v58, %v3134_v58  ;;  %v1856_v47 = vpop.f32.mrf.mxu2 }
 0x357   : > { %3406 = vst [vmem:[%s5421_s7 + $0x204] sm:$0xff] %v3278_v16  ;;  %v2196_v34 = vpop.f32.mrf.mxu0 }
 0x358   : > { %v2025_v8 = vpop.f32.mrf.mxu3  ;;  %3409 = vst [vmem:[%s5421_s7 + $0x218] sm:$0xf] %v3281_v50  ;;  %v2365_v15 = vpop.f32.mrf.mxu1 }
 0x359   : > { %v2026_v42 = vadd.f32 %v2025_v8, %v1856_v47  ;;  %v2366_v55 = vadd.f32 %v2365_v15, %v2196_v34 }
 0x35b   : > { %v3133_v2 = vadd.f32 %v5419_v49, %v2026_v42  ;;  %v3137_v35 = vadd.f32 %v5408_v38, %v2366_v55 }
 0x35d   : > { %v3280_v57 = vpack.c.bf16 %v3133_v2, %v3132_v26  ;;  %v3283_v5 = vpack.c.bf16 %v3137_v35, %v3137_v35  ;;  %v1858_v54 = vpop.f32.mrf.mxu2  ;;  %v6182_v26 = vld [vmem:[#allocation72_spill] sm:$0xff] }
 0x35e   : > { %v3147_v2 = vadd.f32 %v5417_v48, %v6182_v26 }
 0x35f   : > { %3408 = vst [vmem:[%s5421_s7 + $0x210] sm:$0xff] %v3280_v57  ;;  %v2199_v4 = vpop.f32.mrf.mxu0 }
 0x360   : > { %v2027_v45 = vpop.f32.mrf.mxu3  ;;  %3411 = vst [vmem:[%s5421_s7 + $0x224] sm:$0xf] %v3283_v5  ;;  %v2368_v43 = vpop.f32.mrf.mxu1 }
 0x361   : > { %v2028_v63 = vadd.f32 %v2027_v45, %v1858_v54  ;;  %v2369_v33 = vadd.f32 %v2368_v43, %v2199_v4 }
 0x362   : > { %1900 = vmatmul.bf16.gmra.mxu2 %v6177_v11  ;;  %2238 = vmatmul.bf16.gmra.mxu0 %v6177_v11 }
 0x363   : > { %v3136_v12 = vadd.f32 %v5419_v49, %v2028_v63  ;;  %v3140_v19 = vadd.f32 %v5408_v38, %v2369_v33  ;;  %2407 = vmatmul.bf16.gmra.mxu1 %v6178_v44 }
 0x365   : > { %v3282_v39 = vpack.c.bf16 %v3136_v12, %v3135_v25  ;;  %2069 = vmatmul.bf16.gmra.mxu3 %v6178_v44  ;;  %v3285_v46 = vpack.c.bf16 %v3140_v19, %v3140_v19  ;;  %v1861_v59 = vpop.f32.mrf.mxu2  ;;  %v6183_v25 = vld [vmem:[#allocation73_spill] sm:$0xff] }
 0x366   : > { %v3150_v12 = vadd.f32 %v5417_v48, %v6183_v25 }
 0x367   : > { %3410 = vst [vmem:[%s5421_s7 + $0x21c] sm:$0xff] %v3282_v39  ;;  %v2201_v1 = vpop.f32.mrf.mxu0 }
 0x368   : > { %v2030_v21 = vpop.f32.mrf.mxu3  ;;  %3413 = vst [vmem:[%s5421_s7 + $0x230] sm:$0xf] %v3285_v46  ;;  %v2370_v23 = vpop.f32.mrf.mxu1 }
 0x369   : > { %v2031_v62 = vadd.f32 %v2030_v21, %v1861_v59  ;;  %v2371_v52 = vadd.f32 %v2370_v23, %v2201_v1  ;;  %v6184_v23 = vld [vmem:[#allocation74_spill] sm:$0xff] }
 0x36a   : > { %v3153_v28 = vadd.f32 %v5417_v48, %v6184_v23 }
 0x36b   : > { %v3139_v9 = vadd.f32 %v5419_v49, %v2031_v62  ;;  %v3143_v13 = vadd.f32 %v5408_v38, %v2371_v52 }
 0x36d   : > { %v3284_v20 = vpack.c.bf16 %v3139_v9, %v3138_v27  ;;  %v3287_v31 = vpack.c.bf16 %v3143_v13, %v3143_v13  ;;  %v1863_v18 = vpop.f32.mrf.mxu2 }
 0x36f   : > { %3412 = vst [vmem:[%s5421_s7 + $0x228] sm:$0xff] %v3284_v20  ;;  %v2204_v7 = vpop.f32.mrf.mxu0 }
 0x370   : > { %v2032_v30 = vpop.f32.mrf.mxu3  ;;  %3415 = vst [vmem:[%s5421_s7 + $0x23c] sm:$0xf] %v3287_v31  ;;  %v2373_v41 = vpop.f32.mrf.mxu1 }
 0x371   : > { %v2033_v6 = vadd.f32 %v2032_v30, %v1863_v18  ;;  %v2374_v56 = vadd.f32 %v2373_v41, %v2204_v7  ;;  %v6185_v41 = vld [vmem:[#allocation75_spill] sm:$0xff] }
 0x372   : > { %v3156_v36 = vadd.f32 %v5417_v48, %v6185_v41 }
 0x373   : > { %v3142_v10 = vadd.f32 %v5419_v49, %v2033_v6  ;;  %v3146_v14 = vadd.f32 %v5408_v38, %v2374_v56 }
 0x375   : > { %v3286_v22 = vpack.c.bf16 %v3142_v10, %v3141_v53  ;;  %v3289_v32 = vpack.c.bf16 %v3146_v14, %v3146_v14  ;;  %v1866_v51 = vpop.f32.mrf.mxu2 }
 0x377   : > { %3414 = vst [vmem:[%s5421_s7 + $0x234] sm:$0xff] %v3286_v22  ;;  %v2206_v29 = vpop.f32.mrf.mxu0 }
 0x378   : > { %v2035_v60 = vpop.f32.mrf.mxu3  ;;  %3417 = vst [vmem:[%s5421_s7 + $0x248] sm:$0xf] %v3289_v32  ;;  %v2375_v24 = vpop.f32.mrf.mxu1 }
 0x379   : > { %v2036_v61 = vadd.f32 %v2035_v60, %v1866_v51  ;;  %v2376_v58 = vadd.f32 %v2375_v24, %v2206_v29  ;;  %v6186_v24 = vld [vmem:[#allocation76_spill] sm:$0xff] }
 0x37a   : > { %v3159_v40 = vadd.f32 %v5417_v48, %v6186_v24 }
 0x37b   : > { %v3145_v16 = vadd.f32 %v5419_v49, %v2036_v61  ;;  %v3149_v50 = vadd.f32 %v5408_v38, %v2376_v58 }
 0x37d   : > { %v3288_v17 = vpack.c.bf16 %v3145_v16, %v3144_v37  ;;  %v3291_v47 = vpack.c.bf16 %v3149_v50, %v3149_v50  ;;  %v1868_v8 = vpop.f32.mrf.mxu2 }
 0x37f   : > { %3416 = vst [vmem:[%s5421_s7 + $0x240] sm:$0xff] %v3288_v17  ;;  %v2209_v15 = vpop.f32.mrf.mxu0 }
 0x380   : > { %v2037_v42 = vpop.f32.mrf.mxu3  ;;  %3419 = vst [vmem:[%s5421_s7 + $0x254] sm:$0xf] %v3291_v47  ;;  %v2378_v3 = vpop.f32.mrf.mxu1 }
 0x381   : > { %v2038_v34 = vadd.f32 %v2037_v42, %v1868_v8  ;;  %v2379_v57 = vadd.f32 %v2378_v3, %v2209_v15  ;;  %v6187_v3 = vld [vmem:[#allocation77_spill] sm:$0xff] }
 0x382   : > { %v3162_v26 = vadd.f32 %v5417_v48, %v6187_v3 }
 0x383   : > { %v3148_v55 = vadd.f32 %v5419_v49, %v2038_v34  ;;  %v3152_v5 = vadd.f32 %v5408_v38, %v2379_v57 }
 0x385   : > { %v3290_v35 = vpack.c.bf16 %v3148_v55, %v3147_v2  ;;  %v3293_v54 = vpack.c.bf16 %v3152_v5, %v3152_v5  ;;  %v1871_v45 = vpop.f32.mrf.mxu2 }
 0x387   : > { %3418 = vst [vmem:[%s5421_s7 + $0x24c] sm:$0xff] %v3290_v35  ;;  %v2211_v43 = vpop.f32.mrf.mxu0 }
 0x388   : > { %v2040_v63 = vpop.f32.mrf.mxu3  ;;  %3421 = vst [vmem:[%s5421_s7 + $0x260] sm:$0xf] %v3293_v54  ;;  %v2380_v0 = vpop.f32.mrf.mxu1 }
 0x389   : > { %v2041_v4 = vadd.f32 %v2040_v63, %v1871_v45  ;;  %v2381_v11 = vadd.f32 %v2380_v0, %v2211_v43  ;;  %v6188_v0 = vld [vmem:[#allocation78_spill] sm:$0xff] }
 0x38a   : > { %v3165_v25 = vadd.f32 %v5417_v48, %v6188_v0 }
 0x38b   : > { %v3151_v33 = vadd.f32 %v5419_v49, %v2041_v4  ;;  %v3155_v19 = vadd.f32 %v5408_v38, %v2381_v11 }
 0x38d   : > { %v3292_v39 = vpack.c.bf16 %v3151_v33, %v3150_v12  ;;  %v3295_v44 = vpack.c.bf16 %v3155_v19, %v3155_v19  ;;  %v1873_v46 = vpop.f32.mrf.mxu2 }
 0x38f   : > { %3420 = vst [vmem:[%s5421_s7 + $0x258] sm:$0xff] %v3292_v39  ;;  %v2214_v62 = vpop.f32.mrf.mxu0 }
 0x390   : > { %v2042_v59 = vpop.f32.mrf.mxu3  ;;  %3423 = vst [vmem:[%s5421_s7 + $0x26c] sm:$0xf] %v3295_v44  ;;  %v2383_v1 = vpop.f32.mrf.mxu1 }
 0x391   : > { %v2043_v21 = vadd.f32 %v2042_v59, %v1873_v46  ;;  %v2384_v9 = vadd.f32 %v2383_v1, %v2214_v62  ;;  %v6189_v1 = vld [vmem:[#allocation79_spill] sm:$0xff] }
 0x392   : > { %v3168_v23 = vadd.f32 %v5417_v48, %v6189_v1 }
 0x393   : > { %v3154_v27 = vadd.f32 %v5419_v49, %v2043_v21  ;;  %v3158_v20 = vadd.f32 %v5408_v38, %v2384_v9 }
 0x395   : > { %v3294_v52 = vpack.c.bf16 %v3154_v27, %v3153_v28  ;;  %v3297_v13 = vpack.c.bf16 %v3158_v20, %v3158_v20  ;;  %v1876_v31 = vpop.f32.mrf.mxu2 }
 0x397   : > { %3422 = vst [vmem:[%s5421_s7 + $0x264] sm:$0xff] %v3294_v52  ;;  %v2216_v6 = vpop.f32.mrf.mxu0 }
 0x398   : > { %v2045_v18 = vpop.f32.mrf.mxu3  ;;  %3425 = vst [vmem:[%s5421_s7 + $0x278] sm:$0xf] %v3297_v13  ;;  %v2385_v7 = vpop.f32.mrf.mxu1 }
 0x399   : > { %v2046_v30 = vadd.f32 %v2045_v18, %v1876_v31  ;;  %v2386_v10 = vadd.f32 %v2385_v7, %v2216_v6  ;;  %v6190_v7 = vld [vmem:[#allocation80_spill] sm:$0xff] }
 0x39a   : > { %v3171_v41 = vadd.f32 %v5417_v48, %v6190_v7 }
 0x39b   : > { %v3157_v53 = vadd.f32 %v5419_v49, %v2046_v30  ;;  %v3161_v22 = vadd.f32 %v5408_v38, %v2386_v10 }
 0x39d   : > { %v3296_v56 = vpack.c.bf16 %v3157_v53, %v3156_v36  ;;  %v3299_v14 = vpack.c.bf16 %v3161_v22, %v3161_v22  ;;  %v1878_v32 = vpop.f32.mrf.mxu2 }
 0x39f   : > { %3424 = vst [vmem:[%s5421_s7 + $0x270] sm:$0xff] %v3296_v56  ;;  %v2219_v61 = vpop.f32.mrf.mxu0 }
 0x3a0   : > { %v2047_v51 = vpop.f32.mrf.mxu3  ;;  %3427 = vst [vmem:[%s5421_s7 + $0x284] sm:$0xf] %v3299_v14  ;;  %v2388_v29 = vpop.f32.mrf.mxu1 }
 0x3a1   : > { %v2048_v60 = vadd.f32 %v2047_v51, %v1878_v32  ;;  %v2389_v16 = vadd.f32 %v2388_v29, %v2219_v61  ;;  %v6191_v29 = vld [vmem:[#allocation81_spill] sm:$0xff] }
 0x3a2   : > { %v3174_v24 = vadd.f32 %v5417_v48, %v6191_v29 }
 0x3a3   : > { %v3160_v37 = vadd.f32 %v5419_v49, %v2048_v60  ;;  %v3164_v17 = vadd.f32 %v5408_v38, %v2389_v16 }
 0x3a5   : > { %v3298_v58 = vpack.c.bf16 %v3160_v37, %v3159_v40  ;;  %v3301_v50 = vpack.c.bf16 %v3164_v17, %v3164_v17  ;;  %v1881_v47 = vpop.f32.mrf.mxu2 }
 0x3a7   : > { %3426 = vst [vmem:[%s5421_s7 + $0x27c] sm:$0xff] %v3298_v58  ;;  %v2221_v34 = vpop.f32.mrf.mxu0 }
 0x3a8   : > { %v2050_v8 = vpop.f32.mrf.mxu3  ;;  %3429 = vst [vmem:[%s5421_s7 + $0x290] sm:$0xf] %v3301_v50  ;;  %v2390_v15 = vpop.f32.mrf.mxu1 }
 0x3a9   : > { %v2051_v42 = vadd.f32 %v2050_v8, %v1881_v47  ;;  %v2391_v55 = vadd.f32 %v2390_v15, %v2221_v34  ;;  %v6192_v15 = vld [vmem:[#allocation82_spill] sm:$0xff] }
 0x3aa   : > { %v3177_v3 = vadd.f32 %v5417_v48, %v6192_v15 }
 0x3ab   : > { %v3163_v2 = vadd.f32 %v5419_v49, %v2051_v42  ;;  %v3167_v35 = vadd.f32 %v5408_v38, %v2391_v55 }
 0x3ad   : > { %v3300_v57 = vpack.c.bf16 %v3163_v2, %v3162_v26  ;;  %v3303_v5 = vpack.c.bf16 %v3167_v35, %v3167_v35  ;;  %v1883_v54 = vpop.f32.mrf.mxu2 }
 0x3af   : > { %3428 = vst [vmem:[%s5421_s7 + $0x288] sm:$0xff] %v3300_v57  ;;  %v2224_v4 = vpop.f32.mrf.mxu0 }
 0x3b0   : > { %v2052_v45 = vpop.f32.mrf.mxu3  ;;  %3431 = vst [vmem:[%s5421_s7 + $0x29c] sm:$0xf] %v3303_v5  ;;  %v2393_v43 = vpop.f32.mrf.mxu1 }
 0x3b1   : > { %v2053_v63 = vadd.f32 %v2052_v45, %v1883_v54  ;;  %v2394_v33 = vadd.f32 %v2393_v43, %v2224_v4  ;;  %v6193_v43 = vld [vmem:[#allocation83_spill] sm:$0xff] }
 0x3b2   : > { %v3180_v0 = vadd.f32 %v5417_v48, %v6193_v43 }
 0x3b3   : > { %v3166_v12 = vadd.f32 %v5419_v49, %v2053_v63  ;;  %v3170_v39 = vadd.f32 %v5408_v38, %v2394_v33 }
 0x3b5   : > { %v3302_v11 = vpack.c.bf16 %v3166_v12, %v3165_v25  ;;  %v3305_v19 = vpack.c.bf16 %v3170_v39, %v3170_v39  ;;  %v1886_v44 = vpop.f32.mrf.mxu2 }
 0x3b7   : > { %3430 = vst [vmem:[%s5421_s7 + $0x294] sm:$0xff] %v3302_v11  ;;  %v2226_v21 = vpop.f32.mrf.mxu0 }
 0x3b8   : > { %v2055_v46 = vpop.f32.mrf.mxu3  ;;  %3433 = vst [vmem:[%s5421_s7 + $0x2a8] sm:$0xf] %v3305_v19  ;;  %v2395_v62 = vpop.f32.mrf.mxu1 }
 0x3b9   : > { %v2056_v59 = vadd.f32 %v2055_v46, %v1886_v44  ;;  %v2396_v27 = vadd.f32 %v2395_v62, %v2226_v21  ;;  %v6195_v62 = vld [vmem:[#allocation84_spill] sm:$0xff] }
 0x3ba   : > { %v3183_v1 = vadd.f32 %v5417_v48, %v6195_v62 }
 0x3bb   : > { %v3169_v28 = vadd.f32 %v5419_v49, %v2056_v59  ;;  %v3173_v52 = vadd.f32 %v5408_v38, %v2396_v27 }
 0x3bd   : > { %v3304_v9 = vpack.c.bf16 %v3169_v28, %v3168_v23  ;;  %v3307_v20 = vpack.c.bf16 %v3173_v52, %v3173_v52  ;;  %v1888_v13 = vpop.f32.mrf.mxu2 }
 0x3bf   : > { %3432 = vst [vmem:[%s5421_s7 + $0x2a0] sm:$0xff] %v3304_v9  ;;  %v2229_v30 = vpop.f32.mrf.mxu0 }
 0x3c0   : > { %v2057_v31 = vpop.f32.mrf.mxu3  ;;  %3435 = vst [vmem:[%s5421_s7 + $0x2b4] sm:$0xf] %v3307_v20  ;;  %v2398_v6 = vpop.f32.mrf.mxu1 }
 0x3c1   : > { %v2058_v18 = vadd.f32 %v2057_v31, %v1888_v13  ;;  %v2399_v53 = vadd.f32 %v2398_v6, %v2229_v30  ;;  %v6196_v6 = vld [vmem:[#allocation86_spill] sm:$0xff] }
 0x3c2   : > { %v3186_v7 = vadd.f32 %v5417_v48, %v6196_v6 }
 0x3c3   : > { %v3172_v36 = vadd.f32 %v5419_v49, %v2058_v18  ;;  %v3176_v56 = vadd.f32 %v5408_v38, %v2399_v53 }
 0x3c5   : > { %v3306_v10 = vpack.c.bf16 %v3172_v36, %v3171_v41  ;;  %v3309_v22 = vpack.c.bf16 %v3176_v56, %v3176_v56  ;;  %v1891_v14 = vpop.f32.mrf.mxu2 }
 0x3c7   : > { %3434 = vst [vmem:[%s5421_s7 + $0x2ac] sm:$0xff] %v3306_v10  ;;  %v2231_v60 = vpop.f32.mrf.mxu0 }
 0x3c8   : > { %v2060_v32 = vpop.f32.mrf.mxu3  ;;  %3437 = vst [vmem:[%s5421_s7 + $0x2c0] sm:$0xf] %v3309_v22  ;;  %v2400_v61 = vpop.f32.mrf.mxu1 }
 0x3c9   : > { %v2061_v51 = vadd.f32 %v2060_v32, %v1891_v14  ;;  %v2401_v37 = vadd.f32 %v2400_v61, %v2231_v60 }
 0x3cb   : > { %v3175_v40 = vadd.f32 %v5419_v49, %v2061_v51  ;;  %v3179_v58 = vadd.f32 %v5408_v38, %v2401_v37  ;;  %v6199_v51 = vld [vmem:[#allocation88_spill] sm:$0xff] }
 0x3cc   : > { %v3189_v60 = vadd.f32 %v5417_v48, %v6199_v51 }
 0x3cd   : > { %v3308_v16 = vpack.c.bf16 %v3175_v40, %v3174_v24  ;;  %v3311_v17 = vpack.c.bf16 %v3179_v58, %v3179_v58  ;;  %v1893_v50 = vpop.f32.mrf.mxu2 }
 0x3cf   : > { %3436 = vst [vmem:[%s5421_s7 + $0x2b8] sm:$0xff] %v3308_v16  ;;  %v2234_v42 = vpop.f32.mrf.mxu0 }
 0x3d0   : > { %v2062_v47 = vpop.f32.mrf.mxu3  ;;  %3439 = vst [vmem:[%s5421_s7 + $0x2cc] sm:$0xf] %v3311_v17  ;;  %v2403_v34 = vpop.f32.mrf.mxu1 }
 0x3d1   : > { %v2063_v8 = vadd.f32 %v2062_v47, %v1893_v50  ;;  %v2404_v2 = vadd.f32 %v2403_v34, %v2234_v42 }
 0x3d3   : > { %v3178_v26 = vadd.f32 %v5419_v49, %v2063_v8  ;;  %v3182_v57 = vadd.f32 %v5408_v38, %v2404_v2 }
 0x3d5   : > { %v3310_v55 = vpack.c.bf16 %v3178_v26, %v3177_v3  ;;  %v3313_v35 = vpack.c.bf16 %v3182_v57, %v3182_v57  ;;  %v1896_v5 = vpop.f32.mrf.mxu2 }
 0x3d7   : > { %3438 = vst [vmem:[%s5421_s7 + $0x2c4] sm:$0xff] %v3310_v55  ;;  %v2236_v63 = vpop.f32.mrf.mxu0 }
 0x3d8   : > { %v2065_v54 = vpop.f32.mrf.mxu3  ;;  %3441 = vst [vmem:[%s5421_s7 + $0x2d8] sm:$0xf] %v3313_v35  ;;  %v2405_v4 = vpop.f32.mrf.mxu1 }
 0x3d9   : > { %v2066_v45 = vadd.f32 %v2065_v54, %v1896_v5  ;;  %v2406_v12 = vadd.f32 %v2405_v4, %v2236_v63 }
 0x3db   : > { %v3181_v25 = vadd.f32 %v5419_v49, %v2066_v45  ;;  %v3185_v11 = vadd.f32 %v5408_v38, %v2406_v12 }
 0x3dd   : > { %v3312_v33 = vpack.c.bf16 %v3181_v25, %v3180_v0  ;;  %v3315_v39 = vpack.c.bf16 %v3185_v11, %v3185_v11  ;;  %v1898_v19 = vpop.f32.mrf.mxu2 }
 0x3df   : > { %3440 = vst [vmem:[%s5421_s7 + $0x2d0] sm:$0xff] %v3312_v33  ;;  %v2239_v59 = vpop.f32.mrf.mxu0 }
 0x3e0   : > { %v2067_v44 = vpop.f32.mrf.mxu3  ;;  %3443 = vst [vmem:[%s5421_s7 + $0x2e4] sm:$0xf] %v3315_v39  ;;  %v2408_v21 = vpop.f32.mrf.mxu1 }
 0x3e1   : > { %v2068_v46 = vadd.f32 %v2067_v44, %v1898_v19  ;;  %v2409_v28 = vadd.f32 %v2408_v21, %v2239_v59 }
 0x3e3   : > { %v3184_v23 = vadd.f32 %v5419_v49, %v2068_v46  ;;  %v3188_v9 = vadd.f32 %v5408_v38, %v2409_v28 }
 0x3e5   : > { %v3314_v27 = vpack.c.bf16 %v3184_v23, %v3183_v1  ;;  %v3317_v52 = vpack.c.bf16 %v3188_v9, %v3188_v9  ;;  %v1901_v20 = vpop.f32.mrf.mxu2 }
 0x3e7   : > { %3442 = vst [vmem:[%s5421_s7 + $0x2dc] sm:$0xff] %v3314_v27  ;;  %v2241_v18 = vpop.f32.mrf.mxu0 }
 0x3e8   : > { %v2070_v13 = vpop.f32.mrf.mxu3  ;;  %3445 = vst [vmem:[%s5421_s7 + $0x2f0] sm:$0xf] %v3317_v52  ;;  %v2410_v30 = vpop.f32.mrf.mxu1 }
 0x3e9   : > { %v2071_v31 = vadd.f32 %v2070_v13, %v1901_v20  ;;  %v2411_v36 = vadd.f32 %v2410_v30, %v2241_v18 }
 0x3eb   : > { %v3187_v41 = vadd.f32 %v5419_v49, %v2071_v31  ;;  %v3191_v10 = vadd.f32 %v5408_v38, %v2411_v36 }
 0x3ed   : > { %v3316_v53 = vpack.c.bf16 %v3187_v41, %v3186_v7  ;;  %v3319_v56 = vpack.c.bf16 %v3191_v10, %v3191_v10  ;;  %v1903_v22 = vpop.f32.mrf.mxu2 }
 0x3ef   : > { %3444 = vst [vmem:[%s5421_s7 + $0x2e8] sm:$0xff] %v3316_v53 }
 0x3f0   : > { %v2072_v14 = vpop.f32.mrf.mxu3  ;;  %3447 = vst [vmem:[%s5421_s7 + $0x2fc] sm:$0xf] %v3319_v56 }
 0x3f1   : > { %v2073_v32 = vadd.f32 %v2072_v14, %v1903_v22 }
 0x3f3   : > { %v3190_v61 = vadd.f32 %v5419_v49, %v2073_v32 }
 0x3f5   : > { %v3318_v38 = vpack.c.bf16 %v3190_v61, %v3189_v60 }
 0x3f7   : > { %3446 = vst [vmem:[%s5421_s7 + $0x2f4] sm:$0xff] %v3318_v38 }
 0x3f8   : > { %4468 = shalt.err (!%p4465_p9)
}
 0x3f9   : > { %s4598_s9 = smov 192   ;;  %s4599_s10 = smov 384  }
 0x3fa   : > { %s4600_s6 = smov 12  }
 0x3fb   : > { %4213 = dma.vmem_to_hbm [thread:$0]  (%p4782_p2), %s3465_s3, 12288, %s3467_s12, %s3449_s14, %s4598_s9, %s4599_s10, %s4600_s6  }
 0x3fc PF: > { %s6200_s7 = sld [smem:[#allocation13_spill]]  ;;  %p4230_p10 = scmp.ge.s32.totalorder %s4591_s25, 2 }
 0x3fe   : > { %p4226_p11 = pnand %p4230_p10, %p4789_p6 }
 0x400   : > { %p4227_p12 = pneg %p4226_p11 }
 0x402   : > { %s3481_s11 = sand.u32 1, %s6200_s7  }
 0x403   : > { %s3482_s27 = scalar_lea.sflag [#allocation5], %s3481_s11 }
 0x404   : > { %4534 = dma.done.wait (%p4227_p12), %s3482_s27, 12288  }
 0x405   : > { %4536 = vsyncadd (%p4227_p12), %s3482_s27, 4294955008  ;;  %s22_s25 = sadd.s32 1, %s4591_s25   ;;  %s6203_s21 = sld [smem:[#allocation14_spill]] }
 0x406   : > { %p5921_p13 = scmp.ge.s32.totalorder %s22_s25, 6   ;;  %s6204_s14 = sld [smem:[#allocation22_spill]] }
 0x407   : > { %s6205_s1 = sld [smem:[#allocation20_spill]]  ;;  %s6211_s12 = smov %s4543_s13 }
 0x408   : > { %s6206_s4 = sld [smem:[#allocation15_spill]]  ;;  %s6213_s15 = smov %s4555_s16 }
 0x409   : > { %s6207_s20 = sld [smem:[#allocation21_spill]]  ;;  %s6214_s16 = smov %s4559_s17 }
 0x40a   : > { %s6208_s22 = sld [smem:[#allocation17_spill]]  ;;  %s6216_s18 = smov %s4567_s19 }
 0x40b   : > { %s6209_s3 = sld [smem:[#allocation18_spill]]  ;;  %s6212_s13 = smov %s6203_s21 }
 0x40c   : > { %s6210_s24 = sld [smem:[#allocation19_spill]]  ;;  %s6218_s21 = smov %s4583_s23 }
 0x40d   : > { %s6215_s17 = smov %s6205_s1  ;;  %21 = sbr.rel (!%p5921_p13) target bundleno = 16 (0x10), region = 109 }
 0x40e   : > { %s6217_s19 = smov %s6206_s4 }
 0x411   : > { %s6219_s23 = smov %s6209_s3 }
 0x412   :  { %3488 = vsyncpa [#allocation4], 1 }
 0x413   :  { %3490 = vsyncpa [#allocation4 + $0x1], 1 }
 0x414   :  { %3491 = vsyncpa [#allocation7], 1 }
 0x415   :  { %3493 = vsyncpa [#allocation7 + $0x1], 1 }
 0x416   :  { %3494 = vsyncpa [#allocation5], 1 }
 0x417   :  { %3496 = vsyncpa [#allocation5 + $0x1], 1 }

</bundles_post_ra>
